<compile_context>
chip_gen: v7x
topology: tpu7x:2x2x1
jax: 0.10.0
libtpu: 0.0.40
codegen_flags: <defaults>
</compile_context>

<pallas_src>
import functools

import jax
import jax.numpy as jnp
from jax.experimental import pallas as pl
from jax.experimental.pallas import tpu as pltpu


def _round_up(x, m):
    return ((x + m - 1) // m) * m


def _pad2(a, rows, cols):
    return jnp.pad(a.astype(jnp.float32),
                   ((0, rows - a.shape[0]), (0, cols - a.shape[1])))


def _pad3(a, rows, cols):
    return jnp.pad(a.astype(jnp.float32),
                   ((0, 0), (0, rows - a.shape[1]), (0, cols - a.shape[2])))


# --------------------------------------------------------------------------- #
# Kernel
# --------------------------------------------------------------------------- #
def vae_kernel(num_hid_layers, lat_pad,
               x_ref, eps_ref,
               ew_ref, eb_ref, ehw_ref, ehb_ref,
               mulvw_ref, mulvb_ref,
               dw_ref, db_ref, dhw_ref, dhb_ref, dow_ref, dob_ref,
               recon_ref, mulv_ref):
    f32 = jnp.float32

    # ---------------- encoder ----------------
    h = jnp.tanh(jnp.dot(x_ref[...], ew_ref[...], preferred_element_type=f32)
                 + eb_ref[...])
    for i in range(num_hid_layers - 1):                      # static unroll
        h = jnp.tanh(jnp.dot(h, ehw_ref[i], preferred_element_type=f32)
                     + ehb_ref[i])

    # Fused mu / logvar head: one MXU pass, lane-dense (2*lat_pad wide) result.
    mulv = jnp.dot(h, mulvw_ref[...], preferred_element_type=f32) + mulvb_ref[...]
    mu = mulv[:, :lat_pad]
    logvar = mulv[:, lat_pad:]

    # ------------- reparameterize -------------
    # eps ~ N(0, 1) is generated deterministically in the wrapper and passed in
    # (padded latent columns of eps are zero, so padded z columns stay zero).
    z = mu + eps_ref[...] * jnp.exp(0.5 * logvar)

    # ---------------- decoder ----------------
    h = jnp.tanh(jnp.dot(z, dw_ref[...], preferred_element_type=f32) + db_ref[...])
    for i in range(num_hid_layers - 1):                      # static unroll
        h = jnp.tanh(jnp.dot(h, dhw_ref[i], preferred_element_type=f32)
                     + dhb_ref[i])

    recon_ref[...] = jnp.exp(jnp.dot(h, dow_ref[...], preferred_element_type=f32)
                             + dob_ref[...])
    mulv_ref[...] = mulv                                      # mu || logvar slab


# --------------------------------------------------------------------------- #
# Wrapper
# --------------------------------------------------------------------------- #
def vae_forward(params, x, eps, *, num_hid_layers, batch_tile=None):
    B, D = x.shape
    hid = params["enc_in_w"].shape[1]
    lat = params["mu_w"].shape[1]
    n_hid = num_hid_layers - 1
    f32 = jnp.float32

    # Lane-dense padding of every feature dim to a multiple of 128.
    D_pad = _round_up(D, 128)
    H_pad = _round_up(hid, 128)
    L_pad = _round_up(lat, 128)

    # Batch tiling: large tiles fill the MXU / amortize ~0.35us per grid step.
    if batch_tile is None:
        batch_tile = min(256, _round_up(B, 8))
    batch_tile = _round_up(batch_tile, 8)
    B_pad = _round_up(B, batch_tile)               # pad batch instead of asserting
    grid = (B_pad // batch_tile,)

    # ---- wrapper-side layout plumbing: zero-pad inputs & weights ------------
    x_p = jnp.pad(x.astype(f32), ((0, B_pad - B), (0, D_pad - D)))
    eps_p = jnp.pad(eps.astype(f32), ((0, B_pad - B), (0, L_pad - lat)))

    ew = _pad2(params["enc_in_w"], D_pad, H_pad)
    eb = _pad2(params["enc_in_b"], 1, H_pad)
    if n_hid > 0:
        ehw = _pad3(params["enc_h_w"], H_pad, H_pad)
        ehb = _pad3(params["enc_h_b"], 1, H_pad)
        dhw = _pad3(params["dec_h_w"], H_pad, H_pad)
        dhb = _pad3(params["dec_h_b"], 1, H_pad)
    else:  # dummy single layer, never indexed (loop range is empty)
        ehw = jnp.zeros((1, H_pad, H_pad), f32)
        ehb = jnp.zeros((1, 1, H_pad), f32)
        dhw = jnp.zeros((1, H_pad, H_pad), f32)
        dhb = jnp.zeros((1, 1, H_pad), f32)
    # Fuse mu/logvar heads: (H_pad, 2*L_pad) weight, (1, 2*L_pad) bias.
    mulvw = jnp.concatenate([_pad2(params["mu_w"], H_pad, L_pad),
                             _pad2(params["logvar_w"], H_pad, L_pad)], axis=1)
    mulvb = jnp.concatenate([_pad2(params["mu_b"], 1, L_pad),
                             _pad2(params["logvar_b"], 1, L_pad)], axis=1)
    dw = _pad2(params["dec_in_w"], L_pad, H_pad)
    db = _pad2(params["dec_in_b"], 1, H_pad)
    dow = _pad2(params["dec_out_w"], H_pad, D_pad)
    dob = _pad2(params["dec_out_b"], 1, D_pad)

    weights = (ew, eb, ehw, ehb, mulvw, mulvb, dw, db, dhw, dhb, dow, dob)
    # TODO(synk): all (padded) weights are kept VMEM-resident; for hid_dim >= ~1024
    # the stacked hidden weights should be blocked over the layer axis instead.

    def row_spec(feat):
        return pl.BlockSpec((batch_tile, feat), lambda i: (i, 0))

    def weight_spec(a, buffer_count):
        idx = lambda i, _nd=a.ndim: (0,) * _nd     # constant block across the grid
        if buffer_count == 1:
            return pl.BlockSpec(a.shape, idx, pipeline_mode=pl.Buffered(1))
        return pl.BlockSpec(a.shape, idx)

    out_shape = (
        jax.ShapeDtypeStruct((B_pad, D_pad), f32),       # recon (padded)
        jax.ShapeDtypeStruct((B_pad, 2 * L_pad), f32),   # mu || logvar slab
    )
    out_specs = [row_spec(D_pad), row_spec(2 * L_pad)]

    kernel = functools.partial(vae_kernel, num_hid_layers, L_pad)

    # Explicit VMEM budget (portable to v7x's 64 MiB ceiling).
    weight_bytes = sum(int(w.size) * 4 for w in weights)
    io_tile_bytes = 4 * batch_tile * (D_pad + L_pad + D_pad + 2 * L_pad)
    act_bytes = 8 * 4 * batch_tile * max(H_pad, D_pad, 2 * L_pad)

    def run(weight_bufs):
        vmem_need = weight_bufs * weight_bytes + 2 * io_tile_bytes + act_bytes
        vmem_limit = int(min(max(int(vmem_need * 1.5), 32 * 1024 * 1024),
                             64 * 1024 * 1024))
        in_specs = [row_spec(D_pad), row_spec(L_pad)] + [
            weight_spec(w, weight_bufs) for w in weights]
        return pl.pallas_call(
            kernel,
            out_shape=out_shape,
            grid_spec=pltpu.PrefetchScalarGridSpec(
                num_scalar_prefetch=0,
                grid=grid,
                in_specs=in_specs,
                out_specs=out_specs,
            ),
            compiler_params=pltpu.CompilerParams(
                dimension_semantics=("parallel",),
                vmem_limit_bytes=vmem_limit,
            ),
        )(x_p, eps_p, *weights)

    try:
        recon_p, mulv_p = run(1)      # single-buffered constant weights
    except Exception:                 # Buffered(1) unsupported -> default pipelining
        recon_p, mulv_p = run(2)

    recon = recon_p[:B, :D]
    mu = mulv_p[:B, :lat]
    logvar = mulv_p[:B, L_pad:L_pad + lat]
    return recon, mu, logvar


# --------------------------------------------------------------------------- #
# Params / reference
# --------------------------------------------------------------------------- #
def init_params(key, in_out_dim, hid_dim, latent_dim, num_hid_layers):
    """Deterministic init mimicking torch.nn.Linear's U(-1/sqrt(fan_in), ...).
    Weights stored pre-transposed as (in_features, out_features)."""
    n_hid = num_hid_layers - 1

    def linear(key, fan_in, fan_out):
        kw, kb = jax.random.split(key)
        bound = 1.0 / jnp.sqrt(fan_in)
        w = jax.random.uniform(kw, (fan_in, fan_out), jnp.float32, -bound, bound)
        b = jax.random.uniform(kb, (1, fan_out), jnp.float32, -bound, bound)
        return w, b

    keys = jax.random.split(key, 6 + 2 * max(n_hid, 1))
    ki = iter(keys)

    params = {}
    params["enc_in_w"], params["enc_in_b"] = linear(next(ki), in_out_dim, hid_dim)

    ehw, ehb = [], []
    for _ in range(n_hid):
        w, b = linear(next(ki), hid_dim, hid_dim)
        ehw.append(w)
        ehb.append(b)
    if n_hid > 0:
        params["enc_h_w"] = jnp.stack(ehw)           # (n_hid, hid, hid)
        params["enc_h_b"] = jnp.stack(ehb)           # (n_hid, 1, hid)

    params["mu_w"], params["mu_b"] = linear(next(ki), hid_dim, latent_dim)
    params["logvar_w"], params["logvar_b"] = linear(next(ki), hid_dim, latent_dim)
    params["dec_in_w"], params["dec_in_b"] = linear(next(ki), latent_dim, hid_dim)

    dhw, dhb = [], []
    for _ in range(n_hid):
        w, b = linear(next(ki), hid_dim, hid_dim)
        dhw.append(w)
        dhb.append(b)
    if n_hid > 0:
        params["dec_h_w"] = jnp.stack(dhw)
        params["dec_h_b"] = jnp.stack(dhb)

    params["dec_out_w"], params["dec_out_b"] = linear(next(ki), hid_dim, in_out_dim)
    return params


def vae_reference(params, x, eps, *, num_hid_layers):
    """Pure-JAX reference of the same forward pass (for validation)."""
    h = jnp.tanh(x @ params["enc_in_w"] + params["enc_in_b"])
    for i in range(num_hid_layers - 1):
        h = jnp.tanh(h @ params["enc_h_w"][i] + params["enc_h_b"][i])
    mu = h @ params["mu_w"] + params["mu_b"]
    logvar = h @ params["logvar_w"] + params["logvar_b"]
    z = mu + eps * jnp.exp(0.5 * logvar)
    h = jnp.tanh(z @ params["dec_in_w"] + params["dec_in_b"])
    for i in range(num_hid_layers - 1):
        h = jnp.tanh(h @ params["dec_h_w"][i] + params["dec_h_b"][i])
    recon = jnp.exp(h @ params["dec_out_w"] + params["dec_out_b"])
    return recon, mu, logvar


if __name__ == "__main__":
    # Small shapes consistent with the module's forward: x is (batch, in_out_dim).
    IN_OUT_DIM = 32
    HID_DIM = 64
    LATENT_DIM = 16
    NUM_HID_LAYERS = 3
    BATCH = 24          # deliberately NOT a multiple of the tile -> exercises padding

    key = jax.random.PRNGKey(0)
    kp, kx, ke = jax.random.split(key, 3)

    params = init_params(kp, IN_OUT_DIM, HID_DIM, LATENT_DIM, NUM_HID_LAYERS)
    x = jax.random.normal(kx, (BATCH, IN_OUT_DIM), jnp.float32)
    # Deterministic stand-in for torch.randn_like in reparameterize.
    eps = jax.random.normal(ke, (BATCH, LATENT_DIM), jnp.float32)

    # batch_tile=16 -> grid of 2 steps (exercises the tiled path at small scale);
    # for real workloads leave batch_tile=None (auto: up to 256 rows per step).
    recon, mu, logvar = vae_forward(
        params, x, eps, num_hid_layers=NUM_HID_LAYERS, batch_tile=16)
    jax.block_until_ready((recon, mu, logvar))

    r_ref, mu_ref, lv_ref = vae_reference(
        params, x, eps, num_hid_layers=NUM_HID_LAYERS)

    assert recon.shape == (BATCH, IN_OUT_DIM)
    assert mu.shape == (BATCH, LATENT_DIM)
    assert logvar.shape == (BATCH, LATENT_DIM)
    assert jnp.allclose(recon, r_ref, rtol=1e-3, atol=1e-3)
    assert jnp.allclose(mu, mu_ref, rtol=1e-3, atol=1e-3)
    assert jnp.allclose(logvar, lv_ref, rtol=1e-3, atol=1e-3)

    print("KERNEL_OK")
</pallas_src>

<mosaic_0001>
module attributes {stable_mosaic.version = 11 : i64} {
  func.func @vae_kernel(%arg0: i32, %arg1: memref<16x128xf32, #tpu.memory_space<vmem>>, %arg2: memref<16x128xf32, #tpu.memory_space<vmem>>, %arg3: memref<128x128xf32, #tpu.memory_space<vmem>>, %arg4: memref<1x128xf32, #tpu.memory_space<vmem>>, %arg5: memref<2x128x128xf32, #tpu.memory_space<vmem>>, %arg6: memref<2x1x128xf32, #tpu.memory_space<vmem>>, %arg7: memref<128x256xf32, #tpu.memory_space<vmem>>, %arg8: memref<1x256xf32, #tpu.memory_space<vmem>>, %arg9: memref<128x128xf32, #tpu.memory_space<vmem>>, %arg10: memref<1x128xf32, #tpu.memory_space<vmem>>, %arg11: memref<2x128x128xf32, #tpu.memory_space<vmem>>, %arg12: memref<2x1x128xf32, #tpu.memory_space<vmem>>, %arg13: memref<128x128xf32, #tpu.memory_space<vmem>>, %arg14: memref<1x128xf32, #tpu.memory_space<vmem>>, %arg15: memref<16x128xf32, #tpu.memory_space<vmem>>, %arg16: memref<16x256xf32, #tpu.memory_space<vmem>>) attributes {dimension_semantics = [#tpu.dimension_semantics<parallel>], iteration_bounds = array<i64: 2>, scalar_prefetch = 0 : i64, scratch_operands = 0 : i64, tpu.core_type = #tpu.core_type<tc>, window_params = [{transform_indices = @transform_0, window_bounds = array<i64: 16, 128>}, {transform_indices = @transform_1, window_bounds = array<i64: 16, 128>}, {pipeline_mode = #tpu.pipeline_mode<synchronous>, transform_indices = @transform_2, window_bounds = array<i64: 128, 128>}, {pipeline_mode = #tpu.pipeline_mode<synchronous>, transform_indices = @transform_3, window_bounds = array<i64: 1, 128>}, {pipeline_mode = #tpu.pipeline_mode<synchronous>, transform_indices = @transform_4, window_bounds = array<i64: 2, 128, 128>}, {pipeline_mode = #tpu.pipeline_mode<synchronous>, transform_indices = @transform_5, window_bounds = array<i64: 2, 1, 128>}, {pipeline_mode = #tpu.pipeline_mode<synchronous>, transform_indices = @transform_6, window_bounds = array<i64: 128, 256>}, {pipeline_mode = #tpu.pipeline_mode<synchronous>, transform_indices = @transform_7, window_bounds = array<i64: 1, 256>}, {pipeline_mode = #tpu.pipeline_mode<synchronous>, transform_indices = @transform_8, window_bounds = array<i64: 128, 128>}, {pipeline_mode = #tpu.pipeline_mode<synchronous>, transform_indices = @transform_9, window_bounds = array<i64: 1, 128>}, {pipeline_mode = #tpu.pipeline_mode<synchronous>, transform_indices = @transform_10, window_bounds = array<i64: 2, 128, 128>}, {pipeline_mode = #tpu.pipeline_mode<synchronous>, transform_indices = @transform_11, window_bounds = array<i64: 2, 1, 128>}, {pipeline_mode = #tpu.pipeline_mode<synchronous>, transform_indices = @transform_12, window_bounds = array<i64: 128, 128>}, {pipeline_mode = #tpu.pipeline_mode<synchronous>, transform_indices = @transform_13, window_bounds = array<i64: 1, 128>}, {transform_indices = @transform_14, window_bounds = array<i64: 16, 128>}, {transform_indices = @transform_15, window_bounds = array<i64: 16, 256>}]} {
    %c0 = arith.constant 0 : index
    %c0_0 = arith.constant 0 : index
    %0 = vector.load %arg1[%c0, %c0_0] : memref<16x128xf32, #tpu.memory_space<vmem>>, vector<16x128xf32>
    %c0_1 = arith.constant 0 : index
    %c0_2 = arith.constant 0 : index
    %1 = vector.load %arg3[%c0_1, %c0_2] : memref<128x128xf32, #tpu.memory_space<vmem>>, vector<128x128xf32>
    %cst = arith.constant dense<0.000000e+00> : vector<16x128xf32>
    %2 = tpu.matmul %0, %1, %cst {dimension_numbers = #tpu.dot_dimension_numbers<[1], [0], [0], [1], [0, 0, 1, 1], [], []>} : vector<16x128xf32>, vector<128x128xf32>, vector<16x128xf32> -> vector<16x128xf32>
    %c0_3 = arith.constant 0 : index
    %c0_4 = arith.constant 0 : index
    %3 = vector.load %arg4[%c0_3, %c0_4] : memref<1x128xf32, #tpu.memory_space<vmem>>, vector<1x128xf32>
    %4 = vector.broadcast %3 : vector<1x128xf32> to vector<16x128xf32>
    %5 = arith.addf %2, %4 : vector<16x128xf32>
    %6 = math.tanh %5 : vector<16x128xf32>
    %c0_5 = arith.constant 0 : index
    %c0_6 = arith.constant 0 : index
    %c0_7 = arith.constant 0 : index
    %7 = vector.load %arg5[%c0_5, %c0_6, %c0_7] : memref<2x128x128xf32, #tpu.memory_space<vmem>>, vector<1x128x128xf32>
    %8 = vector.shape_cast %7 : vector<1x128x128xf32> to vector<128x128xf32>
    %cst_8 = arith.constant dense<0.000000e+00> : vector<16x128xf32>
    %9 = tpu.matmul %6, %8, %cst_8 {dimension_numbers = #tpu.dot_dimension_numbers<[1], [0], [0], [1], [0, 0, 1, 1], [], []>} : vector<16x128xf32>, vector<128x128xf32>, vector<16x128xf32> -> vector<16x128xf32>
    %c0_9 = arith.constant 0 : index
    %c0_10 = arith.constant 0 : index
    %c0_11 = arith.constant 0 : index
    %10 = vector.load %arg6[%c0_9, %c0_10, %c0_11] : memref<2x1x128xf32, #tpu.memory_space<vmem>>, vector<1x1x128xf32>
    %11 = vector.shape_cast %10 : vector<1x1x128xf32> to vector<1x128xf32>
    %12 = vector.broadcast %11 : vector<1x128xf32> to vector<16x128xf32>
    %13 = arith.addf %9, %12 : vector<16x128xf32>
    %14 = math.tanh %13 : vector<16x128xf32>
    %c1 = arith.constant 1 : index
    %c0_12 = arith.constant 0 : index
    %c0_13 = arith.constant 0 : index
    %15 = vector.load %arg5[%c1, %c0_12, %c0_13] : memref<2x128x128xf32, #tpu.memory_space<vmem>>, vector<1x128x128xf32>
    %16 = vector.shape_cast %15 : vector<1x128x128xf32> to vector<128x128xf32>
    %cst_14 = arith.constant dense<0.000000e+00> : vector<16x128xf32>
    %17 = tpu.matmul %14, %16, %cst_14 {dimension_numbers = #tpu.dot_dimension_numbers<[1], [0], [0], [1], [0, 0, 1, 1], [], []>} : vector<16x128xf32>, vector<128x128xf32>, vector<16x128xf32> -> vector<16x128xf32>
    %c1_15 = arith.constant 1 : index
    %c0_16 = arith.constant 0 : index
    %c0_17 = arith.constant 0 : index
    %18 = vector.load %arg6[%c1_15, %c0_16, %c0_17] : memref<2x1x128xf32, #tpu.memory_space<vmem>>, vector<1x1x128xf32>
    %19 = vector.shape_cast %18 : vector<1x1x128xf32> to vector<1x128xf32>
    %20 = vector.broadcast %19 : vector<1x128xf32> to vector<16x128xf32>
    %21 = arith.addf %17, %20 : vector<16x128xf32>
    %22 = math.tanh %21 : vector<16x128xf32>
    %c0_18 = arith.constant 0 : index
    %c0_19 = arith.constant 0 : index
    %23 = vector.load %arg7[%c0_18, %c0_19] : memref<128x256xf32, #tpu.memory_space<vmem>>, vector<128x256xf32>
    %cst_20 = arith.constant dense<0.000000e+00> : vector<16x256xf32>
    %24 = tpu.matmul %22, %23, %cst_20 {dimension_numbers = #tpu.dot_dimension_numbers<[1], [0], [0], [1], [0, 0, 1, 1], [], []>} : vector<16x128xf32>, vector<128x256xf32>, vector<16x256xf32> -> vector<16x256xf32>
    %c0_21 = arith.constant 0 : index
    %c0_22 = arith.constant 0 : index
    %25 = vector.load %arg8[%c0_21, %c0_22] : memref<1x256xf32, #tpu.memory_space<vmem>>, vector<1x256xf32>
    %26 = vector.broadcast %25 : vector<1x256xf32> to vector<16x256xf32>
    %27 = arith.addf %24, %26 : vector<16x256xf32>
    %28 = vector.extract_strided_slice %27 {offsets = [0, 0], sizes = [16, 128], strides = [1, 1]} : vector<16x256xf32> to vector<16x128xf32>
    %29 = vector.extract_strided_slice %27 {offsets = [0, 128], sizes = [16, 128], strides = [1, 1]} : vector<16x256xf32> to vector<16x128xf32>
    %c0_23 = arith.constant 0 : index
    %c0_24 = arith.constant 0 : index
    %30 = vector.load %arg2[%c0_23, %c0_24] : memref<16x128xf32, #tpu.memory_space<vmem>>, vector<16x128xf32>
    %cst_25 = arith.constant 5.000000e-01 : f32
    %31 = vector.broadcast %cst_25 : f32 to vector<16x128xf32>
    %32 = arith.mulf %31, %29 : vector<16x128xf32>
    %33 = math.exp %32 : vector<16x128xf32>
    %34 = arith.mulf %30, %33 : vector<16x128xf32>
    %35 = arith.addf %28, %34 : vector<16x128xf32>
    %c0_26 = arith.constant 0 : index
    %c0_27 = arith.constant 0 : index
    %36 = vector.load %arg9[%c0_26, %c0_27] : memref<128x128xf32, #tpu.memory_space<vmem>>, vector<128x128xf32>
    %cst_28 = arith.constant dense<0.000000e+00> : vector<16x128xf32>
    %37 = tpu.matmul %35, %36, %cst_28 {dimension_numbers = #tpu.dot_dimension_numbers<[1], [0], [0], [1], [0, 0, 1, 1], [], []>} : vector<16x128xf32>, vector<128x128xf32>, vector<16x128xf32> -> vector<16x128xf32>
    %c0_29 = arith.constant 0 : index
    %c0_30 = arith.constant 0 : index
    %38 = vector.load %arg10[%c0_29, %c0_30] : memref<1x128xf32, #tpu.memory_space<vmem>>, vector<1x128xf32>
    %39 = vector.broadcast %38 : vector<1x128xf32> to vector<16x128xf32>
    %40 = arith.addf %37, %39 : vector<16x128xf32>
    %41 = math.tanh %40 : vector<16x128xf32>
    %c0_31 = arith.constant 0 : index
    %c0_32 = arith.constant 0 : index
    %c0_33 = arith.constant 0 : index
    %42 = vector.load %arg11[%c0_31, %c0_32, %c0_33] : memref<2x128x128xf32, #tpu.memory_space<vmem>>, vector<1x128x128xf32>
    %43 = vector.shape_cast %42 : vector<1x128x128xf32> to vector<128x128xf32>
    %cst_34 = arith.constant dense<0.000000e+00> : vector<16x128xf32>
    %44 = tpu.matmul %41, %43, %cst_34 {dimension_numbers = #tpu.dot_dimension_numbers<[1], [0], [0], [1], [0, 0, 1, 1], [], []>} : vector<16x128xf32>, vector<128x128xf32>, vector<16x128xf32> -> vector<16x128xf32>
    %c0_35 = arith.constant 0 : index
    %c0_36 = arith.constant 0 : index
    %c0_37 = arith.constant 0 : index
    %45 = vector.load %arg12[%c0_35, %c0_36, %c0_37] : memref<2x1x128xf32, #tpu.memory_space<vmem>>, vector<1x1x128xf32>
    %46 = vector.shape_cast %45 : vector<1x1x128xf32> to vector<1x128xf32>
    %47 = vector.broadcast %46 : vector<1x128xf32> to vector<16x128xf32>
    %48 = arith.addf %44, %47 : vector<16x128xf32>
    %49 = math.tanh %48 : vector<16x128xf32>
    %c1_38 = arith.constant 1 : index
    %c0_39 = arith.constant 0 : index
    %c0_40 = arith.constant 0 : index
    %50 = vector.load %arg11[%c1_38, %c0_39, %c0_40] : memref<2x128x128xf32, #tpu.memory_space<vmem>>, vector<1x128x128xf32>
    %51 = vector.shape_cast %50 : vector<1x128x128xf32> to vector<128x128xf32>
    %cst_41 = arith.constant dense<0.000000e+00> : vector<16x128xf32>
    %52 = tpu.matmul %49, %51, %cst_41 {dimension_numbers = #tpu.dot_dimension_numbers<[1], [0], [0], [1], [0, 0, 1, 1], [], []>} : vector<16x128xf32>, vector<128x128xf32>, vector<16x128xf32> -> vector<16x128xf32>
    %c1_42 = arith.constant 1 : index
    %c0_43 = arith.constant 0 : index
    %c0_44 = arith.constant 0 : index
    %53 = vector.load %arg12[%c1_42, %c0_43, %c0_44] : memref<2x1x128xf32, #tpu.memory_space<vmem>>, vector<1x1x128xf32>
    %54 = vector.shape_cast %53 : vector<1x1x128xf32> to vector<1x128xf32>
    %55 = vector.broadcast %54 : vector<1x128xf32> to vector<16x128xf32>
    %56 = arith.addf %52, %55 : vector<16x128xf32>
    %57 = math.tanh %56 : vector<16x128xf32>
    %c0_45 = arith.constant 0 : index
    %c0_46 = arith.constant 0 : index
    %58 = vector.load %arg13[%c0_45, %c0_46] : memref<128x128xf32, #tpu.memory_space<vmem>>, vector<128x128xf32>
    %cst_47 = arith.constant dense<0.000000e+00> : vector<16x128xf32>
    %59 = tpu.matmul %57, %58, %cst_47 {dimension_numbers = #tpu.dot_dimension_numbers<[1], [0], [0], [1], [0, 0, 1, 1], [], []>} : vector<16x128xf32>, vector<128x128xf32>, vector<16x128xf32> -> vector<16x128xf32>
    %c0_48 = arith.constant 0 : index
    %c0_49 = arith.constant 0 : index
    %60 = vector.load %arg14[%c0_48, %c0_49] : memref<1x128xf32, #tpu.memory_space<vmem>>, vector<1x128xf32>
    %61 = vector.broadcast %60 : vector<1x128xf32> to vector<16x128xf32>
    %62 = arith.addf %59, %61 : vector<16x128xf32>
    %63 = math.exp %62 : vector<16x128xf32>
    %c0_50 = arith.constant 0 : index
    %c0_51 = arith.constant 0 : index
    %64 = vector.load %arg15[%c0_50, %c0_51] : memref<16x128xf32, #tpu.memory_space<vmem>>, vector<16x128xf32>
    tpu.vector_store %arg15[%c0_50, %c0_51], %63 {strides = array<i32>} : memref<16x128xf32, #tpu.memory_space<vmem>>, vector<16x128xf32>,
    %c0_52 = arith.constant 0 : index
    %c0_53 = arith.constant 0 : index
    %65 = vector.load %arg16[%c0_52, %c0_53] : memref<16x256xf32, #tpu.memory_space<vmem>>, vector<16x256xf32>
    tpu.vector_store %arg16[%c0_52, %c0_53], %27 {strides = array<i32>} : memref<16x256xf32, #tpu.memory_space<vmem>>, vector<16x256xf32>,
    return
  }
  func.func @transform_0(%arg0: i32) -> (i32, i32) {
    %c0_i32 = arith.constant 0 : i32
    %c0_i32_0 = arith.constant 0 : i32
    return %arg0, %c0_i32 : i32, i32
  }
  func.func @transform_1(%arg0: i32) -> (i32, i32) {
    %c0_i32 = arith.constant 0 : i32
    %c0_i32_0 = arith.constant 0 : i32
    return %arg0, %c0_i32 : i32, i32
  }
  func.func @transform_2(%arg0: i32) -> (i32, i32) {
    %c0_i32 = arith.constant 0 : i32
    %c0_i32_0 = arith.constant 0 : i32
    %c0_i32_1 = arith.constant 0 : i32
    return %c0_i32, %c0_i32_0 : i32, i32
  }
  func.func @transform_3(%arg0: i32) -> (i32, i32) {
    %c0_i32 = arith.constant 0 : i32
    %c0_i32_0 = arith.constant 0 : i32
    %c0_i32_1 = arith.constant 0 : i32
    return %c0_i32, %c0_i32_0 : i32, i32
  }
  func.func @transform_4(%arg0: i32) -> (i32, i32, i32) {
    %c0_i32 = arith.constant 0 : i32
    %c0_i32_0 = arith.constant 0 : i32
    %c0_i32_1 = arith.constant 0 : i32
    %c0_i32_2 = arith.constant 0 : i32
    return %c0_i32, %c0_i32_0, %c0_i32_1 : i32, i32, i32
  }
  func.func @transform_5(%arg0: i32) -> (i32, i32, i32) {
    %c0_i32 = arith.constant 0 : i32
    %c0_i32_0 = arith.constant 0 : i32
    %c0_i32_1 = arith.constant 0 : i32
    %c0_i32_2 = arith.constant 0 : i32
    return %c0_i32, %c0_i32_0, %c0_i32_1 : i32, i32, i32
  }
  func.func @transform_6(%arg0: i32) -> (i32, i32) {
    %c0_i32 = arith.constant 0 : i32
    %c0_i32_0 = arith.constant 0 : i32
    %c0_i32_1 = arith.constant 0 : i32
    return %c0_i32, %c0_i32_0 : i32, i32
  }
  func.func @transform_7(%arg0: i32) -> (i32, i32) {
    %c0_i32 = arith.constant 0 : i32
    %c0_i32_0 = arith.constant 0 : i32
    %c0_i32_1 = arith.constant 0 : i32
    return %c0_i32, %c0_i32_0 : i32, i32
  }
  func.func @transform_8(%arg0: i32) -> (i32, i32) {
    %c0_i32 = arith.constant 0 : i32
    %c0_i32_0 = arith.constant 0 : i32
    %c0_i32_1 = arith.constant 0 : i32
    return %c0_i32, %c0_i32_0 : i32, i32
  }
  func.func @transform_9(%arg0: i32) -> (i32, i32) {
    %c0_i32 = arith.constant 0 : i32
    %c0_i32_0 = arith.constant 0 : i32
    %c0_i32_1 = arith.constant 0 : i32
    return %c0_i32, %c0_i32_0 : i32, i32
  }
  func.func @transform_10(%arg0: i32) -> (i32, i32, i32) {
    %c0_i32 = arith.constant 0 : i32
    %c0_i32_0 = arith.constant 0 : i32
    %c0_i32_1 = arith.constant 0 : i32
    %c0_i32_2 = arith.constant 0 : i32
    return %c0_i32, %c0_i32_0, %c0_i32_1 : i32, i32, i32
  }
  func.func @transform_11(%arg0: i32) -> (i32, i32, i32) {
    %c0_i32 = arith.constant 0 : i32
    %c0_i32_0 = arith.constant 0 : i32
    %c0_i32_1 = arith.constant 0 : i32
    %c0_i32_2 = arith.constant 0 : i32
    return %c0_i32, %c0_i32_0, %c0_i32_1 : i32, i32, i32
  }
  func.func @transform_12(%arg0: i32) -> (i32, i32) {
    %c0_i32 = arith.constant 0 : i32
    %c0_i32_0 = arith.constant 0 : i32
    %c0_i32_1 = arith.constant 0 : i32
    return %c0_i32, %c0_i32_0 : i32, i32
  }
  func.func @transform_13(%arg0: i32) -> (i32, i32) {
    %c0_i32 = arith.constant 0 : i32
    %c0_i32_0 = arith.constant 0 : i32
    %c0_i32_1 = arith.constant 0 : i32
    return %c0_i32, %c0_i32_0 : i32, i32
  }
  func.func @transform_14(%arg0: i32) -> (i32, i32) {
    %c0_i32 = arith.constant 0 : i32
    %c0_i32_0 = arith.constant 0 : i32
    return %arg0, %c0_i32 : i32, i32
  }
  func.func @transform_15(%arg0: i32) -> (i32, i32) {
    %c0_i32 = arith.constant 0 : i32
    %c0_i32_0 = arith.constant 0 : i32
    return %arg0, %c0_i32 : i32, i32
  }
}

module attributes {stable_mosaic.version = 11 : i64} {
  func.func @vae_kernel(%arg0: i32, %arg1: memref<16x128xf32, #tpu.memory_space<vmem>>, %arg2: memref<16x128xf32, #tpu.memory_space<vmem>>, %arg3: memref<128x128xf32, #tpu.memory_space<vmem>>, %arg4: memref<1x128xf32, #tpu.memory_space<vmem>>, %arg5: memref<2x128x128xf32, #tpu.memory_space<vmem>>, %arg6: memref<2x1x128xf32, #tpu.memory_space<vmem>>, %arg7: memref<128x256xf32, #tpu.memory_space<vmem>>, %arg8: memref<1x256xf32, #tpu.memory_space<vmem>>, %arg9: memref<128x128xf32, #tpu.memory_space<vmem>>, %arg10: memref<1x128xf32, #tpu.memory_space<vmem>>, %arg11: memref<2x128x128xf32, #tpu.memory_space<vmem>>, %arg12: memref<2x1x128xf32, #tpu.memory_space<vmem>>, %arg13: memref<128x128xf32, #tpu.memory_space<vmem>>, %arg14: memref<1x128xf32, #tpu.memory_space<vmem>>, %arg15: memref<16x128xf32, #tpu.memory_space<vmem>>, %arg16: memref<16x256xf32, #tpu.memory_space<vmem>>) attributes {dimension_semantics = [#tpu.dimension_semantics<parallel>], iteration_bounds = array<i64: 2>, scalar_prefetch = 0 : i64, scratch_operands = 0 : i64, tpu.core_type = #tpu.core_type<tc>, window_params = [{transform_indices = @transform_0, window_bounds = array<i64: 16, 128>}, {transform_indices = @transform_1, window_bounds = array<i64: 16, 128>}, {pipeline_mode = #tpu.pipeline_mode<synchronous>, transform_indices = @transform_2, window_bounds = array<i64: 128, 128>}, {pipeline_mode = #tpu.pipeline_mode<synchronous>, transform_indices = @transform_3, window_bounds = array<i64: 1, 128>}, {pipeline_mode = #tpu.pipeline_mode<synchronous>, transform_indices = @transform_4, window_bounds = array<i64: 2, 128, 128>}, {pipeline_mode = #tpu.pipeline_mode<synchronous>, transform_indices = @transform_5, window_bounds = array<i64: 2, 1, 128>}, {pipeline_mode = #tpu.pipeline_mode<synchronous>, transform_indices = @transform_6, window_bounds = array<i64: 128, 256>}, {pipeline_mode = #tpu.pipeline_mode<synchronous>, transform_indices = @transform_7, window_bounds = array<i64: 1, 256>}, {pipeline_mode = #tpu.pipeline_mode<synchronous>, transform_indices = @transform_8, window_bounds = array<i64: 128, 128>}, {pipeline_mode = #tpu.pipeline_mode<synchronous>, transform_indices = @transform_9, window_bounds = array<i64: 1, 128>}, {pipeline_mode = #tpu.pipeline_mode<synchronous>, transform_indices = @transform_10, window_bounds = array<i64: 2, 128, 128>}, {pipeline_mode = #tpu.pipeline_mode<synchronous>, transform_indices = @transform_11, window_bounds = array<i64: 2, 1, 128>}, {pipeline_mode = #tpu.pipeline_mode<synchronous>, transform_indices = @transform_12, window_bounds = array<i64: 128, 128>}, {pipeline_mode = #tpu.pipeline_mode<synchronous>, transform_indices = @transform_13, window_bounds = array<i64: 1, 128>}, {transform_indices = @transform_14, window_bounds = array<i64: 16, 128>}, {transform_indices = @transform_15, window_bounds = array<i64: 16, 256>}]} {
    %c0 = arith.constant 0 : index
    %c0_0 = arith.constant 0 : index
    %0 = vector.load %arg1[%c0, %c0_0] : memref<16x128xf32, #tpu.memory_space<vmem>>, vector<16x128xf32>
    %c0_1 = arith.constant 0 : index
    %c0_2 = arith.constant 0 : index
    %1 = vector.load %arg3[%c0_1, %c0_2] : memref<128x128xf32, #tpu.memory_space<vmem>>, vector<128x128xf32>
    %cst = arith.constant dense<0.000000e+00> : vector<16x128xf32>
    %2 = tpu.matmul %0, %1, %cst {dimension_numbers = #tpu.dot_dimension_numbers<[1], [0], [0], [1], [0, 0, 1, 1], [], []>} : vector<16x128xf32>, vector<128x128xf32>, vector<16x128xf32> -> vector<16x128xf32>
    %c0_3 = arith.constant 0 : index
    %c0_4 = arith.constant 0 : index
    %3 = vector.load %arg4[%c0_3, %c0_4] : memref<1x128xf32, #tpu.memory_space<vmem>>, vector<1x128xf32>
    %4 = vector.broadcast %3 : vector<1x128xf32> to vector<16x128xf32>
    %5 = arith.addf %2, %4 : vector<16x128xf32>
    %6 = math.tanh %5 : vector<16x128xf32>
    %c0_5 = arith.constant 0 : index
    %c0_6 = arith.constant 0 : index
    %c0_7 = arith.constant 0 : index
    %7 = vector.load %arg5[%c0_5, %c0_6, %c0_7] : memref<2x128x128xf32, #tpu.memory_space<vmem>>, vector<1x128x128xf32>
    %8 = vector.shape_cast %7 : vector<1x128x128xf32> to vector<128x128xf32>
    %cst_8 = arith.constant dense<0.000000e+00> : vector<16x128xf32>
    %9 = tpu.matmul %6, %8, %cst_8 {dimension_numbers = #tpu.dot_dimension_numbers<[1], [0], [0], [1], [0, 0, 1, 1], [], []>} : vector<16x128xf32>, vector<128x128xf32>, vector<16x128xf32> -> vector<16x128xf32>
    %c0_9 = arith.constant 0 : index
    %c0_10 = arith.constant 0 : index
    %c0_11 = arith.constant 0 : index
    %10 = vector.load %arg6[%c0_9, %c0_10, %c0_11] : memref<2x1x128xf32, #tpu.memory_space<vmem>>, vector<1x1x128xf32>
    %11 = vector.shape_cast %10 : vector<1x1x128xf32> to vector<1x128xf32>
    %12 = vector.broadcast %11 : vector<1x128xf32> to vector<16x128xf32>
    %13 = arith.addf %9, %12 : vector<16x128xf32>
    %14 = math.tanh %13 : vector<16x128xf32>
    %c1 = arith.constant 1 : index
    %c0_12 = arith.constant 0 : index
    %c0_13 = arith.constant 0 : index
    %15 = vector.load %arg5[%c1, %c0_12, %c0_13] : memref<2x128x128xf32, #tpu.memory_space<vmem>>, vector<1x128x128xf32>
    %16 = vector.shape_cast %15 : vector<1x128x128xf32> to vector<128x128xf32>
    %cst_14 = arith.constant dense<0.000000e+00> : vector<16x128xf32>
    %17 = tpu.matmul %14, %16, %cst_14 {dimension_numbers = #tpu.dot_dimension_numbers<[1], [0], [0], [1], [0, 0, 1, 1], [], []>} : vector<16x128xf32>, vector<128x128xf32>, vector<16x128xf32> -> vector<16x128xf32>
    %c1_15 = arith.constant 1 : index
    %c0_16 = arith.constant 0 : index
    %c0_17 = arith.constant 0 : index
    %18 = vector.load %arg6[%c1_15, %c0_16, %c0_17] : memref<2x1x128xf32, #tpu.memory_space<vmem>>, vector<1x1x128xf32>
    %19 = vector.shape_cast %18 : vector<1x1x128xf32> to vector<1x128xf32>
    %20 = vector.broadcast %19 : vector<1x128xf32> to vector<16x128xf32>
    %21 = arith.addf %17, %20 : vector<16x128xf32>
    %22 = math.tanh %21 : vector<16x128xf32>
    %c0_18 = arith.constant 0 : index
    %c0_19 = arith.constant 0 : index
    %23 = vector.load %arg7[%c0_18, %c0_19] : memref<128x256xf32, #tpu.memory_space<vmem>>, vector<128x256xf32>
    %cst_20 = arith.constant dense<0.000000e+00> : vector<16x256xf32>
    %24 = tpu.matmul %22, %23, %cst_20 {dimension_numbers = #tpu.dot_dimension_numbers<[1], [0], [0], [1], [0, 0, 1, 1], [], []>} : vector<16x128xf32>, vector<128x256xf32>, vector<16x256xf32> -> vector<16x256xf32>
    %c0_21 = arith.constant 0 : index
    %c0_22 = arith.constant 0 : index
    %25 = vector.load %arg8[%c0_21, %c0_22] : memref<1x256xf32, #tpu.memory_space<vmem>>, vector<1x256xf32>
    %26 = vector.broadcast %25 : vector<1x256xf32> to vector<16x256xf32>
    %27 = arith.addf %24, %26 : vector<16x256xf32>
    %28 = vector.extract_strided_slice %27 {offsets = [0, 0], sizes = [16, 128], strides = [1, 1]} : vector<16x256xf32> to vector<16x128xf32>
    %29 = vector.extract_strided_slice %27 {offsets = [0, 128], sizes = [16, 128], strides = [1, 1]} : vector<16x256xf32> to vector<16x128xf32>
    %c0_23 = arith.constant 0 : index
    %c0_24 = arith.constant 0 : index
    %30 = vector.load %arg2[%c0_23, %c0_24] : memref<16x128xf32, #tpu.memory_space<vmem>>, vector<16x128xf32>
    %cst_25 = arith.constant 5.000000e-01 : f32
    %31 = vector.broadcast %cst_25 : f32 to vector<16x128xf32>
    %32 = arith.mulf %31, %29 : vector<16x128xf32>
    %33 = math.exp %32 : vector<16x128xf32>
    %34 = arith.mulf %30, %33 : vector<16x128xf32>
    %35 = arith.addf %28, %34 : vector<16x128xf32>
    %c0_26 = arith.constant 0 : index
    %c0_27 = arith.constant 0 : index
    %36 = vector.load %arg9[%c0_26, %c0_27] : memref<128x128xf32, #tpu.memory_space<vmem>>, vector<128x128xf32>
    %cst_28 = arith.constant dense<0.000000e+00> : vector<16x128xf32>
    %37 = tpu.matmul %35, %36, %cst_28 {dimension_numbers = #tpu.dot_dimension_numbers<[1], [0], [0], [1], [0, 0, 1, 1], [], []>} : vector<16x128xf32>, vector<128x128xf32>, vector<16x128xf32> -> vector<16x128xf32>
    %c0_29 = arith.constant 0 : index
    %c0_30 = arith.constant 0 : index
    %38 = vector.load %arg10[%c0_29, %c0_30] : memref<1x128xf32, #tpu.memory_space<vmem>>, vector<1x128xf32>
    %39 = vector.broadcast %38 : vector<1x128xf32> to vector<16x128xf32>
    %40 = arith.addf %37, %39 : vector<16x128xf32>
    %41 = math.tanh %40 : vector<16x128xf32>
    %c0_31 = arith.constant 0 : index
    %c0_32 = arith.constant 0 : index
    %c0_33 = arith.constant 0 : index
    %42 = vector.load %arg11[%c0_31, %c0_32, %c0_33] : memref<2x128x128xf32, #tpu.memory_space<vmem>>, vector<1x128x128xf32>
    %43 = vector.shape_cast %42 : vector<1x128x128xf32> to vector<128x128xf32>
    %cst_34 = arith.constant dense<0.000000e+00> : vector<16x128xf32>
    %44 = tpu.matmul %41, %43, %cst_34 {dimension_numbers = #tpu.dot_dimension_numbers<[1], [0], [0], [1], [0, 0, 1, 1], [], []>} : vector<16x128xf32>, vector<128x128xf32>, vector<16x128xf32> -> vector<16x128xf32>
    %c0_35 = arith.constant 0 : index
    %c0_36 = arith.constant 0 : index
    %c0_37 = arith.constant 0 : index
    %45 = vector.load %arg12[%c0_35, %c0_36, %c0_37] : memref<2x1x128xf32, #tpu.memory_space<vmem>>, vector<1x1x128xf32>
    %46 = vector.shape_cast %45 : vector<1x1x128xf32> to vector<1x128xf32>
    %47 = vector.broadcast %46 : vector<1x128xf32> to vector<16x128xf32>
    %48 = arith.addf %44, %47 : vector<16x128xf32>
    %49 = math.tanh %48 : vector<16x128xf32>
    %c1_38 = arith.constant 1 : index
    %c0_39 = arith.constant 0 : index
    %c0_40 = arith.constant 0 : index
    %50 = vector.load %arg11[%c1_38, %c0_39, %c0_40] : memref<2x128x128xf32, #tpu.memory_space<vmem>>, vector<1x128x128xf32>
    %51 = vector.shape_cast %50 : vector<1x128x128xf32> to vector<128x128xf32>
    %cst_41 = arith.constant dense<0.000000e+00> : vector<16x128xf32>
    %52 = tpu.matmul %49, %51, %cst_41 {dimension_numbers = #tpu.dot_dimension_numbers<[1], [0], [0], [1], [0, 0, 1, 1], [], []>} : vector<16x128xf32>, vector<128x128xf32>, vector<16x128xf32> -> vector<16x128xf32>
    %c1_42 = arith.constant 1 : index
    %c0_43 = arith.constant 0 : index
    %c0_44 = arith.constant 0 : index
    %53 = vector.load %arg12[%c1_42, %c0_43, %c0_44] : memref<2x1x128xf32, #tpu.memory_space<vmem>>, vector<1x1x128xf32>
    %54 = vector.shape_cast %53 : vector<1x1x128xf32> to vector<1x128xf32>
    %55 = vector.broadcast %54 : vector<1x128xf32> to vector<16x128xf32>
    %56 = arith.addf %52, %55 : vector<16x128xf32>
    %57 = math.tanh %56 : vector<16x128xf32>
    %c0_45 = arith.constant 0 : index
    %c0_46 = arith.constant 0 : index
    %58 = vector.load %arg13[%c0_45, %c0_46] : memref<128x128xf32, #tpu.memory_space<vmem>>, vector<128x128xf32>
    %cst_47 = arith.constant dense<0.000000e+00> : vector<16x128xf32>
    %59 = tpu.matmul %57, %58, %cst_47 {dimension_numbers = #tpu.dot_dimension_numbers<[1], [0], [0], [1], [0, 0, 1, 1], [], []>} : vector<16x128xf32>, vector<128x128xf32>, vector<16x128xf32> -> vector<16x128xf32>
    %c0_48 = arith.constant 0 : index
    %c0_49 = arith.constant 0 : index
    %60 = vector.load %arg14[%c0_48, %c0_49] : memref<1x128xf32, #tpu.memory_space<vmem>>, vector<1x128xf32>
    %61 = vector.broadcast %60 : vector<1x128xf32> to vector<16x128xf32>
    %62 = arith.addf %59, %61 : vector<16x128xf32>
    %63 = math.exp %62 : vector<16x128xf32>
    %c0_50 = arith.constant 0 : index
    %c0_51 = arith.constant 0 : index
    %64 = vector.load %arg15[%c0_50, %c0_51] : memref<16x128xf32, #tpu.memory_space<vmem>>, vector<16x128xf32>
    tpu.vector_store %arg15[%c0_50, %c0_51], %63 {strides = array<i32>} : memref<16x128xf32, #tpu.memory_space<vmem>>, vector<16x128xf32>,
    %c0_52 = arith.constant 0 : index
    %c0_53 = arith.constant 0 : index
    %65 = vector.load %arg16[%c0_52, %c0_53] : memref<16x256xf32, #tpu.memory_space<vmem>>, vector<16x256xf32>
    tpu.vector_store %arg16[%c0_52, %c0_53], %27 {strides = array<i32>} : memref<16x256xf32, #tpu.memory_space<vmem>>, vector<16x256xf32>,
    return
  }
  func.func @transform_0(%arg0: i32) -> (i32, i32) {
    %c0_i32 = arith.constant 0 : i32
    %c0_i32_0 = arith.constant 0 : i32
    return %arg0, %c0_i32 : i32, i32
  }
  func.func @transform_1(%arg0: i32) -> (i32, i32) {
    %c0_i32 = arith.constant 0 : i32
    %c0_i32_0 = arith.constant 0 : i32
    return %arg0, %c0_i32 : i32, i32
  }
  func.func @transform_2(%arg0: i32) -> (i32, i32) {
    %c0_i32 = arith.constant 0 : i32
    %c0_i32_0 = arith.constant 0 : i32
    %c0_i32_1 = arith.constant 0 : i32
    return %c0_i32, %c0_i32_0 : i32, i32
  }
  func.func @transform_3(%arg0: i32) -> (i32, i32) {
    %c0_i32 = arith.constant 0 : i32
    %c0_i32_0 = arith.constant 0 : i32
    %c0_i32_1 = arith.constant 0 : i32
    return %c0_i32, %c0_i32_0 : i32, i32
  }
  func.func @transform_4(%arg0: i32) -> (i32, i32, i32) {
    %c0_i32 = arith.constant 0 : i32
    %c0_i32_0 = arith.constant 0 : i32
    %c0_i32_1 = arith.constant 0 : i32
    %c0_i32_2 = arith.constant 0 : i32
    return %c0_i32, %c0_i32_0, %c0_i32_1 : i32, i32, i32
  }
  func.func @transform_5(%arg0: i32) -> (i32, i32, i32) {
    %c0_i32 = arith.constant 0 : i32
    %c0_i32_0 = arith.constant 0 : i32
    %c0_i32_1 = arith.constant 0 : i32
    %c0_i32_2 = arith.constant 0 : i32
    return %c0_i32, %c0_i32_0, %c0_i32_1 : i32, i32, i32
  }
  func.func @transform_6(%arg0: i32) -> (i32, i32) {
    %c0_i32 = arith.constant 0 : i32
    %c0_i32_0 = arith.constant 0 : i32
    %c0_i32_1 = arith.constant 0 : i32
    return %c0_i32, %c0_i32_0 : i32, i32
  }
  func.func @transform_7(%arg0: i32) -> (i32, i32) {
    %c0_i32 = arith.constant 0 : i32
    %c0_i32_0 = arith.constant 0 : i32
    %c0_i32_1 = arith.constant 0 : i32
    return %c0_i32, %c0_i32_0 : i32, i32
  }
  func.func @transform_8(%arg0: i32) -> (i32, i32) {
    %c0_i32 = arith.constant 0 : i32
    %c0_i32_0 = arith.constant 0 : i32
    %c0_i32_1 = arith.constant 0 : i32
    return %c0_i32, %c0_i32_0 : i32, i32
  }
  func.func @transform_9(%arg0: i32) -> (i32, i32) {
    %c0_i32 = arith.constant 0 : i32
    %c0_i32_0 = arith.constant 0 : i32
    %c0_i32_1 = arith.constant 0 : i32
    return %c0_i32, %c0_i32_0 : i32, i32
  }
  func.func @transform_10(%arg0: i32) -> (i32, i32, i32) {
    %c0_i32 = arith.constant 0 : i32
    %c0_i32_0 = arith.constant 0 : i32
    %c0_i32_1 = arith.constant 0 : i32
    %c0_i32_2 = arith.constant 0 : i32
    return %c0_i32, %c0_i32_0, %c0_i32_1 : i32, i32, i32
  }
  func.func @transform_11(%arg0: i32) -> (i32, i32, i32) {
    %c0_i32 = arith.constant 0 : i32
    %c0_i32_0 = arith.constant 0 : i32
    %c0_i32_1 = arith.constant 0 : i32
    %c0_i32_2 = arith.constant 0 : i32
    return %c0_i32, %c0_i32_0, %c0_i32_1 : i32, i32, i32
  }
  func.func @transform_12(%arg0: i32) -> (i32, i32) {
    %c0_i32 = arith.constant 0 : i32
    %c0_i32_0 = arith.constant 0 : i32
    %c0_i32_1 = arith.constant 0 : i32
    return %c0_i32, %c0_i32_0 : i32, i32
  }
  func.func @transform_13(%arg0: i32) -> (i32, i32) {
    %c0_i32 = arith.constant 0 : i32
    %c0_i32_0 = arith.constant 0 : i32
    %c0_i32_1 = arith.constant 0 : i32
    return %c0_i32, %c0_i32_0 : i32, i32
  }
  func.func @transform_14(%arg0: i32) -> (i32, i32) {
    %c0_i32 = arith.constant 0 : i32
    %c0_i32_0 = arith.constant 0 : i32
    return %arg0, %c0_i32 : i32, i32
  }
  func.func @transform_15(%arg0: i32) -> (i32, i32) {
    %c0_i32 = arith.constant 0 : i32
    %c0_i32_0 = arith.constant 0 : i32
    return %arg0, %c0_i32 : i32, i32
  }
}

</mosaic_0001>

<bundles_post_ra>
// kernel: tpu_custom_call.1
= control target key start
LH: loop header
LB: loop body
LE: loop exit
PB: predicated region body
PF: predicated region fallthrough
CT: control target
= control target key end

     0   :  { %s3480_s0 = inlined_call_operand.hbm [shape: f32[32,128], index: 0, kind: input, shape index: {}]   ;;  %s3481_s1 = inlined_call_operand.hbm [shape: f32[32,128], index: 1, kind: input, shape index: {}]   ;;  %s3482_s2 = inlined_call_operand.hbm [shape: f32[128,128], index: 2, kind: input, shape index: {}]   ;;  %s3483_s3 = inlined_call_operand.vmem [shape: f32[1,128], index: 3, kind: input, shape index: {}]   ;;  %s3484_s4 = inlined_call_operand.hbm [shape: f32[2,128,128], index: 4, kind: input, shape index: {}]   ;;  %s3485_s5 = inlined_call_operand.vmem [shape: f32[2,1,128], index: 5, kind: input, shape index: {}]   ;;  %s3486_s6 = inlined_call_operand.hbm [shape: f32[128,256], index: 6, kind: input, shape index: {}]   ;;  %s3487_s7 = inlined_call_operand.vmem [shape: f32[1,256], index: 7, kind: input, shape index: {}]   ;;  %s3488_s8 = inlined_call_operand.hbm [shape: f32[128,128], index: 8, kind: input, shape index: {}]   ;;  %s3489_s9 = inlined_call_operand.vmem [shape: f32[1,128], index: 9, kind: input, shape index: {}]   ;;  %s3490_s10 = inlined_call_operand.hbm [shape: f32[2,128,128], index: 10, kind: input, shape index: {}]   ;;  %s3491_s11 = inlined_call_operand.vmem [shape: f32[2,1,128], index: 11, kind: input, shape index: {}]   ;;  %s3492_s12 = inlined_call_operand.hbm [shape: f32[128,128], index: 12, kind: input, shape index: {}]   ;;  %s3493_s13 = inlined_call_operand.vmem [shape: f32[1,128], index: 13, kind: input, shape index: {}]   ;;  %s3494_s14 = inlined_call_operand.hbm [shape: f32[32,128], index: 14, kind: output, shape index: {0}]   ;;  %s3495_s15 = inlined_call_operand.hbm [shape: f32[32,256], index: 15, kind: output, shape index: {1}]  }
   0x1   :  { %3507 = sst [smem:[#allocation27_spill]] %s3482_s2 }
   0x2   :  { %3508 = sst [smem:[#allocation28_spill]] %s3484_s4 }
   0x3   :  { %3509 = sst [smem:[#allocation29_spill]] %s3485_s5 }
   0x4   :  { %3510 = sst [smem:[#allocation30_spill]] %s3486_s6 }
   0x5   :  { %3511 = sst [smem:[#allocation31_spill]] %s3487_s7 }
   0x6   :  { %3512 = sst [smem:[#allocation32_spill]] %s3488_s8 }
   0x7   :  { %3513 = sst [smem:[#allocation33_spill]] %s3489_s9 }
   0x8   :  { %3514 = sst [smem:[#allocation34_spill]] %s3490_s10 }
   0x9   :  { %3515 = sst [smem:[#allocation35_spill]] %s3491_s11 }
   0xa   :  { %3516 = sst [smem:[#allocation36_spill]] %s3492_s12 }
   0xb   :  { %3517 = sst [smem:[#allocation37_spill]] %s3493_s13 }
   0xc   :  { %3518 = sst [smem:[#allocation38_spill]] %s3494_s14 }
   0xd   :  { %3519 = sst [smem:[#allocation39_spill]] %s3495_s15 }
   0xe   :  { %21 = vsyncpa [#allocation3], 0 }
   0xf   :  { %23 = vsyncpa [#allocation3 + $0x1], 0 }
  0x10   :  { %24 = vsyncpa [#allocation6], 0 }
  0x11   :  { %26 = vsyncpa [#allocation6 + $0x1], 0 }
  0x12   :  { %27 = vsyncpa [#allocation9], 0 }
  0x13   :  { %28 = vsyncpa [#allocation12], 0 }
  0x14   :  { %29 = vsyncpa [#allocation15], 0 }
  0x15   :  { %30 = vsyncpa [#allocation4], 0 }
  0x16   :  { %32 = vsyncpa [#allocation4 + $0x1], 0 }
  0x17   :  { %33 = vsyncpa [#allocation18], 0 }
  0x18   :  { %35 = vsyncpa [#allocation18 + $0x1], 0  ;;  %s3004_s18 = smov 0   ;;  %s3006_s19 = smov 0  }
  0x19   :  { %s3008_s20 = smov 0   ;;  %s3010_s21 = smov 0  }
  0x1a LB: > { %s2905_s22 = smov [#allocation7]   ;;  %s3025_s24 = sadd.s32 4294967295, %s2903_s21   ;;  %s2903_s21 = sphi %s3010_s21, %s3559_s21   ;;  %s2899_s20 = sphi %s3008_s20, %s3558_s20   ;;  %s2895_s19 = sphi %s3006_s19, %s3557_s19   ;;  %s2891_s18 = sphi %s3004_s18, %s3556_s18  }
  0x1b   : > { %s414_s23 = sshll.u32 %s2905_s22, 4  ;;  %p1724_p0 = scmp.ge.s32.totalorder %s2903_s21, 1  ;;  %s3030_s23 = int_to_ptr.vmem [resolvable:$true] %s414_s23 }
  0x1c   : > { %p3500_p1 = scmp.eq.s32.totalorder %s3025_s24, 0  ;;  %p402_p2 = scmp.lt.s32.totalorder %s2903_s21, 3 }
  0x1d   : > { %s2906_s26 = smov [#allocation8]   ;;  %s2907_s29 = smov [#allocation11]  }
  0x1e   : > { %p3032_p3 = pnand %p1724_p0, %p402_p2  ;;  %s430_s27 = sshll.u32 %s2906_s26, 4  ;;  %s3045_s27 = int_to_ptr.vmem [resolvable:$true] %s430_s27 }
  0x1f   : > { %s462_s30 = sshll.u32 %s2907_s29, 4  ;;  %s3522_s2 = sld [smem:[#allocation27_spill]]  ;;  %s3047_s30 = int_to_ptr.vmem [resolvable:$true] %s462_s30 }
  0x20   : > { %s3520_s25 = scalar_select %p3032_p3, 1, 0 }
  0x21   : > { %p2431_p5 = pneg %p3032_p3 }
  0x23   : > { %p3041_p6 = pnand %p2431_p5, %p3500_p1 }
  0x25   : > { %s2557_s22 = scalar_lea.hbm %s3522_s2, 2048  ;;  %p3057_p8 = pneg %p3041_p6 }
  0x26   : > { %p2558_p7 = scmp.ne.s32.totalorder %s3522_s2, %s2557_s22  ;;  %p2564_p11 = scmp.lt.u32.totalorder %s2557_s22, %s3522_s2 }
  0x28   : > { %p2560_p9 = pnand %p3057_p8, %p2558_p7 }
  0x2a   : > { %p2561_p10 = pneg %p2560_p9 }
  0x2c   : > { %p2566_p12 = pnand %p2564_p11, %p2561_p10 }
  0x2e   : > { %2569 = shalt.err (!%p2566_p12)
}
  0x2f   : > { %s2570_s13 = scalar_lea.vmem %s3030_s23, 2048  ;;  %p2578_p5 = scmp.lt.s32.totalorder %s3030_s23, %s3030_s23 }
  0x30   : > { %p2571_p13 = scmp.ne.s32.totalorder %s3030_s23, %s2570_s13  ;;  %p2579_p4 = scmp.lt.s32.totalorder %s2570_s13, %s2570_s13 }
  0x32   : > { %p2573_p0 = pnand %p2571_p13, %p3057_p8  ;;  %p2580_p7 = por %p2579_p4, %p2578_p5 }
  0x34   : > { %p2574_p2 = pneg %p2573_p0 }
  0x36   : > { %p2581_p9 = pnand %p2580_p7, %p2574_p2 }
  0x38   : > { %2584 = shalt.err (!%p2581_p9)
}
  0x39   : > { %s3502_s14 = smov 128   ;;  %s3504_s15 = smov 8  }
  0x3a   : > { %2434 = dma.hbm_to_vmem [thread:$0]  (!%p3041_p6), %s3522_s2, 2048, %s3030_s23, [#allocation6], %s3502_s14, %s3502_s14, %s3504_s15  }
  0x3b   : > { %s3524_s4 = sld [smem:[#allocation28_spill]] }
  0x41   : > { %s2585_s13 = scalar_lea.hbm %s3524_s4, 4096 }
  0x42   : > { %p2586_p4 = scmp.ne.s32.totalorder %s3524_s4, %s2585_s13  ;;  %p2592_p12 = scmp.lt.u32.totalorder %s2585_s13, %s3524_s4 }
  0x44   : > { %p2588_p10 = pnand %p2586_p4, %p3057_p8 }
  0x46   : > { %p2589_p11 = pneg %p2588_p10 }
  0x48   : > { %p2594_p13 = pnand %p2592_p12, %p2589_p11 }
  0x4a   : > { %2597 = shalt.err (!%p2594_p13)
}
  0x4b   : > { %s2598_s23 = scalar_lea.vmem %s3045_s27, 4096  ;;  %p2606_p7 = scmp.lt.s32.totalorder %s3045_s27, %s3045_s27 }
  0x4c   : > { %p2599_p0 = scmp.ne.s32.totalorder %s3045_s27, %s2598_s23  ;;  %p2607_p9 = scmp.lt.s32.totalorder %s2598_s23, %s2598_s23 }
  0x4e   : > { %p2601_p2 = pnand %p2599_p0, %p3057_p8  ;;  %p2608_p4 = por %p2607_p9, %p2606_p7 }
  0x50   : > { %p2602_p5 = pneg %p2601_p2 }
  0x52   : > { %p2609_p10 = pnand %p2608_p4, %p2602_p5 }
  0x54   : > { %2612 = shalt.err (!%p2609_p10)
}
  0x55   : > { %2437 = dma.hbm_to_vmem [thread:$0]  (!%p3041_p6), %s3524_s4, 4096, %s3045_s27, [#allocation9], %s3502_s14, %s3502_s14, %s3504_s15  }
  0x56   : > { %s3525_s8 = sld [smem:[#allocation32_spill]] }
  0x5c   : > { %s2613_s16 = scalar_lea.hbm %s3525_s8, 2048 }
  0x5d   : > { %p2614_p11 = scmp.ne.s32.totalorder %s3525_s8, %s2613_s16  ;;  %p2620_p0 = scmp.lt.u32.totalorder %s2613_s16, %s3525_s8 }
  0x5f   : > { %p2616_p12 = pnand %p2614_p11, %p3057_p8 }
  0x61   : > { %p2617_p13 = pneg %p2616_p12 }
  0x63   : > { %p2622_p2 = pnand %p2620_p0, %p2617_p13 }
  0x65   : > { %2625 = shalt.err (!%p2622_p2)
}
  0x66   : > { %s2626_s27 = scalar_lea.vmem %s3047_s30, 2048  ;;  %p2634_p4 = scmp.lt.s32.totalorder %s3047_s30, %s3047_s30 }
  0x67   : > { %p2627_p5 = scmp.ne.s32.totalorder %s3047_s30, %s2626_s27  ;;  %p2635_p10 = scmp.lt.s32.totalorder %s2626_s27, %s2626_s27 }
  0x69   : > { %p2629_p7 = pnand %p2627_p5, %p3057_p8  ;;  %p2636_p11 = por %p2635_p10, %p2634_p4 }
  0x6b   : > { %p2630_p9 = pneg %p2629_p7 }
  0x6d   : > { %p2637_p12 = pnand %p2636_p11, %p2630_p9 }
  0x6f   : > { %2640 = shalt.err (!%p2637_p12)
}
  0x70   : > { %2443 = dma.hbm_to_vmem [thread:$0]  (!%p3041_p6), %s3525_s8, 2048, %s3047_s30, [#allocation12], %s3502_s14, %s3502_s14, %s3504_s15  }
  0x71   : > { %s2910_s7 = smov [#allocation10]   ;;  %s3526_s6 = sld [smem:[#allocation30_spill]] }
  0x72   : > { %s446_s9 = sshll.u32 %s2910_s7, 4  ;;  %s447_s9 = int_to_ptr.vmem [resolvable:$true] %s446_s9 }
  0x77   : > { %s2641_s17 = scalar_lea.hbm %s3526_s6, 4096 }
  0x78   : > { %p2642_p13 = scmp.ne.s32.totalorder %s3526_s6, %s2641_s17  ;;  %p2648_p5 = scmp.lt.u32.totalorder %s2641_s17, %s3526_s6 }
  0x7a   : > { %p2644_p0 = pnand %p2642_p13, %p3057_p8 }
  0x7c   : > { %p2645_p2 = pneg %p2644_p0 }
  0x7e   : > { %p2650_p7 = pnand %p2648_p5, %p2645_p2 }
  0x80   : > { %2653 = shalt.err (!%p2650_p7)
}
  0x81   : > { %s2654_s30 = scalar_lea.vmem %s447_s9, 4096  ;;  %p2662_p11 = scmp.lt.s32.totalorder %s447_s9, %s447_s9 }
  0x82   : > { %p2655_p9 = scmp.ne.s32.totalorder %s447_s9, %s2654_s30  ;;  %p2663_p12 = scmp.lt.s32.totalorder %s2654_s30, %s2654_s30 }
  0x84   : > { %p2657_p4 = pnand %p2655_p9, %p3057_p8  ;;  %p2664_p1 = por %p2663_p12, %p2662_p11 }
  0x86   : > { %p2658_p10 = pneg %p2657_p4 }
  0x88   : > { %p2665_p3 = pnand %p2664_p1, %p2658_p10 }
  0x8a   : > { %2668 = shalt.err (!%p2665_p3)
}
  0x8b   : > { %s2911_s23 = smov 256   ;;  %s2912_s5 = smov 16  }
  0x8c   : > { %2440 = dma.hbm_to_vmem [thread:$0]  (!%p3041_p6), %s3526_s6, 4096, %s447_s9, [#allocation9], %s2911_s23, %s2911_s23, %s2912_s5  }
  0x8d   : > { %s2913_s16 = smov [#allocation13]   ;;  %s2914_s22 = smov [#allocation14]  }
  0x8e   : > { %s478_s17 = sshll.u32 %s2913_s16, 4  ;;  %s494_s29 = sshll.u32 %s2914_s22, 4  ;;  %s479_s17 = int_to_ptr.vmem [resolvable:$true] %s478_s17  ;;  %s3151_s29 = int_to_ptr.vmem [resolvable:$true] %s494_s29 }
  0x8f   : > { %s3527_s10 = sld [smem:[#allocation34_spill]] }
  0x95   : > { %s2669_s30 = scalar_lea.hbm %s3527_s10, 4096 }
  0x96   : > { %p2670_p1 = scmp.ne.s32.totalorder %s3527_s10, %s2669_s30  ;;  %p2676_p0 = scmp.lt.u32.totalorder %s2669_s30, %s3527_s10 }
  0x98   : > { %p2672_p3 = pnand %p2670_p1, %p3057_p8 }
  0x9a   : > { %p2673_p13 = pneg %p2672_p3 }
  0x9c   : > { %p2678_p2 = pnand %p2676_p0, %p2673_p13 }
  0x9e   : > { %2681 = shalt.err (!%p2678_p2)
}
  0x9f   : > { %s2682_s23 = scalar_lea.vmem %s479_s17, 4096  ;;  %p2690_p4 = scmp.lt.s32.totalorder %s479_s17, %s479_s17 }
  0xa0   : > { %p2683_p5 = scmp.ne.s32.totalorder %s479_s17, %s2682_s23  ;;  %p2691_p10 = scmp.lt.s32.totalorder %s2682_s23, %s2682_s23 }
  0xa2   : > { %p2685_p7 = pnand %p2683_p5, %p3057_p8  ;;  %p2692_p11 = por %p2691_p10, %p2690_p4 }
  0xa4   : > { %p2686_p9 = pneg %p2685_p7 }
  0xa6   : > { %p2693_p12 = pnand %p2692_p11, %p2686_p9 }
  0xa8   : > { %2696 = shalt.err (!%p2693_p12)
}
  0xa9   : > { %s3528_s14 = smov 8   ;;  %s3529_s15 = smov 128  }
  0xaa   : > { %2446 = dma.hbm_to_vmem [thread:$0]  (!%p3041_p6), %s3527_s10, 4096, %s479_s17, [#allocation12], %s3529_s15, %s3529_s15, %s3528_s14  }
  0xab   : > { %s3530_s12 = sld [smem:[#allocation36_spill]] }
  0xb1   : > { %s2697_s13 = scalar_lea.hbm %s3530_s12, 2048 }
  0xb2   : > { %p2698_p1 = scmp.ne.s32.totalorder %s3530_s12, %s2697_s13  ;;  %p2704_p0 = scmp.lt.u32.totalorder %s2697_s13, %s3530_s12 }
  0xb4   : > { %p2700_p3 = pnand %p2698_p1, %p3057_p8 }
  0xb6   : > { %p2701_p13 = pneg %p2700_p3 }
  0xb8   : > { %p2706_p2 = pnand %p2704_p0, %p2701_p13 }
  0xba   : > { %2709 = shalt.err (!%p2706_p2)
}
  0xbb   : > { %s2710_s17 = scalar_lea.vmem %s3151_s29, 2048  ;;  %p2718_p4 = scmp.lt.s32.totalorder %s3151_s29, %s3151_s29 }
  0xbc   : > { %p2711_p5 = scmp.ne.s32.totalorder %s3151_s29, %s2710_s17  ;;  %p2719_p10 = scmp.lt.s32.totalorder %s2710_s17, %s2710_s17 }
  0xbe   : > { %p2713_p7 = pnand %p2711_p5, %p3057_p8  ;;  %p2720_p11 = por %p2719_p10, %p2718_p4 }
  0xc0   : > { %p2714_p9 = pneg %p2713_p7 }
  0xc2   : > { %p2721_p12 = pnand %p2720_p11, %p2714_p9 }
  0xc4   : > { %2724 = shalt.err (!%p2721_p12)
}
  0xc5   : > { %2449 = dma.hbm_to_vmem [thread:$0]  (!%p3041_p6), %s3530_s12, 2048, %s3151_s29, [#allocation15], %s3529_s15, %s3529_s15, %s3528_s14  }
  0xc6   : > { %s1723_s28 = sadd.s32 4294967294, %s2903_s21   ;;  %s3202_s26 = sadd.s32 1, %s2903_s21  }
  0xc7   : > { %s45_s11 = ssub.s32 %s2903_s21, %s3202_s26  ;;  %s48_s16 = sadd.s32 1, %s2899_s20 }
  0xc8   : > { %p46_p8 = scmp.eq.s32.totalorder %s45_s11, 0  ;;  %p55_p1 = scmp.ne.s32.totalorder %s2899_s20, %s2895_s19 }
  0xc9   : > { %p56_p3 = scmp.eq.s32.totalorder %s2903_s21, 0  ;;  %p61_p13 = scmp.ne.s32.totalorder %s2895_s19, %s2891_s18 }
  0xca   : > { %s3213_s22 = scalar_select %p46_p8, %s2899_s20, %s48_s16  }
  0xcb   : > { %p3215_p0 = por %p56_p3, %p55_p1  ;;  %p3532_p2 = scmp.eq.s32.totalorder %s3025_s24, 0 }
  0xcc   : > { %p363_p5 = scmp.eq.s32.totalorder %s3025_s24, 1  ;;  %p369_p7 = scmp.eq.s32.totalorder %s1723_s28, 1 }
  0xcd   : > { %p3221_p6 = por %p3532_p2, %p61_p13  ;;  %p2470_p9 = scmp.lt.s32.totalorder %s2903_s21, 2 }
  0xce   : > { %s511_s27 = sand.u32 1, %s2899_s20   ;;  %p3228_p4 = por %p363_p5, %p55_p1 }
  0xcf   : > { %p3232_p10 = por %p369_p7, %p61_p13  ;;  %s1732_s9 = sshll.u32 %s511_s27, 4 }
  0xd0   : > { %s3534_s30 = scalar_select %p3228_p4, 1, 0 }
  0xd1   : > { %s3535_s7 = scalar_select %p3232_p10, 1, 0 }
  0xd2   : > { %s1767_s17 = sshll.u32 %s2903_s21, 8  ;;  %s515_s28 = scalar_lea.vmem [#allocation2], %s1732_s9 }
  0xd3   : > { %s3240_s11 = scalar_lea.hbm %s3480_s0, %s1767_s17  ;;  %s522_s16 = sshll.u32 %s515_s28, 4  ;;  %s3242_s16 = int_to_ptr.vmem [resolvable:$true] %s522_s16 }
  0xd4   : > { %p3246_p11 = pnand %p2470_p9, %p3215_p0  ;;  %s3253_s23 = scalar_lea.hbm %s3481_s1, %s1767_s17 }
  0xd5   : > { %s536_s5 = scalar_lea.vmem [#allocation5], %s1732_s9  ;;  %s3257_s10 = scalar_lea.sflag [#allocation3], %s511_s27 }
  0xd6   : > { %s3255_s8 = sshll.u32 %s536_s5, 4  ;;  %s2725_s28 = scalar_lea.hbm %s3240_s11, 256  ;;  %s3289_s8 = int_to_ptr.vmem [resolvable:$true] %s3255_s8 }
  0xd7   : > { %p2726_p12 = scmp.ne.s32.totalorder %s3240_s11, %s2725_s28  ;;  %p2727_p8 = pneg %p3246_p11 }
  0xd8   : > { %s2730_s4 = scalar_lea.hbm %s3480_s0, 512  ;;  %p2731_p13 = scmp.lt.u32.totalorder %s3240_s11, %s3480_s0 }
  0xd9   : > { %p2728_p1 = pnand %p2727_p8, %p2726_p12  ;;  %p2732_p0 = scmp.lt.u32.totalorder %s2730_s4, %s2725_s28 }
  0xda   : > { %p2734_p5 = scmp.lt.u32.totalorder %s2725_s28, %s3240_s11 }
  0xdb   : > { %p2729_p3 = pneg %p2728_p1  ;;  %p2733_p2 = por %p2732_p0, %p2731_p13 }
  0xdd   : > { %p2735_p7 = por %p2734_p5, %p2733_p2 }
  0xdf   : > { %p2736_p9 = pnand %p2735_p7, %p2729_p3 }
  0xe1   : > { %2739 = shalt.err (!%p2736_p9)
}
  0xe2   : > { %s2740_s27 = scalar_lea.vmem %s3242_s16, 256  ;;  %s2915_s12 = smov [#allocation2]  }
  0xe3   : > { %p2741_p12 = scmp.ne.s32.totalorder %s3242_s16, %s2740_s27  ;;  %s2745_s9 = sshll.u32 %s2915_s12, 4  ;;  %s2746_s9 = int_to_ptr.vmem [resolvable:$false] %s2745_s9 }
  0xe4   : > { %s2747_s5 = scalar_lea.vmem %s2746_s9, 512  ;;  %p2748_p4 = scmp.lt.s32.totalorder %s3242_s16, %s2746_s9 }
  0xe5   : > { %p2743_p1 = pnand %p2741_p12, %p2727_p8  ;;  %p2749_p13 = scmp.lt.s32.totalorder %s2747_s5, %s2740_s27 }
  0xe7   : > { %p2744_p10 = pneg %p2743_p1  ;;  %p2750_p0 = por %p2749_p13, %p2748_p4 }
  0xe9   : > { %p2751_p2 = pnand %p2750_p0, %p2744_p10 }
  0xeb   : > { %2754 = shalt.err (!%p2751_p2)
}
  0xec   : > { %2453 = dma.hbm_to_vmem [thread:$0]  (!%p3246_p11), %s3240_s11, 256, %s3242_s16, %s3257_s10, %s3529_s15, %s3529_s15, %s3528_s14  }
  0xed   : > { %s532_s28 = sand.u32 1, %s2903_s21   ;;  %s2755_s4 = scalar_lea.hbm %s3253_s23, 256 }
  0xee   : > { %s3292_s13 = scalar_lea.sflag [#allocation6], %s532_s28  ;;  %p2756_p4 = scmp.ne.s32.totalorder %s3253_s23, %s2755_s4 }
  0xef   : > { %s2760_s27 = scalar_lea.hbm %s3481_s1, 512  ;;  %p2761_p5 = scmp.lt.u32.totalorder %s3253_s23, %s3481_s1 }
  0xf0   : > { %p2758_p10 = pnand %p2756_p4, %p2727_p8  ;;  %p2762_p7 = scmp.lt.u32.totalorder %s2760_s27, %s2755_s4 }
  0xf1   : > { %p2764_p12 = scmp.lt.u32.totalorder %s2755_s4, %s3253_s23 }
  0xf2   : > { %p2759_p3 = pneg %p2758_p10  ;;  %p2763_p9 = por %p2762_p7, %p2761_p5 }
  0xf4   : > { %p2765_p1 = por %p2764_p12, %p2763_p9 }
  0xf6   : > { %p2766_p13 = pnand %p2765_p1, %p2759_p3 }
  0xf8   : > { %2769 = shalt.err (!%p2766_p13)
}
  0xf9   : > { %s2770_s10 = scalar_lea.vmem %s3289_s8, 256  ;;  %s2916_s11 = smov [#allocation5]  }
  0xfa   : > { %p2771_p0 = scmp.ne.s32.totalorder %s3289_s8, %s2770_s10  ;;  %s2775_s16 = sshll.u32 %s2916_s11, 4  ;;  %s2776_s16 = int_to_ptr.vmem [resolvable:$false] %s2775_s16 }
  0xfb   : > { %s2777_s5 = scalar_lea.vmem %s2776_s16, 512  ;;  %p2778_p10 = scmp.lt.s32.totalorder %s3289_s8, %s2776_s16 }
  0xfc   : > { %p2773_p2 = pnand %p2771_p0, %p2727_p8  ;;  %p2779_p5 = scmp.lt.s32.totalorder %s2777_s5, %s2770_s10 }
  0xfe   : > { %p2774_p4 = pneg %p2773_p2  ;;  %p2780_p7 = por %p2779_p5, %p2778_p10 }
 0x100   : > { %p2781_p9 = pnand %p2780_p7, %p2774_p4 }
 0x102   : > { %2784 = shalt.err (!%p2781_p9)
}
 0x103   : > { %2456 = dma.hbm_to_vmem [thread:$0]  (!%p3246_p11), %s3253_s23, 256, %s3289_s8, %s3292_s13, %s3529_s15, %s3529_s15, %s3528_s14  }
 0x104   : > { %p3537_p8 = scmp.ne.s32.totalorder %s3520_s25, 0 }
 0x105   : > { %s3324_s28 = sand.u32 (!%p3537_p8), 1, %s2895_s19  }
 0x106   : > { %555 = sbr.rel (%p3537_p8) target bundleno = 2163 (0x873), region = 76  ;;  %s3327_s4 = sshll.u32 (!%p3537_p8), %s3324_s28, 4 }
 0x107   : > { %s558_s2 = scalar_lea.sflag (!%p3537_p8), [#allocation3], %s3324_s28  ;;  %s561_s6 = scalar_lea.vmem (!%p3537_p8), [#allocation2], %s3327_s4 }
 0x10d   : > { %2858 = dma.done.wait (%p3221_p6), %s558_s2, 256  }
 0x10e   : > { %2860 = vsyncadd (%p3221_p6), %s558_s2, 4294967040  ;;  %s566_s8 = sand.u32 1, %s3025_s24   ;;  %s570_s14 = scalar_lea.vmem [#allocation5], %s3327_s4 }
 0x10f   : > { %s567_s25 = scalar_lea.sflag [#allocation6], %s566_s8 }
 0x110   : > { %2862 = dma.done.wait (%p3221_p6), %s567_s25, 256  }
 0x111   : > { %2864 = vsyncadd (%p3221_p6), %s567_s25, 4294967040  ;;  %p3538_p11 = scmp.eq.s32.totalorder %s3025_s24, 0 }
 0x113   : > { %2866 = dma.done.wait (%p3538_p11), [#allocation6], 2048   ;;  %p3539_p3 = pmov %p3538_p11 }
 0x115   : > { %2868 = vsyncadd (%p3539_p3), [#allocation6], 4294965248  ;;  %p3540_p12 = pmov %p3539_p3 }
 0x116   : > { %p3541_p1 = pmov %p3539_p3 }
 0x117   : > { %2870 = dma.done.wait (%p3540_p12), [#allocation9], 8192  }
 0x118   : > { %2872 = vsyncadd (%p3541_p1), [#allocation9], 4294959104  ;;  %p3542_p13 = pmov %p3541_p1 }
 0x119   : > { %p3543_p0 = pmov %p3541_p1 }
 0x11a   : > { %2874 = dma.done.wait (%p3542_p13), [#allocation12], 6144  }
 0x11b   : > { %2876 = vsyncadd (%p3543_p0), [#allocation12], 4294961152  ;;  %p3544_p6 = pmov %p3543_p0 }
 0x11c   : > { %p3545_p2 = pmov %p3543_p0 }
 0x11d   : > { %2878 = dma.done.wait (%p3544_p6), [#allocation15], 2048  }
 0x11e   : > { %2880 = vsyncadd (%p3545_p2), [#allocation15], 4294965248  ;;  %v657_v0 = vld [vmem:[#allocation7] sm:$0xff]  ;;  %v658_v1 = vld [vmem:[#allocation7 + $0x8] sm:$0xff]  ;;  %s3546_s17 = sld [smem:[#allocation29_spill]]  ;;  %s3547_s11 = sld [smem:[#allocation31_spill]] }
 0x11f   : > { %v659_v2 = vld [vmem:[#allocation7 + $0x10] sm:$0xff]  ;;  %v2143_v3 = vpack.c.bf16 %v658_v1, %v657_v0  ;;  %v660_v4 = vld [vmem:[#allocation7 + $0x18] sm:$0xff]  ;;  %v661_v6 = vld [vmem:[#allocation7 + $0x20] sm:$0xff]  ;;  %s1748_s16 = sshll.u32 %s3324_s28, 5  ;;  %s3548_s8 = sld [smem:[#allocation33_spill]] }
 0x120   : > { %v2147_v5 = vpack.c.bf16 %v660_v4, %v659_v2  ;;  %v662_v7 = vld [vmem:[#allocation7 + $0x28] sm:$0xff]  ;;  %v663_v9 = vld [vmem:[#allocation7 + $0x30] sm:$0xff]  ;;  %v664_v10 = vld [vmem:[#allocation7 + $0x38] sm:$0xff]  ;;  %s3374_s5 = scalar_lea.vmem [#allocation17], %s1748_s16  ;;  %s3549_s15 = sld [smem:[#allocation35_spill]] }
 0x121   : > { %2144 = vmatprep.subr.bf16.mxu0 %v2143_v3  ;;  %v2151_v8 = vpack.c.bf16 %v662_v7, %v661_v6  ;;  %v655_v11 = vld [vmem:[%s561_s6] sm:$0xff]  ;;  %v758_v13 = vld [vmem:[#allocation8 + $0x8] sm:$0xff]  ;;  %v760_v16 = vld [vmem:[#allocation8 + $0x18] sm:$0xff]  ;;  %v2155_v20 = vpack.c.bf16 %v664_v10, %v663_v9  ;;  %s1538_s13 = sshll.u32 %s3374_s5, 4  ;;  %s1771_s27 = sshll.u32 %s3025_s24, 9  ;;  %s3394_s13 = int_to_ptr.vmem [resolvable:$true] %s1538_s13 }
 0x122   : > { %2146 = vmatpush3.bf16.msra.mxu0 %v2143_v3  ;;  %1930 = vmatprep.mubr.f32.mxu0 %v655_v11  ;;  %v757_v12 = vld [vmem:[#allocation8] sm:$0xff]  ;;  %v759_v14 = vld [vmem:[#allocation8 + $0x10] sm:$0xff]  ;;  %v762_v19 = vld [vmem:[#allocation8 + $0x28] sm:$0xff]  ;;  %s3550_s10 = sld [smem:[#allocation39_spill]]  ;;  %s1508_s16 = scalar_lea.sflag [#allocation18], %s3324_s28 }
 0x123   : > { %2148 = vmatprep.subr.bf16.mxu0 %v2147_v5  ;;  %v2175_v15 = vpack.c.bf16 %v758_v13, %v757_v12  ;;  %v2179_v17 = vpack.c.bf16 %v760_v16, %v759_v14  ;;  %v761_v18 = vld [vmem:[#allocation8 + $0x20] sm:$0xff]  ;;  %v666_v22 = vld [vmem:[#allocation7 + $0x48] sm:$0xff]  ;;  %v763_v24 = vld [vmem:[#allocation8 + $0x30] sm:$0xff]  ;;  %s2785_s2 = scalar_lea.vmem %s3394_s13, 512  ;;  %p3551_p10 = scmp.ne.s32.totalorder %s3534_s30, 0 }
 0x124   : > { %v665_v21 = vld [vmem:[#allocation7 + $0x40] sm:$0xff]  ;;  %v2183_v23 = vpack.c.bf16 %v762_v19, %v761_v18  ;;  %v764_v25 = vld [vmem:[#allocation8 + $0x38] sm:$0xff]  ;;  %v667_v27 = vld [vmem:[#allocation7 + $0x50] sm:$0xff]  ;;  %p2786_p4 = scmp.ne.s32.totalorder %s3394_s13, %s2785_s2 }
 0x125   : > { %2176 = vmatprep.subr.bf16.mxu1 %v2175_v15  ;;  %v2159_v26 = vpack.c.bf16 %v666_v22, %v665_v21  ;;  %v668_v28 = vld [vmem:[#allocation7 + $0x58] sm:$0xff]  ;;  %v2187_v29 = vpack.c.bf16 %v764_v25, %v763_v24  ;;  %v669_v31 = vld [vmem:[#allocation7 + $0x60] sm:$0xff]  ;;  %v670_v32 = vld [vmem:[#allocation7 + $0x68] sm:$0xff] }
 0x126   : > { %2150 = vmatpush3.bf16.msra.mxu0 %v2147_v5  ;;  %2178 = vmatpush3.bf16.msra.mxu1 %v2175_v15  ;;  %v2163_v30 = vpack.c.bf16 %v668_v28, %v667_v27  ;;  %v2167_v33 = vpack.c.bf16 %v670_v32, %v669_v31  ;;  %v671_v34 = vld [vmem:[#allocation7 + $0x70] sm:$0xff]  ;;  %v672_v35 = vld [vmem:[#allocation7 + $0x78] sm:$0xff]  ;;  %v765_v38 = vld [vmem:[#allocation8 + $0x40] sm:$0xff]  ;;  %p2787_p5 = pnand %p2786_p4, %p3551_p10 }
 0x127   : > { %2152 = vmatprep.subr.bf16.mxu0 %v2151_v8  ;;  %2180 = vmatprep.subr.bf16.mxu1 %v2179_v17  ;;  %v2171_v36 = vpack.c.bf16 %v672_v35, %v671_v34  ;;  %v656_v37 = vld [vmem:[%s561_s6 + $0x8] sm:$0xff]  ;;  %v767_v41 = vld [vmem:[#allocation8 + $0x50] sm:$0xff]  ;;  %v769_v44 = vld [vmem:[#allocation8 + $0x60] sm:$0xff]  ;;  %s2918_s6 = smov [#allocation17]  }
 0x128   : > { %v766_v39 = vld [vmem:[#allocation8 + $0x48] sm:$0xff]  ;;  %v768_v42 = vld [vmem:[#allocation8 + $0x58] sm:$0xff]  ;;  %v771_v46 = vld [vmem:[#allocation8 + $0x70] sm:$0xff]  ;;  %p2788_p7 = pneg %p2787_p5 }
 0x129   : > { %v2191_v40 = vpack.c.bf16 %v766_v39, %v765_v38  ;;  %v2195_v43 = vpack.c.bf16 %v768_v42, %v767_v41  ;;  %v770_v45 = vld [vmem:[#allocation8 + $0x68] sm:$0xff]  ;;  %v772_v48 = vld [vmem:[#allocation8 + $0x78] sm:$0xff]  ;;  %v858_v50 = vld [vmem:[#allocation8 + $0x80] sm:$0xff] }
 0x12a   : > { %2154 = vmatpush3.bf16.msra.mxu0 %v2151_v8  ;;  %2182 = vmatpush3.bf16.msra.mxu1 %v2179_v17  ;;  %v2199_v47 = vpack.c.bf16 %v770_v45, %v769_v44  ;;  %v2203_v49 = vpack.c.bf16 %v772_v48, %v771_v46  ;;  %v859_v51 = vld [vmem:[#allocation8 + $0x88] sm:$0xff]  ;;  %v860_v52 = vld [vmem:[#allocation8 + $0x90] sm:$0xff]  ;;  %v861_v54 = vld [vmem:[#allocation8 + $0x98] sm:$0xff] }
 0x12b   : > { %2156 = vmatprep.subr.bf16.mxu0 %v2155_v20  ;;  %2184 = vmatprep.subr.bf16.mxu1 %v2183_v23  ;;  %v2207_v53 = vpack.c.bf16 %v859_v51, %v858_v50  ;;  %v2211_v55 = vpack.c.bf16 %v861_v54, %v860_v52  ;;  %v862_v56 = vld [vmem:[#allocation8 + $0xa0] sm:$0xff]  ;;  %v863_v57 = vld [vmem:[#allocation8 + $0xa8] sm:$0xff]  ;;  %v864_v59 = vld [vmem:[#allocation8 + $0xb0] sm:$0xff] }
 0x12c   : > { %v2215_v58 = vpack.c.bf16 %v863_v57, %v862_v56  ;;  %v865_v60 = vld [vmem:[#allocation8 + $0xb8] sm:$0xff]  ;;  %v1749_v62 = vld [vmem:[%s3483_s3] ss:$0 sm:$0xff]  ;;  %v867_v6 = vld [vmem:[#allocation8 + $0xc8] sm:$0xff] }
 0x12d   : > { %v2219_v61 = vpack.c.bf16 %v865_v60, %v864_v59  ;;  %v866_v5 = vld [vmem:[#allocation8 + $0xc0] sm:$0xff]  ;;  %v868_v8 = vld [vmem:[#allocation8 + $0xd0] sm:$0xff]  ;;  %v869_v9 = vld [vmem:[#allocation8 + $0xd8] sm:$0xff] }
 0x12e   : > { %2158 = vmatpush3.bf16.msra.mxu0 %v2155_v20  ;;  %2186 = vmatpush3.bf16.msra.mxu1 %v2183_v23  ;;  %v2223_v7 = vpack.c.bf16 %v867_v6, %v866_v5  ;;  %v2227_v10 = vpack.c.bf16 %v869_v9, %v868_v8  ;;  %v870_v11 = vld [vmem:[#allocation8 + $0xe0] sm:$0xff]  ;;  %v871_v12 = vld [vmem:[#allocation8 + $0xe8] sm:$0xff]  ;;  %v872_v13 = vld [vmem:[#allocation8 + $0xf0] sm:$0xff] }
 0x12f   : > { %2160 = vmatprep.subr.bf16.mxu0 %v2159_v26  ;;  %2188 = vmatprep.subr.bf16.mxu1 %v2187_v29  ;;  %v2231_v14 = vpack.c.bf16 %v871_v12, %v870_v11  ;;  %v873_v15 = vld [vmem:[#allocation8 + $0xf8] sm:$0xff]  ;;  %v960_v17 = vld [vmem:[#allocation10 + $0x8] sm:$0xff]  ;;  %v959_v19 = vld [vmem:[#allocation10] sm:$0xff] }
 0x130   : > { %v2235_v16 = vpack.c.bf16 %v873_v15, %v872_v13  ;;  %v962_v18 = vld [vmem:[#allocation10 + $0x18] sm:$0xff]  ;;  %v961_v21 = vld [vmem:[#allocation10 + $0x10] sm:$0xff]  ;;  %v964_v22 = vld [vmem:[#allocation10 + $0x28] sm:$0xff] }
 0x131   : > { %v2239_v20 = vpack.c.bf16 %v962_v18, %v960_v17  ;;  %v966_v23 = vld [vmem:[#allocation10 + $0x38] sm:$0xff]  ;;  %v2241_v24 = vpack.c.bf16 %v961_v21, %v959_v19  ;;  %v965_v27 = vld [vmem:[#allocation10 + $0x30] sm:$0xff]  ;;  %v968_v28 = vld [vmem:[#allocation10 + $0x48] sm:$0xff] }
 0x132   : > { %2162 = vmatpush3.bf16.msra.mxu0 %v2159_v26  ;;  %2190 = vmatpush3.bf16.msra.mxu1 %v2187_v29  ;;  %v2243_v25 = vpack.c.bf16 %v966_v23, %v964_v22  ;;  %v963_v26 = vld [vmem:[#allocation10 + $0x20] sm:$0xff]  ;;  %v970_v29 = vld [vmem:[#allocation10 + $0x58] sm:$0xff]  ;;  %v972_v34 = vld [vmem:[#allocation10 + $0x68] sm:$0xff] }
 0x133   : > { %2164 = vmatprep.subr.bf16.mxu0 %v2163_v30  ;;  %2192 = vmatprep.subr.bf16.mxu1 %v2191_v40  ;;  %v2247_v31 = vpack.c.bf16 %v970_v29, %v968_v28  ;;  %v967_v32 = vld [vmem:[#allocation10 + $0x40] sm:$0xff]  ;;  %v974_v35 = vld [vmem:[#allocation10 + $0x78] sm:$0xff]  ;;  %v973_v39 = vld [vmem:[#allocation10 + $0x70] sm:$0xff] }
 0x134   : > { %v971_v38 = vld [vmem:[#allocation10 + $0x60] sm:$0xff]  ;;  %v978_v41 = vld [vmem:[#allocation10 + $0x98] sm:$0xff]  ;;  %v977_v52 = vld [vmem:[#allocation10 + $0x90] sm:$0xff] }
 0x135   : > { %v2253_v42 = vpack.c.bf16 %v973_v39, %v971_v38  ;;  %v1750_v44 = vld [vmem:[%s3546_s17] ss:$0 sm:$0xff]  ;;  %v980_v54 = vld [vmem:[#allocation10 + $0xa8] sm:$0xff]  ;;  %v1094_v11 = vld [vmem:[#allocation11 + $0x10] sm:$0xff] }
 0x136   : > { %2166 = vmatpush3.bf16.msra.mxu0 %v2163_v30  ;;  %2194 = vmatpush3.bf16.msra.mxu1 %v2191_v40  ;;  %v2245_v30 = vpack.c.bf16 %v965_v27, %v963_v26  ;;  %v976_v40 = vld [vmem:[#allocation10 + $0x88] sm:$0xff]  ;;  %v975_v51 = vld [vmem:[#allocation10 + $0x80] sm:$0xff]  ;;  %v1095_v13 = vld [vmem:[#allocation11 + $0x18] sm:$0xff] }
 0x137   : > { %2168 = vmatprep.subr.bf16.mxu0 %v2167_v33  ;;  %2196 = vmatprep.subr.bf16.mxu1 %v2195_v43  ;;  %v979_v57 = vld [vmem:[#allocation10 + $0xa0] sm:$0xff]  ;;  %v984_v60 = vld [vmem:[#allocation10 + $0xc8] sm:$0xff]  ;;  %v1099_v26 = vld [vmem:[#allocation11 + $0x38] sm:$0xff] }
 0x138   : > { %v987_v6 = vld [vmem:[#allocation10 + $0xe0] sm:$0xff]  ;;  %v1097_v23 = vld [vmem:[#allocation11 + $0x28] sm:$0xff]  ;;  %v1107_v38 = vld [vmem:[#allocation11 + $0x78] sm:$0xff] }
 0x139   : > { %v1092_v9 = vld [vmem:[#allocation11] sm:$0xff]  ;;  %v1101_v29 = vld [vmem:[#allocation11 + $0x48] sm:$0xff] }
 0x13a   : > { %2170 = vmatpush3.bf16.msra.mxu0 %v2167_v33  ;;  %2198 = vmatpush3.bf16.msra.mxu1 %v2195_v43  ;;  %v969_v33 = vld [vmem:[#allocation10 + $0x50] sm:$0xff]  ;;  %v2255_v43 = vpack.c.bf16 %v978_v41, %v976_v40  ;;  %v1752_v15 = vld [vmem:[%s3546_s17 + $0x1] ss:$0 sm:$0xff]  ;;  %v1193_v41 = vld [vmem:[#allocation13 + $0x8] sm:$0xff] }
 0x13b   : > { %2172 = vmatprep.subr.bf16.mxu0 %v2171_v36  ;;  %2200 = vmatprep.subr.bf16.mxu1 %v2199_v47  ;;  %v1096_v22 = vld [vmem:[#allocation11 + $0x20] sm:$0xff] }
 0x13c   : > { %v1100_v28 = vld [vmem:[#allocation11 + $0x40] sm:$0xff] }
 0x13d   : > { %v1192_v40 = vld [vmem:[#allocation13] sm:$0xff] }
 0x13e   : > { %2174 = vmatpush3.bf16.msra.mxu0 %v2171_v36  ;;  %2202 = vmatpush3.bf16.msra.mxu1 %v2199_v47  ;;  %v2249_v36 = vpack.c.bf16 %v969_v33, %v967_v32  ;;  %v1103_v32 = vld [vmem:[#allocation11 + $0x58] sm:$0xff]  ;;  %v1104_v33 = vld [vmem:[#allocation11 + $0x60] sm:$0xff] }
 0x13f   : > { %2204 = vmatprep.subr.bf16.mxu1 %v2203_v49  ;;  %2208 = vmatprep.subr.bf16.mxu0 %v2207_v53 }
 0x141   : > { %1931 = vmatmul.mubr.f32.vlgmr.msra.gmra.mrb[0].mxu0 %v656_v37  ;;  %v2251_v37 = vpack.c.bf16 %v974_v35, %v972_v34  ;;  %v1105_v35 = vld [vmem:[#allocation11 + $0x68] sm:$0xff] }
 0x142   : > { %2206 = vmatpush3.bf16.msra.mxu1 %v2203_v49  ;;  %2210 = vmatpush3.bf16.msra.mxu0 %v2207_v53  ;;  %v2257_v53 = vpack.c.bf16 %v977_v52, %v975_v51  ;;  %v993_v52 = vlaneseq }
 0x143   : > { %2212 = vmatprep.subr.bf16.mxu0 %v2211_v55  ;;  %2240 = vmatprep.subr.bf16.mxu1 %v2239_v20 }
 0x146   : > { %2214 = vmatpush3.bf16.msra.mxu0 %v2211_v55  ;;  %v982_v55 = vld [vmem:[#allocation10 + $0xb8] sm:$0xff] }
 0x147   : > { %2216 = vmatprep.subr.bf16.mxu0 %v2215_v58  ;;  %v2259_v56 = vpack.c.bf16 %v982_v55, %v980_v54  ;;  %v991_v55 = vld [vmem:[%s3547_s11] sm:$0x3]  ;;  %s3400_s11 = scalar_lea.hbm %s3550_s10, %s1771_s27 }
 0x14a   : > { %2218 = vmatpush3.bf16.msra.mxu0 %v2215_v58  ;;  %v981_v58 = vld [vmem:[#allocation10 + $0xb0] sm:$0xff] }
 0x14b   : > { %2220 = vmatprep.subr.bf16.mxu0 %v2219_v61  ;;  %v2261_v59 = vpack.c.bf16 %v981_v58, %v979_v57 }
 0x14e   : > { %2222 = vmatpush3.bf16.msra.mxu0 %v2219_v61  ;;  %v986_v61 = vld [vmem:[#allocation10 + $0xd8] sm:$0xff] }
 0x14f   : > { %2224 = vmatprep.subr.bf16.mxu0 %v2223_v7 }
 0x152   : > { %2226 = vmatpush3.bf16.msra.mxu0 %v2223_v7  ;;  %v989_v7 = vld [vmem:[#allocation10 + $0xf0] sm:$0xff] }
 0x153   : > { %2228 = vmatprep.subr.bf16.mxu0 %v2227_v10  ;;  %v2269_v8 = vpack.c.bf16 %v989_v7, %v987_v6  ;;  %v1080_v7 = vld [vmem:[%s570_s14] sm:$0xff] }
 0x156   : > { %2230 = vmatpush3.bf16.msra.mxu0 %v2227_v10  ;;  %v1093_v10 = vld [vmem:[#allocation11 + $0x8] sm:$0xff] }
 0x157   : > { %2232 = vmatprep.subr.bf16.mxu0 %v2231_v14  ;;  %v2271_v12 = vpack.c.bf16 %v1093_v10, %v1092_v9  ;;  %v1081_v10 = vld [vmem:[%s570_s14 + $0x8] sm:$0xff] }
 0x15a   : > { %2234 = vmatpush3.bf16.msra.mxu0 %v2231_v14  ;;  %v2275_v14 = vpack.c.bf16 %v1095_v13, %v1094_v11 }
 0x15b   : > { %2236 = vmatprep.subr.bf16.mxu0 %v2235_v16 }
 0x15e   : > { %2238 = vmatpush3.bf16.msra.mxu0 %v2235_v16 }
 0x15f   : > { %2272 = vmatprep.subr.bf16.mxu0 %v2271_v12 }
 0x214   : > { %v1932_v63 = vpop.f32.mrb[0].mxu0 }
 0x215   : > { %v752_v0 = vadd.f32 %v1932_v63, %v1749_v62  ;;  %v746_v1 = vpop.f32.mrb[1].mxu0  ;;  %v2263_v63 = vpack.c.bf16 %v986_v61, %v984_v60 }
 0x216   : > { %v747_v2 = vadd.f32 %v1749_v62, %v746_v1  ;;  %v983_v62 = vld [vmem:[#allocation10 + $0xc0] sm:$0xff]  ;;  %v988_v1 = vld [vmem:[#allocation10 + $0xe8] sm:$0xff] }
 0x218   : > { %2525 = vtanh.f32 %v747_v2  ;;  %v990_v2 = vld [vmem:[#allocation10 + $0xf8] sm:$0xff] }
 0x219   : > { %2527 = vtanh.f32 %v752_v0  ;;  %v985_v0 = vld [vmem:[#allocation10 + $0xd0] sm:$0xff]  ;;  %v2267_v5 = vpack.c.bf16 %v990_v2, %v988_v1 }
 0x222   : > { %v2526_v3 = vpop.eup %2525 }
 0x223   : > { %v2528_v4 = vpop.eup %2527  ;;  %1965 = vmatprep.mubr.f32.mxu1 %v2526_v3  ;;  %v2917_v3 = vmov 0.0  }
 0x224   : > { %1966 = vmatmul.mubr.f32.vlgmr.msra.gmra.mrb[0].mxu1 %v2528_v4  ;;  %v2265_v4 = vpack.c.bf16 %v985_v0, %v983_v62 }
 0x225   : > { %2242 = vmatpush1.bf16.msra.mxu1 %v2241_v24  ;;  %1067 = vmatprep.mubr.f32.mxu1 %v2917_v3  ;;  %v2279_v24 = vpack.c.bf16 %v1097_v23, %v1096_v22  ;;  %v1205_v22 = vld [vmem:[#allocation13 + $0x68] sm:$0xff]  ;;  %v1206_v23 = vld [vmem:[#allocation13 + $0x70] sm:$0xff] }
 0x226   : > { %2244 = vmatprep.subr.bf16.mxu1 %v2243_v25  ;;  %v1098_v25 = vld [vmem:[#allocation11 + $0x30] sm:$0xff] }
 0x227   : > { %v2283_v27 = vpack.c.bf16 %v1099_v26, %v1098_v25  ;;  %v1207_v25 = vld [vmem:[#allocation13 + $0x78] sm:$0xff] }
 0x228   : > { %v2331_v26 = vpack.c.bf16 %v1207_v25, %v1206_v23  ;;  %v1409_v23 = vld [vmem:[#allocation14 + $0x78] sm:$0xff]  ;;  %v1756_v25 = vld [vmem:[%s3549_s15 + $0x1] ss:$0 sm:$0xff] }
 0x229   : > { %2246 = vmatpush1.bf16.msra.mxu1 %v2245_v30  ;;  %v2287_v30 = vpack.c.bf16 %v1101_v29, %v1100_v28  ;;  %v1294_v28 = vld [vmem:[#allocation13 + $0x88] sm:$0xff]  ;;  %v1295_v29 = vld [vmem:[#allocation13 + $0x90] sm:$0xff] }
 0x22a   : > { %2248 = vmatprep.subr.bf16.mxu1 %v2247_v31  ;;  %v1102_v31 = vld [vmem:[#allocation11 + $0x50] sm:$0xff] }
 0x22b   : > { %v2291_v34 = vpack.c.bf16 %v1103_v32, %v1102_v31  ;;  %v1296_v31 = vld [vmem:[#allocation13 + $0x98] sm:$0xff] }
 0x22c   : > { %v2339_v32 = vpack.c.bf16 %v1296_v31, %v1295_v29 }
 0x22d   : > { %2250 = vmatpush1.bf16.msra.mxu1 %v2249_v36  ;;  %v2295_v36 = vpack.c.bf16 %v1105_v35, %v1104_v33  ;;  %v1297_v33 = vld [vmem:[#allocation13 + $0xa0] sm:$0xff] }
 0x22e   : > { %2252 = vmatprep.subr.bf16.mxu1 %v2251_v37  ;;  %v1106_v37 = vld [vmem:[#allocation11 + $0x70] sm:$0xff] }
 0x22f   : > { %v2299_v39 = vpack.c.bf16 %v1107_v38, %v1106_v37  ;;  %v1300_v37 = vld [vmem:[#allocation13 + $0xb8] sm:$0xff] }
 0x231   : > { %2254 = vmatpush1.bf16.msra.mxu1 %v2253_v42  ;;  %v1194_v42 = vld [vmem:[#allocation13 + $0x10] sm:$0xff] }
 0x232   : > { %2256 = vmatprep.subr.bf16.mxu1 %v2255_v43  ;;  %v2303_v43 = vpack.c.bf16 %v1193_v41, %v1192_v40 }
 0x235   : > { %2258 = vmatpush1.bf16.msra.mxu1 %v2257_v53  ;;  %v994_v53 = vshrl.u32 %v993_v52, 7  ;;  %v1305_v52 = vld [vmem:[#allocation13 + $0xe0] sm:$0xff] }
 0x236   : > { %2260 = vmatprep.subr.bf16.mxu1 %v2259_v56 }
 0x237   : > { %v995_v54 = vsub.s32 0, %v994_v53  ;;  %v999_v56 = vsub.s32 1, %v994_v53  ;;  %v1306_v53 = vld [vmem:[#allocation13 + $0xe8] sm:$0xff] }
 0x239   : > { %2262 = vmatpush1.bf16.msra.mxu1 %v2261_v59  ;;  %v996_v57 = vrot.slane %v991_v55, %v995_v54  ;;  %v1000_v58 = vrot.slane %v991_v55, %v999_v56  ;;  %v1307_v54 = vld [vmem:[#allocation13 + $0xf0] sm:$0xff]  ;;  %v2359_v55 = vpack.c.bf16 %v1306_v53, %v1305_v52  ;;  %v1308_v56 = vld [vmem:[#allocation13 + $0xf8] sm:$0xff] }
 0x23a   : > { %2264 = vmatprep.subr.bf16.mxu1 %v2263_v63 }
 0x23d   : > { %2266 = vmatpush1.bf16.msra.mxu1 %v2265_v4 }
 0x23e   : > { %2268 = vmatprep.subr.bf16.mxu1 %v2267_v5 }
 0x241   : > { %2270 = vmatpush1.bf16.msra.mxu1 %v2269_v8 }
 0x242   : > { %2304 = vmatprep.subr.bf16.mxu1 %v2303_v43 }
 0x2f7   : > { %v1967_v45 = vpop.f32.mrb[0].mxu1 }
 0x2f8   : > { %v852_v46 = vadd.f32 %v1967_v45, %v1750_v44  ;;  %v846_v47 = vpop.f32.mrb[1].mxu1 }
 0x2f9   : > { %v847_v48 = vadd.f32 %v1750_v44, %v846_v47  ;;  %v1195_v44 = vld [vmem:[#allocation13 + $0x18] sm:$0xff]  ;;  %v1197_v47 = vld [vmem:[#allocation13 + $0x28] sm:$0xff] }
 0x2fa   : > { %v2307_v45 = vpack.c.bf16 %v1195_v44, %v1194_v42 }
 0x2fb   : > { %2529 = vtanh.f32 %v847_v48 }
 0x2fc   : > { %2531 = vtanh.f32 %v852_v46  ;;  %v1196_v46 = vld [vmem:[#allocation13 + $0x20] sm:$0xff] }
 0x2fd   : > { %v2311_v48 = vpack.c.bf16 %v1197_v47, %v1196_v46  ;;  %v1301_v46 = vld [vmem:[#allocation13 + $0xc0] sm:$0xff]  ;;  %v1302_v47 = vld [vmem:[#allocation13 + $0xc8] sm:$0xff] }
 0x305   : > { %v2530_v49 = vpop.eup %2529 }
 0x306   : > { %v2532_v50 = vpop.eup %2531  ;;  %2000 = vmatprep.mubr.f32.mxu0 %v2530_v49  ;;  %v1198_v49 = vld [vmem:[#allocation13 + $0x30] sm:$0xff] }
 0x307   : > { %2001 = vmatmul.mubr.f32.vlgmr.msra.gmra.mrb[2].mxu0 %v2532_v50  ;;  %v1199_v50 = vld [vmem:[#allocation13 + $0x38] sm:$0xff] }
 0x308   : > { %2274 = vmatpush3.bf16.msra.mxu0 %v2271_v12  ;;  %v2315_v51 = vpack.c.bf16 %v1199_v50, %v1198_v49  ;;  %v1303_v49 = vld [vmem:[#allocation13 + $0xd0] sm:$0xff]  ;;  %v1304_v50 = vld [vmem:[#allocation13 + $0xd8] sm:$0xff] }
 0x309   : > { %2276 = vmatprep.subr.bf16.mxu0 %v2275_v14 }
 0x30c   : > { %2278 = vmatpush3.bf16.msra.mxu0 %v2275_v14 }
 0x30d   : > { %2280 = vmatprep.subr.bf16.mxu0 %v2279_v24 }
 0x310   : > { %2282 = vmatpush3.bf16.msra.mxu0 %v2279_v24 }
 0x311   : > { %2284 = vmatprep.subr.bf16.mxu0 %v2283_v27 }
 0x314   : > { %2286 = vmatpush3.bf16.msra.mxu0 %v2283_v27  ;;  %v1293_v27 = vld [vmem:[#allocation13 + $0x80] sm:$0xff] }
 0x315   : > { %2288 = vmatprep.subr.bf16.mxu0 %v2287_v30 }
 0x318   : > { %2290 = vmatpush3.bf16.msra.mxu0 %v2287_v30  ;;  %v2335_v30 = vpack.c.bf16 %v1294_v28, %v1293_v27 }
 0x319   : > { %2292 = vmatprep.subr.bf16.mxu0 %v2291_v34 }
 0x31c   : > { %2294 = vmatpush3.bf16.msra.mxu0 %v2291_v34  ;;  %v1298_v34 = vld [vmem:[#allocation13 + $0xa8] sm:$0xff] }
 0x31d   : > { %2296 = vmatprep.subr.bf16.mxu0 %v2295_v36  ;;  %v2343_v35 = vpack.c.bf16 %v1298_v34, %v1297_v33 }
 0x320   : > { %2298 = vmatpush3.bf16.msra.mxu0 %v2295_v36  ;;  %v1299_v36 = vld [vmem:[#allocation13 + $0xb0] sm:$0xff] }
 0x321   : > { %2300 = vmatprep.subr.bf16.mxu0 %v2299_v39  ;;  %v2347_v38 = vpack.c.bf16 %v1300_v37, %v1299_v36 }
 0x324   : > { %2302 = vmatpush3.bf16.msra.mxu0 %v2299_v39  ;;  %v1753_v39 = vld [vmem:[%s3548_s8] ss:$0 sm:$0xff]  ;;  %s2789_s8 = sshll.u32 %s2918_s6, 4  ;;  %s2790_s8 = int_to_ptr.vmem [resolvable:$false] %s2789_s8 }
 0x325   : > { %2336 = vmatprep.subr.bf16.mxu0 %v2335_v30  ;;  %p2792_p9 = scmp.lt.s32.totalorder %s3394_s13, %s2790_s8 }
 0x3da   : > { %v2002_v16 = vpop.f32.mrb[2].mxu0 }
 0x3db   : > { %v948_v17 = vpop.f32.mrb[3].mxu0  ;;  %v954_v19 = vadd.f32 %v2002_v16, %v1752_v15  ;;  %v1201_v16 = vld [vmem:[#allocation13 + $0x48] sm:$0xff] }
 0x3dc   : > { %v949_v18 = vadd.f32 %v1752_v15, %v948_v17  ;;  %v1200_v15 = vld [vmem:[#allocation13 + $0x40] sm:$0xff] }
 0x3dd   : > { %v2319_v17 = vpack.c.bf16 %v1201_v16, %v1200_v15  ;;  %v1404_v16 = vld [vmem:[#allocation14 + $0x50] sm:$0xff] }
 0x3de   : > { %2533 = vtanh.f32 %v949_v18  ;;  %v1202_v18 = vld [vmem:[#allocation13 + $0x50] sm:$0xff] }
 0x3df   : > { %2535 = vtanh.f32 %v954_v19  ;;  %v1203_v19 = vld [vmem:[#allocation13 + $0x58] sm:$0xff] }
 0x3e8   : > { %v2534_v20 = vpop.eup %2533 }
 0x3e9   : > { %1068 = vmatmul.mubr.f32.vlgmr.msra.gmra.mrb[2].mxu1 %v2534_v20  ;;  %v2536_v21 = vpop.eup %2535  ;;  %v2323_v20 = vpack.c.bf16 %v1203_v19, %v1202_v18  ;;  %v1406_v19 = vld [vmem:[#allocation14 + $0x60] sm:$0xff] }
 0x3ea   : > { %1073 = vmatprep.mubr.f32.mxu1 %v2917_v3  ;;  %2306 = vmatpush3.bf16.msra.mxu1 %v2303_v43 }
 0x3eb   : > { %2308 = vmatprep.subr.bf16.mxu1 %v2307_v45 }
 0x3ed   : > { %1074 = vmatmul.mubr.f32.gmra.mrb[4].mxu1 %v2536_v21  ;;  %v1204_v21 = vld [vmem:[#allocation13 + $0x60] sm:$0xff] }
 0x3ee   : > { %2310 = vmatpush3.bf16.msra.mxu1 %v2307_v45  ;;  %v2327_v24 = vpack.c.bf16 %v1205_v22, %v1204_v21  ;;  %v1408_v21 = vld [vmem:[#allocation14 + $0x70] sm:$0xff] }
 0x3ef   : > { %2312 = vmatprep.subr.bf16.mxu1 %v2311_v48 }
 0x3f2   : > { %2314 = vmatpush3.bf16.msra.mxu1 %v2311_v48  ;;  %v2351_v48 = vpack.c.bf16 %v1302_v47, %v1301_v46 }
 0x3f3   : > { %2316 = vmatprep.subr.bf16.mxu1 %v2315_v51 }
 0x3f6   : > { %2318 = vmatpush3.bf16.msra.mxu1 %v2315_v51  ;;  %v2355_v51 = vpack.c.bf16 %v1304_v50, %v1303_v49 }
 0x3f7   : > { %2320 = vmatprep.subr.bf16.mxu1 %v2319_v17 }
 0x3fa   : > { %2322 = vmatpush3.bf16.msra.mxu1 %v2319_v17  ;;  %v1405_v17 = vld [vmem:[#allocation14 + $0x58] sm:$0xff] }
 0x3fb   : > { %2324 = vmatprep.subr.bf16.mxu1 %v2323_v20  ;;  %v2387_v18 = vpack.c.bf16 %v1405_v17, %v1404_v16 }
 0x3fe   : > { %2326 = vmatpush3.bf16.msra.mxu1 %v2323_v20  ;;  %v1407_v20 = vld [vmem:[#allocation14 + $0x68] sm:$0xff] }
 0x3ff   : > { %2328 = vmatprep.subr.bf16.mxu1 %v2327_v24  ;;  %v2391_v22 = vpack.c.bf16 %v1407_v20, %v1406_v19 }
 0x402   : > { %2330 = vmatpush3.bf16.msra.mxu1 %v2327_v24  ;;  %v2395_v24 = vpack.c.bf16 %v1409_v23, %v1408_v21 }
 0x403   : > { %2332 = vmatprep.subr.bf16.mxu1 %v2331_v26 }
 0x406   : > { %2334 = vmatpush3.bf16.msra.mxu1 %v2331_v26 }
 0x4bc   : > { %v1069_v59 = vpop.f32.mrb[2].mxu1 }
 0x4bd   : > { %v1070_v60 = vadd.f32 %v1069_v59, %v996_v57  ;;  %v1071_v61 = vpop.f32.mrb[3].mxu1  ;;  %v1395_v59 = vld [vmem:[#allocation14 + $0x8] sm:$0xff] }
 0x4be   : > { %v1072_v62 = vadd.f32 %v1071_v61, %v1000_v58 }
 0x4bf   : > { %1498 = vst [vmem:[%s3374_s5] sm:$0xff] %v1070_v60 }
 0x4c0   : > { %v1082_v63 = vmul.f32 0.5, %v1072_v62  ;;  %1499 = vst [vmem:[%s3374_s5 + $0x8] sm:$0xff] %v1072_v62  ;;  %v1075_v0 = vpop.f32.mrb[4].mxu1  ;;  %v1397_v62 = vld [vmem:[#allocation14 + $0x18] sm:$0xff] }
 0x4c1   : > { %v1076_v1 = vadd.f32 %v1075_v0, %v996_v57  ;;  %v1077_v2 = vpop.f32.mrb[5].mxu1  ;;  %v2363_v57 = vpack.c.bf16 %v1308_v56, %v1307_v54  ;;  %v1398_v0 = vld [vmem:[#allocation14 + $0x20] sm:$0xff] }
 0x4c2   : > { %v1084_v3 = vmul.f32 1.442695, %v1082_v63  ;;  %v1078_v4 = vadd.f32 %v1077_v2, %v1000_v58  ;;  %v1394_v58 = vld [vmem:[#allocation14] sm:$0xff] }
 0x4c3   : > { %1500 = vst [vmem:[%s3374_s5 + $0x10] sm:$0xff] %v1076_v1  ;;  %v2367_v61 = vpack.c.bf16 %v1395_v59, %v1394_v58 }
 0x4c4   : > { %2537 = vpow2.f32 %v1084_v3  ;;  %v1083_v5 = vmul.f32 0.5, %v1078_v4  ;;  %1501 = vst [vmem:[%s3374_s5 + $0x18] sm:$0xff] %v1078_v4  ;;  %v1400_v3 = vld [vmem:[#allocation14 + $0x30] sm:$0xff]  ;;  %v1401_v4 = vld [vmem:[#allocation14 + $0x38] sm:$0xff]  ;;  %s2791_s5 = scalar_lea.vmem %s2790_s8, 1024 }
 0x4c5   : > { %2368 = vmatprep.subr.bf16.mxu1 %v2367_v61  ;;  %p2793_p8 = scmp.lt.s32.totalorder %s2791_s5, %s2785_s2 }
 0x4c6   : > { %v1086_v6 = vmul.f32 1.442695, %v1083_v5  ;;  %v2379_v5 = vpack.c.bf16 %v1401_v4, %v1400_v3 }
 0x4c7   : > { %p2794_p11 = por %p2793_p8, %p2792_p9 }
 0x4c8   : > { %2539 = vpow2.f32 %v1086_v6  ;;  %v1754_v6 = vld [vmem:[%s3549_s15] ss:$0 sm:$0xff] }
 0x4c9   : > { %p2795_p3 = pnand %p2794_p11, %p2788_p7 }
 0x4ce   : > { %v2538_v8 = vpop.eup %2537 }
 0x4cf   : > { %v1088_v9 = vmul.f32 %v2538_v8, %v1080_v7 }
 0x4d1   : > { %v1090_v11 = vadd.f32 %v1088_v9, %v1070_v60  ;;  %v1396_v60 = vld [vmem:[#allocation14 + $0x10] sm:$0xff] }
 0x4d2   : > { %v2540_v12 = vpop.eup %2539  ;;  %v2371_v63 = vpack.c.bf16 %v1397_v62, %v1396_v60 }
 0x4d3   : > { %2035 = vmatprep.mubr.f32.mxu0 %v1090_v11  ;;  %v1089_v13 = vmul.f32 %v2540_v12, %v1081_v10 }
 0x4d5   : > { %v1091_v14 = vadd.f32 %v1089_v13, %v1076_v1  ;;  %v1399_v1 = vld [vmem:[#allocation14 + $0x28] sm:$0xff]  ;;  %v1402_v13 = vld [vmem:[#allocation14 + $0x40] sm:$0xff] }
 0x4d6   : > { %v2375_v2 = vpack.c.bf16 %v1399_v1, %v1398_v0 }
 0x4d7   : > { %2036 = vmatmul.mubr.f32.vlgmr.msra.gmra.mrb[4].mxu0 %v1091_v14  ;;  %v1403_v14 = vld [vmem:[#allocation14 + $0x48] sm:$0xff] }
 0x4d8   : > { %2338 = vmatpush3.bf16.msra.mxu0 %v2335_v30  ;;  %v2383_v15 = vpack.c.bf16 %v1403_v14, %v1402_v13 }
 0x4d9   : > { %2340 = vmatprep.subr.bf16.mxu0 %v2339_v32 }
 0x4dc   : > { %2342 = vmatpush3.bf16.msra.mxu0 %v2339_v32 }
 0x4dd   : > { %2344 = vmatprep.subr.bf16.mxu0 %v2343_v35 }
 0x4e0   : > { %2346 = vmatpush3.bf16.msra.mxu0 %v2343_v35 }
 0x4e1   : > { %2348 = vmatprep.subr.bf16.mxu0 %v2347_v38 }
 0x4e4   : > { %2350 = vmatpush3.bf16.msra.mxu0 %v2347_v38 }
 0x4e5   : > { %2352 = vmatprep.subr.bf16.mxu0 %v2351_v48 }
 0x4e8   : > { %2354 = vmatpush3.bf16.msra.mxu0 %v2351_v48 }
 0x4e9   : > { %2356 = vmatprep.subr.bf16.mxu0 %v2355_v51 }
 0x4ec   : > { %2358 = vmatpush3.bf16.msra.mxu0 %v2355_v51 }
 0x4ed   : > { %2360 = vmatprep.subr.bf16.mxu0 %v2359_v55 }
 0x4f0   : > { %2362 = vmatpush3.bf16.msra.mxu0 %v2359_v55 }
 0x4f1   : > { %2364 = vmatprep.subr.bf16.mxu0 %v2363_v57 }
 0x4f4   : > { %2366 = vmatpush3.bf16.msra.mxu0 %v2363_v57 }
 0x5aa   : > { %v2037_v40 = vpop.f32.mrb[4].mxu0 }
 0x5ab   : > { %v1187_v41 = vadd.f32 %v2037_v40, %v1753_v39  ;;  %v1181_v42 = vpop.f32.mrb[5].mxu0 }
 0x5ac   : > { %v1182_v43 = vadd.f32 %v1753_v39, %v1181_v42 }
 0x5ae   : > { %2541 = vtanh.f32 %v1182_v43 }
 0x5af   : > { %2543 = vtanh.f32 %v1187_v41 }
 0x5b8   : > { %v2542_v44 = vpop.eup %2541 }
 0x5b9   : > { %v2544_v45 = vpop.eup %2543  ;;  %2070 = vmatprep.mubr.f32.mxu1 %v2542_v44 }
 0x5ba   : > { %2071 = vmatmul.mubr.f32.vlgmr.msra.gmra.mrb[6].mxu1 %v2544_v45 }
 0x5bb   : > { %2370 = vmatpush3.bf16.msra.mxu1 %v2367_v61 }
 0x5bc   : > { %2372 = vmatprep.subr.bf16.mxu1 %v2371_v63 }
 0x5bf   : > { %2374 = vmatpush3.bf16.msra.mxu1 %v2371_v63 }
 0x5c0   : > { %2376 = vmatprep.subr.bf16.mxu1 %v2375_v2 }
 0x5c3   : > { %2378 = vmatpush3.bf16.msra.mxu1 %v2375_v2 }
 0x5c4   : > { %2380 = vmatprep.subr.bf16.mxu1 %v2379_v5 }
 0x5c7   : > { %2382 = vmatpush3.bf16.msra.mxu1 %v2379_v5 }
 0x5c8   : > { %2384 = vmatprep.subr.bf16.mxu1 %v2383_v15 }
 0x5cb   : > { %2386 = vmatpush3.bf16.msra.mxu1 %v2383_v15 }
 0x5cc   : > { %2388 = vmatprep.subr.bf16.mxu1 %v2387_v18 }
 0x5cf   : > { %2390 = vmatpush3.bf16.msra.mxu1 %v2387_v18 }
 0x5d0   : > { %2392 = vmatprep.subr.bf16.mxu1 %v2391_v22 }
 0x5d3   : > { %2394 = vmatpush3.bf16.msra.mxu1 %v2391_v22 }
 0x5d4   : > { %2396 = vmatprep.subr.bf16.mxu1 %v2395_v24 }
 0x5d7   : > { %2398 = vmatpush3.bf16.msra.mxu1 %v2395_v24 }
 0x68d   : > { %v2072_v7 = vpop.f32.mrb[6].mxu1 }
 0x68e   : > { %v1287_v8 = vadd.f32 %v2072_v7, %v1754_v6  ;;  %v1281_v9 = vpop.f32.mrb[7].mxu1 }
 0x68f   : > { %v1282_v10 = vadd.f32 %v1754_v6, %v1281_v9 }
 0x691   : > { %2545 = vtanh.f32 %v1282_v10 }
 0x692   : > { %2547 = vtanh.f32 %v1287_v8 }
 0x69b   : > { %v2546_v11 = vpop.eup %2545 }
 0x69c   : > { %v2548_v12 = vpop.eup %2547  ;;  %2105 = vmatprep.mubr.f32.mxu0 %v2546_v11 }
 0x69d   : > { %2106 = vmatmul.mubr.f32.vlgmr.msra.gmra.mrb[6].mxu0 %v2548_v12 }
 0x770   : > { %v2107_v26 = vpop.f32.mrb[6].mxu0 }
 0x771   : > { %v1389_v27 = vadd.f32 %v2107_v26, %v1756_v25  ;;  %v1383_v28 = vpop.f32.mrb[7].mxu0 }
 0x772   : > { %v1384_v29 = vadd.f32 %v1756_v25, %v1383_v28 }
 0x774   : > { %2549 = vtanh.f32 %v1384_v29 }
 0x775   : > { %2551 = vtanh.f32 %v1389_v27 }
 0x77e   : > { %v2550_v30 = vpop.eup %2549 }
 0x77f   : > { %v2552_v31 = vpop.eup %2551  ;;  %2140 = vmatprep.mubr.f32.mxu1 %v2550_v30 }
 0x780   : > { %2141 = vmatmul.mubr.f32.vlgmr.msra.gmra.mrb[8].mxu1 %v2552_v31 }
 0x781   : > { %2798 = shalt.err (!%p2795_p3)
}
 0x782   : > { %s2799_s25 = scalar_lea.hbm %s3400_s11, 512  ;;  %s2803_s23 = scalar_lea.hbm %s3550_s10, 1024 }
 0x783   : > { %p2800_p12 = scmp.ne.s32.totalorder %s3400_s11, %s2799_s25  ;;  %p2804_p0 = scmp.lt.u32.totalorder %s3400_s11, %s3550_s10 }
 0x784   : > { %p2805_p6 = scmp.lt.u32.totalorder %s2803_s23, %s2799_s25  ;;  %p2807_p4 = scmp.lt.u32.totalorder %s2799_s25, %s3400_s11 }
 0x785   : > { %p2801_p1 = pnand %p2800_p12, %p3551_p10 }
 0x786   : > { %p2806_p2 = por %p2805_p6, %p2804_p0 }
 0x787   : > { %p2802_p13 = pneg %p2801_p1 }
 0x788   : > { %p2808_p5 = por %p2807_p4, %p2806_p2 }
 0x78a   : > { %p2809_p7 = pnand %p2808_p5, %p2802_p13 }
 0x78c   : > { %2812 = shalt.err (!%p2809_p7)
}
 0x78d   : > { %s2919_s9 = smov 256   ;;  %s2920_s2 = smov 16  }
 0x78e   : > { %2428 = dma.vmem_to_hbm [thread:$0]  (%p3551_p10), %s3394_s13, 512, %s3400_s11, %s1508_s16, %s2919_s9, %s2919_s9, %s2920_s2  }
 0x78f   : > { %s3552_s5 = sld [smem:[#allocation37_spill]]  ;;  %s1769_s25 = sshll.u32 %s3025_s24, 8 }
 0x790   : > { %s643_s14 = scalar_lea.vmem [#allocation16], %s3327_s4  ;;  %s3553_s13 = sld [smem:[#allocation38_spill]] }
 0x791   : > { %s1521_s29 = sshll.u32 %s643_s14, 4  ;;  %s1503_s16 = scalar_lea.sflag [#allocation4], %s3324_s28  ;;  %s3436_s29 = int_to_ptr.vmem [resolvable:$true] %s1521_s29 }
 0x792   : > { %s2813_s12 = scalar_lea.vmem %s3436_s29, 256  ;;  %s2921_s24 = smov [#allocation16]  }
 0x793   : > { %p2814_p9 = scmp.ne.s32.totalorder %s3436_s29, %s2813_s12  ;;  %s2817_s4 = sshll.u32 %s2921_s24, 4  ;;  %s2818_s4 = int_to_ptr.vmem [resolvable:$false] %s2817_s4 }
 0x794   : > { %s2819_s9 = scalar_lea.vmem %s2818_s4, 512  ;;  %p2820_p3 = scmp.lt.s32.totalorder %s3436_s29, %s2818_s4 }
 0x795   : > { %v1757_v32 = vld [vmem:[%s3552_s5] ss:$0 sm:$0xff]  ;;  %p2815_p8 = pnand %p2814_p9, %p3551_p10  ;;  %p2821_p12 = scmp.lt.s32.totalorder %s2819_s9, %s2813_s12 }
 0x796   : > { %s3434_s11 = scalar_lea.hbm %s3553_s13, %s1769_s25 }
 0x797   : > { %p2816_p11 = pneg %p2815_p8  ;;  %p2822_p1 = por %p2821_p12, %p2820_p3 }
 0x799   : > { %p2823_p13 = pnand %p2822_p1, %p2816_p11 }
 0x853   : > { %v2142_v33 = vpop.f32.mrb[8].mxu1 }
 0x854   : > { %v1489_v34 = vadd.f32 %v2142_v33, %v1757_v32  ;;  %v1483_v35 = vpop.f32.mrb[9].mxu1 }
 0x855   : > { %v1484_v36 = vadd.f32 %v1757_v32, %v1483_v35 }
 0x856   : > { %v1494_v37 = vmul.f32 1.442695, %v1489_v34 }
 0x857   : > { %v1492_v38 = vmul.f32 1.442695, %v1484_v36 }
 0x858   : > { %2553 = vpow2.f32 %v1494_v37 }
 0x859   : > { %2555 = vpow2.f32 %v1492_v38 }
 0x862   : > { %v2554_v39 = vpop.eup %2553 }
 0x863   : > { %v2556_v40 = vpop.eup %2555  ;;  %1497 = vst [vmem:[%s643_s14 + $0x8] sm:$0xff] %v2554_v39 }
 0x864   : > { %1496 = vst [vmem:[%s643_s14] sm:$0xff] %v2556_v40 }
 0x865   : > { %2826 = shalt.err (!%p2823_p13)
}
 0x866   : > { %s2827_s2 = scalar_lea.hbm %s3434_s11, 256  ;;  %s2831_s5 = scalar_lea.hbm %s3553_s13, 512 }
 0x867   : > { %p2828_p0 = scmp.ne.s32.totalorder %s3434_s11, %s2827_s2  ;;  %p2832_p4 = scmp.lt.u32.totalorder %s3434_s11, %s3553_s13 }
 0x868   : > { %p2833_p5 = scmp.lt.u32.totalorder %s2831_s5, %s2827_s2  ;;  %p2835_p9 = scmp.lt.u32.totalorder %s2827_s2, %s3434_s11 }
 0x869   : > { %p2829_p6 = pnand %p2828_p0, %p3551_p10 }
 0x86a   : > { %p2834_p7 = por %p2833_p5, %p2832_p4 }
 0x86b   : > { %p2830_p2 = pneg %p2829_p6 }
 0x86c   : > { %p2836_p8 = por %p2835_p9, %p2834_p7 }
 0x86e   : > { %p2837_p11 = pnand %p2836_p8, %p2830_p2 }
 0x870   : > { %2840 = shalt.err (!%p2837_p11)
}
 0x871   : > { %s2922_s23 = smov 128   ;;  %s2923_s27 = smov 8  }
 0x872   : > { %2427 = dma.vmem_to_hbm [thread:$0]  (%p3551_p10), %s3436_s29, 256, %s3434_s11, %s1503_s16, %s2922_s23, %s2922_s23, %s2923_s27  }
 0x873 PF: > { %s1553_s12 = sand.u32 1, %s2891_s18   ;;  %p3554_p3 = scmp.ne.s32.totalorder %s3535_s7, 0 }
 0x874   : > { %p3555_p12 = scmp.ge.s32.totalorder %s2903_s21, 2  ;;  %s1554_s24 = scalar_lea.sflag [#allocation4], %s1553_s12 }
 0x876   : > { %p2458_p1 = pnand %p3555_p12, %p3554_p3 }
 0x878   : > { %2882 = dma.done.wait (!%p2458_p1), %s1554_s24, 256  }
 0x879   : > { %2884 = vsyncadd (!%p2458_p1), %s1554_s24, 4294967040  ;;  %s1563_s4 = scalar_lea.sflag [#allocation18], %s1553_s12 }
 0x87a   : > { %2886 = dma.done.wait (!%p2458_p1), %s1563_s4, 512  }
 0x87b   : > { %2888 = vsyncadd (!%p2458_p1), %s1563_s4, 4294966784  ;;  %p38_p10 = scmp.ge.s32.totalorder %s3202_s26, 4   ;;  %s3556_s18 = smov %s2895_s19 }
 0x87c   : > { %s3557_s19 = smov %s2899_s20  ;;  %s3558_s20 = smov %s3213_s22 }
 0x87d   : > { %s3559_s21 = smov %s3202_s26  ;;  %40 = sbr.rel (!%p38_p10) target bundleno = 26 (0x1a), region = 179 }
 0x884   :  { %1568 = vsyncpa [#allocation3], 1 }
 0x885   :  { %1570 = vsyncpa [#allocation3 + $0x1], 1 }
 0x886   :  { %1571 = vsyncpa [#allocation6], 1 }
 0x887   :  { %1573 = vsyncpa [#allocation6 + $0x1], 1 }
 0x888   :  { %1574 = vsyncpa [#allocation9], 1 }
 0x889   :  { %1575 = vsyncpa [#allocation12], 1 }
 0x88a   :  { %1576 = vsyncpa [#allocation15], 1 }
 0x88b   :  { %1577 = vsyncpa [#allocation4], 1 }
 0x88c   :  { %1579 = vsyncpa [#allocation4 + $0x1], 1 }
 0x88d   :  { %1580 = vsyncpa [#allocation18], 1 }
 0x88e   :  { %1582 = vsyncpa [#allocation18 + $0x1], 1 }

// kernel: tpu_custom_call.1
= control target key start
LH: loop header
LB: loop body
LE: loop exit
PB: predicated region body
PF: predicated region fallthrough
CT: control target
= control target key end

     0   :  { %s3480_s0 = inlined_call_operand.hbm [shape: f32[32,128], index: 0, kind: input, shape index: {}]   ;;  %s3481_s1 = inlined_call_operand.hbm [shape: f32[32,128], index: 1, kind: input, shape index: {}]   ;;  %s3482_s2 = inlined_call_operand.hbm [shape: f32[128,128], index: 2, kind: input, shape index: {}]   ;;  %s3483_s3 = inlined_call_operand.vmem [shape: f32[1,128], index: 3, kind: input, shape index: {}]   ;;  %s3484_s4 = inlined_call_operand.hbm [shape: f32[2,128,128], index: 4, kind: input, shape index: {}]   ;;  %s3485_s5 = inlined_call_operand.vmem [shape: f32[2,1,128], index: 5, kind: input, shape index: {}]   ;;  %s3486_s6 = inlined_call_operand.hbm [shape: f32[128,256], index: 6, kind: input, shape index: {}]   ;;  %s3487_s7 = inlined_call_operand.vmem [shape: f32[1,256], index: 7, kind: input, shape index: {}]   ;;  %s3488_s8 = inlined_call_operand.hbm [shape: f32[128,128], index: 8, kind: input, shape index: {}]   ;;  %s3489_s9 = inlined_call_operand.vmem [shape: f32[1,128], index: 9, kind: input, shape index: {}]   ;;  %s3490_s10 = inlined_call_operand.hbm [shape: f32[2,128,128], index: 10, kind: input, shape index: {}]   ;;  %s3491_s11 = inlined_call_operand.vmem [shape: f32[2,1,128], index: 11, kind: input, shape index: {}]   ;;  %s3492_s12 = inlined_call_operand.hbm [shape: f32[128,128], index: 12, kind: input, shape index: {}]   ;;  %s3493_s13 = inlined_call_operand.vmem [shape: f32[1,128], index: 13, kind: input, shape index: {}]   ;;  %s3494_s14 = inlined_call_operand.hbm [shape: f32[32,128], index: 14, kind: output, shape index: {0}]   ;;  %s3495_s15 = inlined_call_operand.hbm [shape: f32[32,256], index: 15, kind: output, shape index: {1}]  }
   0x1   :  { %3507 = sst [smem:[#allocation27_spill]] %s3482_s2 }
   0x2   :  { %3508 = sst [smem:[#allocation28_spill]] %s3484_s4 }
   0x3   :  { %3509 = sst [smem:[#allocation29_spill]] %s3485_s5 }
   0x4   :  { %3510 = sst [smem:[#allocation30_spill]] %s3486_s6 }
   0x5   :  { %3511 = sst [smem:[#allocation31_spill]] %s3487_s7 }
   0x6   :  { %3512 = sst [smem:[#allocation32_spill]] %s3488_s8 }
   0x7   :  { %3513 = sst [smem:[#allocation33_spill]] %s3489_s9 }
   0x8   :  { %3514 = sst [smem:[#allocation34_spill]] %s3490_s10 }
   0x9   :  { %3515 = sst [smem:[#allocation35_spill]] %s3491_s11 }
   0xa   :  { %3516 = sst [smem:[#allocation36_spill]] %s3492_s12 }
   0xb   :  { %3517 = sst [smem:[#allocation37_spill]] %s3493_s13 }
   0xc   :  { %3518 = sst [smem:[#allocation38_spill]] %s3494_s14 }
   0xd   :  { %3519 = sst [smem:[#allocation39_spill]] %s3495_s15 }
   0xe   :  { %21 = vsyncpa [#allocation3], 0 }
   0xf   :  { %23 = vsyncpa [#allocation3 + $0x1], 0 }
  0x10   :  { %24 = vsyncpa [#allocation6], 0 }
  0x11   :  { %26 = vsyncpa [#allocation6 + $0x1], 0 }
  0x12   :  { %27 = vsyncpa [#allocation9], 0 }
  0x13   :  { %28 = vsyncpa [#allocation12], 0 }
  0x14   :  { %29 = vsyncpa [#allocation15], 0 }
  0x15   :  { %30 = vsyncpa [#allocation4], 0 }
  0x16   :  { %32 = vsyncpa [#allocation4 + $0x1], 0 }
  0x17   :  { %33 = vsyncpa [#allocation18], 0 }
  0x18   :  { %35 = vsyncpa [#allocation18 + $0x1], 0  ;;  %s3004_s18 = smov 0   ;;  %s3006_s19 = smov 0  }
  0x19   :  { %s3008_s20 = smov 0   ;;  %s3010_s21 = smov 0  }
  0x1a LB: > { %s2905_s22 = smov [#allocation7]   ;;  %s3025_s24 = sadd.s32 4294967295, %s2903_s21   ;;  %s2903_s21 = sphi %s3010_s21, %s3559_s21   ;;  %s2899_s20 = sphi %s3008_s20, %s3558_s20   ;;  %s2895_s19 = sphi %s3006_s19, %s3557_s19   ;;  %s2891_s18 = sphi %s3004_s18, %s3556_s18  }
  0x1b   : > { %s414_s23 = sshll.u32 %s2905_s22, 4  ;;  %p1724_p0 = scmp.ge.s32.totalorder %s2903_s21, 1  ;;  %s3030_s23 = int_to_ptr.vmem [resolvable:$true] %s414_s23 }
  0x1c   : > { %p3500_p1 = scmp.eq.s32.totalorder %s3025_s24, 0  ;;  %p402_p2 = scmp.lt.s32.totalorder %s2903_s21, 3 }
  0x1d   : > { %s2906_s26 = smov [#allocation8]   ;;  %s2907_s29 = smov [#allocation11]  }
  0x1e   : > { %p3032_p3 = pnand %p1724_p0, %p402_p2  ;;  %s430_s27 = sshll.u32 %s2906_s26, 4  ;;  %s3045_s27 = int_to_ptr.vmem [resolvable:$true] %s430_s27 }
  0x1f   : > { %s462_s30 = sshll.u32 %s2907_s29, 4  ;;  %s3522_s2 = sld [smem:[#allocation27_spill]]  ;;  %s3047_s30 = int_to_ptr.vmem [resolvable:$true] %s462_s30 }
  0x20   : > { %s3520_s25 = scalar_select %p3032_p3, 1, 0 }
  0x21   : > { %p2431_p5 = pneg %p3032_p3 }
  0x23   : > { %p3041_p6 = pnand %p2431_p5, %p3500_p1 }
  0x25   : > { %s2557_s22 = scalar_lea.hbm %s3522_s2, 2048  ;;  %p3057_p8 = pneg %p3041_p6 }
  0x26   : > { %p2558_p7 = scmp.ne.s32.totalorder %s3522_s2, %s2557_s22  ;;  %p2564_p11 = scmp.lt.u32.totalorder %s2557_s22, %s3522_s2 }
  0x28   : > { %p2560_p9 = pnand %p3057_p8, %p2558_p7 }
  0x2a   : > { %p2561_p10 = pneg %p2560_p9 }
  0x2c   : > { %p2566_p12 = pnand %p2564_p11, %p2561_p10 }
  0x2e   : > { %2569 = shalt.err (!%p2566_p12)
}
  0x2f   : > { %s2570_s13 = scalar_lea.vmem %s3030_s23, 2048  ;;  %p2578_p5 = scmp.lt.s32.totalorder %s3030_s23, %s3030_s23 }
  0x30   : > { %p2571_p13 = scmp.ne.s32.totalorder %s3030_s23, %s2570_s13  ;;  %p2579_p4 = scmp.lt.s32.totalorder %s2570_s13, %s2570_s13 }
  0x32   : > { %p2573_p0 = pnand %p2571_p13, %p3057_p8  ;;  %p2580_p7 = por %p2579_p4, %p2578_p5 }
  0x34   : > { %p2574_p2 = pneg %p2573_p0 }
  0x36   : > { %p2581_p9 = pnand %p2580_p7, %p2574_p2 }
  0x38   : > { %2584 = shalt.err (!%p2581_p9)
}
  0x39   : > { %s3502_s14 = smov 128   ;;  %s3504_s15 = smov 8  }
  0x3a   : > { %2434 = dma.hbm_to_vmem [thread:$0]  (!%p3041_p6), %s3522_s2, 2048, %s3030_s23, [#allocation6], %s3502_s14, %s3502_s14, %s3504_s15  }
  0x3b   : > { %s3524_s4 = sld [smem:[#allocation28_spill]] }
  0x41   : > { %s2585_s13 = scalar_lea.hbm %s3524_s4, 4096 }
  0x42   : > { %p2586_p4 = scmp.ne.s32.totalorder %s3524_s4, %s2585_s13  ;;  %p2592_p12 = scmp.lt.u32.totalorder %s2585_s13, %s3524_s4 }
  0x44   : > { %p2588_p10 = pnand %p2586_p4, %p3057_p8 }
  0x46   : > { %p2589_p11 = pneg %p2588_p10 }
  0x48   : > { %p2594_p13 = pnand %p2592_p12, %p2589_p11 }
  0x4a   : > { %2597 = shalt.err (!%p2594_p13)
}
  0x4b   : > { %s2598_s23 = scalar_lea.vmem %s3045_s27, 4096  ;;  %p2606_p7 = scmp.lt.s32.totalorder %s3045_s27, %s3045_s27 }
  0x4c   : > { %p2599_p0 = scmp.ne.s32.totalorder %s3045_s27, %s2598_s23  ;;  %p2607_p9 = scmp.lt.s32.totalorder %s2598_s23, %s2598_s23 }
  0x4e   : > { %p2601_p2 = pnand %p2599_p0, %p3057_p8  ;;  %p2608_p4 = por %p2607_p9, %p2606_p7 }
  0x50   : > { %p2602_p5 = pneg %p2601_p2 }
  0x52   : > { %p2609_p10 = pnand %p2608_p4, %p2602_p5 }
  0x54   : > { %2612 = shalt.err (!%p2609_p10)
}
  0x55   : > { %2437 = dma.hbm_to_vmem [thread:$0]  (!%p3041_p6), %s3524_s4, 4096, %s3045_s27, [#allocation9], %s3502_s14, %s3502_s14, %s3504_s15  }
  0x56   : > { %s3525_s8 = sld [smem:[#allocation32_spill]] }
  0x5c   : > { %s2613_s16 = scalar_lea.hbm %s3525_s8, 2048 }
  0x5d   : > { %p2614_p11 = scmp.ne.s32.totalorder %s3525_s8, %s2613_s16  ;;  %p2620_p0 = scmp.lt.u32.totalorder %s2613_s16, %s3525_s8 }
  0x5f   : > { %p2616_p12 = pnand %p2614_p11, %p3057_p8 }
  0x61   : > { %p2617_p13 = pneg %p2616_p12 }
  0x63   : > { %p2622_p2 = pnand %p2620_p0, %p2617_p13 }
  0x65   : > { %2625 = shalt.err (!%p2622_p2)
}
  0x66   : > { %s2626_s27 = scalar_lea.vmem %s3047_s30, 2048  ;;  %p2634_p4 = scmp.lt.s32.totalorder %s3047_s30, %s3047_s30 }
  0x67   : > { %p2627_p5 = scmp.ne.s32.totalorder %s3047_s30, %s2626_s27  ;;  %p2635_p10 = scmp.lt.s32.totalorder %s2626_s27, %s2626_s27 }
  0x69   : > { %p2629_p7 = pnand %p2627_p5, %p3057_p8  ;;  %p2636_p11 = por %p2635_p10, %p2634_p4 }
  0x6b   : > { %p2630_p9 = pneg %p2629_p7 }
  0x6d   : > { %p2637_p12 = pnand %p2636_p11, %p2630_p9 }
  0x6f   : > { %2640 = shalt.err (!%p2637_p12)
}
  0x70   : > { %2443 = dma.hbm_to_vmem [thread:$0]  (!%p3041_p6), %s3525_s8, 2048, %s3047_s30, [#allocation12], %s3502_s14, %s3502_s14, %s3504_s15  }
  0x71   : > { %s2910_s7 = smov [#allocation10]   ;;  %s3526_s6 = sld [smem:[#allocation30_spill]] }
  0x72   : > { %s446_s9 = sshll.u32 %s2910_s7, 4  ;;  %s447_s9 = int_to_ptr.vmem [resolvable:$true] %s446_s9 }
  0x77   : > { %s2641_s17 = scalar_lea.hbm %s3526_s6, 4096 }
  0x78   : > { %p2642_p13 = scmp.ne.s32.totalorder %s3526_s6, %s2641_s17  ;;  %p2648_p5 = scmp.lt.u32.totalorder %s2641_s17, %s3526_s6 }
  0x7a   : > { %p2644_p0 = pnand %p2642_p13, %p3057_p8 }
  0x7c   : > { %p2645_p2 = pneg %p2644_p0 }
  0x7e   : > { %p2650_p7 = pnand %p2648_p5, %p2645_p2 }
  0x80   : > { %2653 = shalt.err (!%p2650_p7)
}
  0x81   : > { %s2654_s30 = scalar_lea.vmem %s447_s9, 4096  ;;  %p2662_p11 = scmp.lt.s32.totalorder %s447_s9, %s447_s9 }
  0x82   : > { %p2655_p9 = scmp.ne.s32.totalorder %s447_s9, %s2654_s30  ;;  %p2663_p12 = scmp.lt.s32.totalorder %s2654_s30, %s2654_s30 }
  0x84   : > { %p2657_p4 = pnand %p2655_p9, %p3057_p8  ;;  %p2664_p1 = por %p2663_p12, %p2662_p11 }
  0x86   : > { %p2658_p10 = pneg %p2657_p4 }
  0x88   : > { %p2665_p3 = pnand %p2664_p1, %p2658_p10 }
  0x8a   : > { %2668 = shalt.err (!%p2665_p3)
}
  0x8b   : > { %s2911_s23 = smov 256   ;;  %s2912_s5 = smov 16  }
  0x8c   : > { %2440 = dma.hbm_to_vmem [thread:$0]  (!%p3041_p6), %s3526_s6, 4096, %s447_s9, [#allocation9], %s2911_s23, %s2911_s23, %s2912_s5  }
  0x8d   : > { %s2913_s16 = smov [#allocation13]   ;;  %s2914_s22 = smov [#allocation14]  }
  0x8e   : > { %s478_s17 = sshll.u32 %s2913_s16, 4  ;;  %s494_s29 = sshll.u32 %s2914_s22, 4  ;;  %s479_s17 = int_to_ptr.vmem [resolvable:$true] %s478_s17  ;;  %s3151_s29 = int_to_ptr.vmem [resolvable:$true] %s494_s29 }
  0x8f   : > { %s3527_s10 = sld [smem:[#allocation34_spill]] }
  0x95   : > { %s2669_s30 = scalar_lea.hbm %s3527_s10, 4096 }
  0x96   : > { %p2670_p1 = scmp.ne.s32.totalorder %s3527_s10, %s2669_s30  ;;  %p2676_p0 = scmp.lt.u32.totalorder %s2669_s30, %s3527_s10 }
  0x98   : > { %p2672_p3 = pnand %p2670_p1, %p3057_p8 }
  0x9a   : > { %p2673_p13 = pneg %p2672_p3 }
  0x9c   : > { %p2678_p2 = pnand %p2676_p0, %p2673_p13 }
  0x9e   : > { %2681 = shalt.err (!%p2678_p2)
}
  0x9f   : > { %s2682_s23 = scalar_lea.vmem %s479_s17, 4096  ;;  %p2690_p4 = scmp.lt.s32.totalorder %s479_s17, %s479_s17 }
  0xa0   : > { %p2683_p5 = scmp.ne.s32.totalorder %s479_s17, %s2682_s23  ;;  %p2691_p10 = scmp.lt.s32.totalorder %s2682_s23, %s2682_s23 }
  0xa2   : > { %p2685_p7 = pnand %p2683_p5, %p3057_p8  ;;  %p2692_p11 = por %p2691_p10, %p2690_p4 }
  0xa4   : > { %p2686_p9 = pneg %p2685_p7 }
  0xa6   : > { %p2693_p12 = pnand %p2692_p11, %p2686_p9 }
  0xa8   : > { %2696 = shalt.err (!%p2693_p12)
}
  0xa9   : > { %s3528_s14 = smov 8   ;;  %s3529_s15 = smov 128  }
  0xaa   : > { %2446 = dma.hbm_to_vmem [thread:$0]  (!%p3041_p6), %s3527_s10, 4096, %s479_s17, [#allocation12], %s3529_s15, %s3529_s15, %s3528_s14  }
  0xab   : > { %s3530_s12 = sld [smem:[#allocation36_spill]] }
  0xb1   : > { %s2697_s13 = scalar_lea.hbm %s3530_s12, 2048 }
  0xb2   : > { %p2698_p1 = scmp.ne.s32.totalorder %s3530_s12, %s2697_s13  ;;  %p2704_p0 = scmp.lt.u32.totalorder %s2697_s13, %s3530_s12 }
  0xb4   : > { %p2700_p3 = pnand %p2698_p1, %p3057_p8 }
  0xb6   : > { %p2701_p13 = pneg %p2700_p3 }
  0xb8   : > { %p2706_p2 = pnand %p2704_p0, %p2701_p13 }
  0xba   : > { %2709 = shalt.err (!%p2706_p2)
}
  0xbb   : > { %s2710_s17 = scalar_lea.vmem %s3151_s29, 2048  ;;  %p2718_p4 = scmp.lt.s32.totalorder %s3151_s29, %s3151_s29 }
  0xbc   : > { %p2711_p5 = scmp.ne.s32.totalorder %s3151_s29, %s2710_s17  ;;  %p2719_p10 = scmp.lt.s32.totalorder %s2710_s17, %s2710_s17 }
  0xbe   : > { %p2713_p7 = pnand %p2711_p5, %p3057_p8  ;;  %p2720_p11 = por %p2719_p10, %p2718_p4 }
  0xc0   : > { %p2714_p9 = pneg %p2713_p7 }
  0xc2   : > { %p2721_p12 = pnand %p2720_p11, %p2714_p9 }
  0xc4   : > { %2724 = shalt.err (!%p2721_p12)
}
  0xc5   : > { %2449 = dma.hbm_to_vmem [thread:$0]  (!%p3041_p6), %s3530_s12, 2048, %s3151_s29, [#allocation15], %s3529_s15, %s3529_s15, %s3528_s14  }
  0xc6   : > { %s1723_s28 = sadd.s32 4294967294, %s2903_s21   ;;  %s3202_s26 = sadd.s32 1, %s2903_s21  }
  0xc7   : > { %s45_s11 = ssub.s32 %s2903_s21, %s3202_s26  ;;  %s48_s16 = sadd.s32 1, %s2899_s20 }
  0xc8   : > { %p46_p8 = scmp.eq.s32.totalorder %s45_s11, 0  ;;  %p55_p1 = scmp.ne.s32.totalorder %s2899_s20, %s2895_s19 }
  0xc9   : > { %p56_p3 = scmp.eq.s32.totalorder %s2903_s21, 0  ;;  %p61_p13 = scmp.ne.s32.totalorder %s2895_s19, %s2891_s18 }
  0xca   : > { %s3213_s22 = scalar_select %p46_p8, %s2899_s20, %s48_s16  }
  0xcb   : > { %p3215_p0 = por %p56_p3, %p55_p1  ;;  %p3532_p2 = scmp.eq.s32.totalorder %s3025_s24, 0 }
  0xcc   : > { %p363_p5 = scmp.eq.s32.totalorder %s3025_s24, 1  ;;  %p369_p7 = scmp.eq.s32.totalorder %s1723_s28, 1 }
  0xcd   : > { %p3221_p6 = por %p3532_p2, %p61_p13  ;;  %p2470_p9 = scmp.lt.s32.totalorder %s2903_s21, 2 }
  0xce   : > { %s511_s27 = sand.u32 1, %s2899_s20   ;;  %p3228_p4 = por %p363_p5, %p55_p1 }
  0xcf   : > { %p3232_p10 = por %p369_p7, %p61_p13  ;;  %s1732_s9 = sshll.u32 %s511_s27, 4 }
  0xd0   : > { %s3534_s30 = scalar_select %p3228_p4, 1, 0 }
  0xd1   : > { %s3535_s7 = scalar_select %p3232_p10, 1, 0 }
  0xd2   : > { %s1767_s17 = sshll.u32 %s2903_s21, 8  ;;  %s515_s28 = scalar_lea.vmem [#allocation2], %s1732_s9 }
  0xd3   : > { %s3240_s11 = scalar_lea.hbm %s3480_s0, %s1767_s17  ;;  %s522_s16 = sshll.u32 %s515_s28, 4  ;;  %s3242_s16 = int_to_ptr.vmem [resolvable:$true] %s522_s16 }
  0xd4   : > { %p3246_p11 = pnand %p2470_p9, %p3215_p0  ;;  %s3253_s23 = scalar_lea.hbm %s3481_s1, %s1767_s17 }
  0xd5   : > { %s536_s5 = scalar_lea.vmem [#allocation5], %s1732_s9  ;;  %s3257_s10 = scalar_lea.sflag [#allocation3], %s511_s27 }
  0xd6   : > { %s3255_s8 = sshll.u32 %s536_s5, 4  ;;  %s2725_s28 = scalar_lea.hbm %s3240_s11, 256  ;;  %s3289_s8 = int_to_ptr.vmem [resolvable:$true] %s3255_s8 }
  0xd7   : > { %p2726_p12 = scmp.ne.s32.totalorder %s3240_s11, %s2725_s28  ;;  %p2727_p8 = pneg %p3246_p11 }
  0xd8   : > { %s2730_s4 = scalar_lea.hbm %s3480_s0, 512  ;;  %p2731_p13 = scmp.lt.u32.totalorder %s3240_s11, %s3480_s0 }
  0xd9   : > { %p2728_p1 = pnand %p2727_p8, %p2726_p12  ;;  %p2732_p0 = scmp.lt.u32.totalorder %s2730_s4, %s2725_s28 }
  0xda   : > { %p2734_p5 = scmp.lt.u32.totalorder %s2725_s28, %s3240_s11 }
  0xdb   : > { %p2729_p3 = pneg %p2728_p1  ;;  %p2733_p2 = por %p2732_p0, %p2731_p13 }
  0xdd   : > { %p2735_p7 = por %p2734_p5, %p2733_p2 }
  0xdf   : > { %p2736_p9 = pnand %p2735_p7, %p2729_p3 }
  0xe1   : > { %2739 = shalt.err (!%p2736_p9)
}
  0xe2   : > { %s2740_s27 = scalar_lea.vmem %s3242_s16, 256  ;;  %s2915_s12 = smov [#allocation2]  }
  0xe3   : > { %p2741_p12 = scmp.ne.s32.totalorder %s3242_s16, %s2740_s27  ;;  %s2745_s9 = sshll.u32 %s2915_s12, 4  ;;  %s2746_s9 = int_to_ptr.vmem [resolvable:$false] %s2745_s9 }
  0xe4   : > { %s2747_s5 = scalar_lea.vmem %s2746_s9, 512  ;;  %p2748_p4 = scmp.lt.s32.totalorder %s3242_s16, %s2746_s9 }
  0xe5   : > { %p2743_p1 = pnand %p2741_p12, %p2727_p8  ;;  %p2749_p13 = scmp.lt.s32.totalorder %s2747_s5, %s2740_s27 }
  0xe7   : > { %p2744_p10 = pneg %p2743_p1  ;;  %p2750_p0 = por %p2749_p13, %p2748_p4 }
  0xe9   : > { %p2751_p2 = pnand %p2750_p0, %p2744_p10 }
  0xeb   : > { %2754 = shalt.err (!%p2751_p2)
}
  0xec   : > { %2453 = dma.hbm_to_vmem [thread:$0]  (!%p3246_p11), %s3240_s11, 256, %s3242_s16, %s3257_s10, %s3529_s15, %s3529_s15, %s3528_s14  }
  0xed   : > { %s532_s28 = sand.u32 1, %s2903_s21   ;;  %s2755_s4 = scalar_lea.hbm %s3253_s23, 256 }
  0xee   : > { %s3292_s13 = scalar_lea.sflag [#allocation6], %s532_s28  ;;  %p2756_p4 = scmp.ne.s32.totalorder %s3253_s23, %s2755_s4 }
  0xef   : > { %s2760_s27 = scalar_lea.hbm %s3481_s1, 512  ;;  %p2761_p5 = scmp.lt.u32.totalorder %s3253_s23, %s3481_s1 }
  0xf0   : > { %p2758_p10 = pnand %p2756_p4, %p2727_p8  ;;  %p2762_p7 = scmp.lt.u32.totalorder %s2760_s27, %s2755_s4 }
  0xf1   : > { %p2764_p12 = scmp.lt.u32.totalorder %s2755_s4, %s3253_s23 }
  0xf2   : > { %p2759_p3 = pneg %p2758_p10  ;;  %p2763_p9 = por %p2762_p7, %p2761_p5 }
  0xf4   : > { %p2765_p1 = por %p2764_p12, %p2763_p9 }
  0xf6   : > { %p2766_p13 = pnand %p2765_p1, %p2759_p3 }
  0xf8   : > { %2769 = shalt.err (!%p2766_p13)
}
  0xf9   : > { %s2770_s10 = scalar_lea.vmem %s3289_s8, 256  ;;  %s2916_s11 = smov [#allocation5]  }
  0xfa   : > { %p2771_p0 = scmp.ne.s32.totalorder %s3289_s8, %s2770_s10  ;;  %s2775_s16 = sshll.u32 %s2916_s11, 4  ;;  %s2776_s16 = int_to_ptr.vmem [resolvable:$false] %s2775_s16 }
  0xfb   : > { %s2777_s5 = scalar_lea.vmem %s2776_s16, 512  ;;  %p2778_p10 = scmp.lt.s32.totalorder %s3289_s8, %s2776_s16 }
  0xfc   : > { %p2773_p2 = pnand %p2771_p0, %p2727_p8  ;;  %p2779_p5 = scmp.lt.s32.totalorder %s2777_s5, %s2770_s10 }
  0xfe   : > { %p2774_p4 = pneg %p2773_p2  ;;  %p2780_p7 = por %p2779_p5, %p2778_p10 }
 0x100   : > { %p2781_p9 = pnand %p2780_p7, %p2774_p4 }
 0x102   : > { %2784 = shalt.err (!%p2781_p9)
}
 0x103   : > { %2456 = dma.hbm_to_vmem [thread:$0]  (!%p3246_p11), %s3253_s23, 256, %s3289_s8, %s3292_s13, %s3529_s15, %s3529_s15, %s3528_s14  }
 0x104   : > { %p3537_p8 = scmp.ne.s32.totalorder %s3520_s25, 0 }
 0x105   : > { %s3324_s28 = sand.u32 (!%p3537_p8), 1, %s2895_s19  }
 0x106   : > { %555 = sbr.rel (%p3537_p8) target bundleno = 2163 (0x873), region = 76  ;;  %s3327_s4 = sshll.u32 (!%p3537_p8), %s3324_s28, 4 }
 0x107   : > { %s558_s2 = scalar_lea.sflag (!%p3537_p8), [#allocation3], %s3324_s28  ;;  %s561_s6 = scalar_lea.vmem (!%p3537_p8), [#allocation2], %s3327_s4 }
 0x10d   : > { %2858 = dma.done.wait (%p3221_p6), %s558_s2, 256  }
 0x10e   : > { %2860 = vsyncadd (%p3221_p6), %s558_s2, 4294967040  ;;  %s566_s8 = sand.u32 1, %s3025_s24   ;;  %s570_s14 = scalar_lea.vmem [#allocation5], %s3327_s4 }
 0x10f   : > { %s567_s25 = scalar_lea.sflag [#allocation6], %s566_s8 }
 0x110   : > { %2862 = dma.done.wait (%p3221_p6), %s567_s25, 256  }
 0x111   : > { %2864 = vsyncadd (%p3221_p6), %s567_s25, 4294967040  ;;  %p3538_p11 = scmp.eq.s32.totalorder %s3025_s24, 0 }
 0x113   : > { %2866 = dma.done.wait (%p3538_p11), [#allocation6], 2048   ;;  %p3539_p3 = pmov %p3538_p11 }
 0x115   : > { %2868 = vsyncadd (%p3539_p3), [#allocation6], 4294965248  ;;  %p3540_p12 = pmov %p3539_p3 }
 0x116   : > { %p3541_p1 = pmov %p3539_p3 }
 0x117   : > { %2870 = dma.done.wait (%p3540_p12), [#allocation9], 8192  }
 0x118   : > { %2872 = vsyncadd (%p3541_p1), [#allocation9], 4294959104  ;;  %p3542_p13 = pmov %p3541_p1 }
 0x119   : > { %p3543_p0 = pmov %p3541_p1 }
 0x11a   : > { %2874 = dma.done.wait (%p3542_p13), [#allocation12], 6144  }
 0x11b   : > { %2876 = vsyncadd (%p3543_p0), [#allocation12], 4294961152  ;;  %p3544_p6 = pmov %p3543_p0 }
 0x11c   : > { %p3545_p2 = pmov %p3543_p0 }
 0x11d   : > { %2878 = dma.done.wait (%p3544_p6), [#allocation15], 2048  }
 0x11e   : > { %2880 = vsyncadd (%p3545_p2), [#allocation15], 4294965248  ;;  %v657_v0 = vld [vmem:[#allocation7] sm:$0xff]  ;;  %v658_v1 = vld [vmem:[#allocation7 + $0x8] sm:$0xff]  ;;  %s3546_s17 = sld [smem:[#allocation29_spill]]  ;;  %s3547_s11 = sld [smem:[#allocation31_spill]] }
 0x11f   : > { %v659_v2 = vld [vmem:[#allocation7 + $0x10] sm:$0xff]  ;;  %v2143_v3 = vpack.c.bf16 %v658_v1, %v657_v0  ;;  %v660_v4 = vld [vmem:[#allocation7 + $0x18] sm:$0xff]  ;;  %v661_v6 = vld [vmem:[#allocation7 + $0x20] sm:$0xff]  ;;  %s1748_s16 = sshll.u32 %s3324_s28, 5  ;;  %s3548_s8 = sld [smem:[#allocation33_spill]] }
 0x120   : > { %v2147_v5 = vpack.c.bf16 %v660_v4, %v659_v2  ;;  %v662_v7 = vld [vmem:[#allocation7 + $0x28] sm:$0xff]  ;;  %v663_v9 = vld [vmem:[#allocation7 + $0x30] sm:$0xff]  ;;  %v664_v10 = vld [vmem:[#allocation7 + $0x38] sm:$0xff]  ;;  %s3374_s5 = scalar_lea.vmem [#allocation17], %s1748_s16  ;;  %s3549_s15 = sld [smem:[#allocation35_spill]] }
 0x121   : > { %2144 = vmatprep.subr.bf16.mxu0 %v2143_v3  ;;  %v2151_v8 = vpack.c.bf16 %v662_v7, %v661_v6  ;;  %v655_v11 = vld [vmem:[%s561_s6] sm:$0xff]  ;;  %v758_v13 = vld [vmem:[#allocation8 + $0x8] sm:$0xff]  ;;  %v760_v16 = vld [vmem:[#allocation8 + $0x18] sm:$0xff]  ;;  %v2155_v20 = vpack.c.bf16 %v664_v10, %v663_v9  ;;  %s1538_s13 = sshll.u32 %s3374_s5, 4  ;;  %s1771_s27 = sshll.u32 %s3025_s24, 9  ;;  %s3394_s13 = int_to_ptr.vmem [resolvable:$true] %s1538_s13 }
 0x122   : > { %2146 = vmatpush3.bf16.msra.mxu0 %v2143_v3  ;;  %1930 = vmatprep.mubr.f32.mxu0 %v655_v11  ;;  %v757_v12 = vld [vmem:[#allocation8] sm:$0xff]  ;;  %v759_v14 = vld [vmem:[#allocation8 + $0x10] sm:$0xff]  ;;  %v762_v19 = vld [vmem:[#allocation8 + $0x28] sm:$0xff]  ;;  %s3550_s10 = sld [smem:[#allocation39_spill]]  ;;  %s1508_s16 = scalar_lea.sflag [#allocation18], %s3324_s28 }
 0x123   : > { %2148 = vmatprep.subr.bf16.mxu0 %v2147_v5  ;;  %v2175_v15 = vpack.c.bf16 %v758_v13, %v757_v12  ;;  %v2179_v17 = vpack.c.bf16 %v760_v16, %v759_v14  ;;  %v761_v18 = vld [vmem:[#allocation8 + $0x20] sm:$0xff]  ;;  %v666_v22 = vld [vmem:[#allocation7 + $0x48] sm:$0xff]  ;;  %v763_v24 = vld [vmem:[#allocation8 + $0x30] sm:$0xff]  ;;  %s2785_s2 = scalar_lea.vmem %s3394_s13, 512  ;;  %p3551_p10 = scmp.ne.s32.totalorder %s3534_s30, 0 }
 0x124   : > { %v665_v21 = vld [vmem:[#allocation7 + $0x40] sm:$0xff]  ;;  %v2183_v23 = vpack.c.bf16 %v762_v19, %v761_v18  ;;  %v764_v25 = vld [vmem:[#allocation8 + $0x38] sm:$0xff]  ;;  %v667_v27 = vld [vmem:[#allocation7 + $0x50] sm:$0xff]  ;;  %p2786_p4 = scmp.ne.s32.totalorder %s3394_s13, %s2785_s2 }
 0x125   : > { %2176 = vmatprep.subr.bf16.mxu1 %v2175_v15  ;;  %v2159_v26 = vpack.c.bf16 %v666_v22, %v665_v21  ;;  %v668_v28 = vld [vmem:[#allocation7 + $0x58] sm:$0xff]  ;;  %v2187_v29 = vpack.c.bf16 %v764_v25, %v763_v24  ;;  %v669_v31 = vld [vmem:[#allocation7 + $0x60] sm:$0xff]  ;;  %v670_v32 = vld [vmem:[#allocation7 + $0x68] sm:$0xff] }
 0x126   : > { %2150 = vmatpush3.bf16.msra.mxu0 %v2147_v5  ;;  %2178 = vmatpush3.bf16.msra.mxu1 %v2175_v15  ;;  %v2163_v30 = vpack.c.bf16 %v668_v28, %v667_v27  ;;  %v2167_v33 = vpack.c.bf16 %v670_v32, %v669_v31  ;;  %v671_v34 = vld [vmem:[#allocation7 + $0x70] sm:$0xff]  ;;  %v672_v35 = vld [vmem:[#allocation7 + $0x78] sm:$0xff]  ;;  %v765_v38 = vld [vmem:[#allocation8 + $0x40] sm:$0xff]  ;;  %p2787_p5 = pnand %p2786_p4, %p3551_p10 }
 0x127   : > { %2152 = vmatprep.subr.bf16.mxu0 %v2151_v8  ;;  %2180 = vmatprep.subr.bf16.mxu1 %v2179_v17  ;;  %v2171_v36 = vpack.c.bf16 %v672_v35, %v671_v34  ;;  %v656_v37 = vld [vmem:[%s561_s6 + $0x8] sm:$0xff]  ;;  %v767_v41 = vld [vmem:[#allocation8 + $0x50] sm:$0xff]  ;;  %v769_v44 = vld [vmem:[#allocation8 + $0x60] sm:$0xff]  ;;  %s2918_s6 = smov [#allocation17]  }
 0x128   : > { %v766_v39 = vld [vmem:[#allocation8 + $0x48] sm:$0xff]  ;;  %v768_v42 = vld [vmem:[#allocation8 + $0x58] sm:$0xff]  ;;  %v771_v46 = vld [vmem:[#allocation8 + $0x70] sm:$0xff]  ;;  %p2788_p7 = pneg %p2787_p5 }
 0x129   : > { %v2191_v40 = vpack.c.bf16 %v766_v39, %v765_v38  ;;  %v2195_v43 = vpack.c.bf16 %v768_v42, %v767_v41  ;;  %v770_v45 = vld [vmem:[#allocation8 + $0x68] sm:$0xff]  ;;  %v772_v48 = vld [vmem:[#allocation8 + $0x78] sm:$0xff]  ;;  %v858_v50 = vld [vmem:[#allocation8 + $0x80] sm:$0xff] }
 0x12a   : > { %2154 = vmatpush3.bf16.msra.mxu0 %v2151_v8  ;;  %2182 = vmatpush3.bf16.msra.mxu1 %v2179_v17  ;;  %v2199_v47 = vpack.c.bf16 %v770_v45, %v769_v44  ;;  %v2203_v49 = vpack.c.bf16 %v772_v48, %v771_v46  ;;  %v859_v51 = vld [vmem:[#allocation8 + $0x88] sm:$0xff]  ;;  %v860_v52 = vld [vmem:[#allocation8 + $0x90] sm:$0xff]  ;;  %v861_v54 = vld [vmem:[#allocation8 + $0x98] sm:$0xff] }
 0x12b   : > { %2156 = vmatprep.subr.bf16.mxu0 %v2155_v20  ;;  %2184 = vmatprep.subr.bf16.mxu1 %v2183_v23  ;;  %v2207_v53 = vpack.c.bf16 %v859_v51, %v858_v50  ;;  %v2211_v55 = vpack.c.bf16 %v861_v54, %v860_v52  ;;  %v862_v56 = vld [vmem:[#allocation8 + $0xa0] sm:$0xff]  ;;  %v863_v57 = vld [vmem:[#allocation8 + $0xa8] sm:$0xff]  ;;  %v864_v59 = vld [vmem:[#allocation8 + $0xb0] sm:$0xff] }
 0x12c   : > { %v2215_v58 = vpack.c.bf16 %v863_v57, %v862_v56  ;;  %v865_v60 = vld [vmem:[#allocation8 + $0xb8] sm:$0xff]  ;;  %v1749_v62 = vld [vmem:[%s3483_s3] ss:$0 sm:$0xff]  ;;  %v867_v6 = vld [vmem:[#allocation8 + $0xc8] sm:$0xff] }
 0x12d   : > { %v2219_v61 = vpack.c.bf16 %v865_v60, %v864_v59  ;;  %v866_v5 = vld [vmem:[#allocation8 + $0xc0] sm:$0xff]  ;;  %v868_v8 = vld [vmem:[#allocation8 + $0xd0] sm:$0xff]  ;;  %v869_v9 = vld [vmem:[#allocation8 + $0xd8] sm:$0xff] }
 0x12e   : > { %2158 = vmatpush3.bf16.msra.mxu0 %v2155_v20  ;;  %2186 = vmatpush3.bf16.msra.mxu1 %v2183_v23  ;;  %v2223_v7 = vpack.c.bf16 %v867_v6, %v866_v5  ;;  %v2227_v10 = vpack.c.bf16 %v869_v9, %v868_v8  ;;  %v870_v11 = vld [vmem:[#allocation8 + $0xe0] sm:$0xff]  ;;  %v871_v12 = vld [vmem:[#allocation8 + $0xe8] sm:$0xff]  ;;  %v872_v13 = vld [vmem:[#allocation8 + $0xf0] sm:$0xff] }
 0x12f   : > { %2160 = vmatprep.subr.bf16.mxu0 %v2159_v26  ;;  %2188 = vmatprep.subr.bf16.mxu1 %v2187_v29  ;;  %v2231_v14 = vpack.c.bf16 %v871_v12, %v870_v11  ;;  %v873_v15 = vld [vmem:[#allocation8 + $0xf8] sm:$0xff]  ;;  %v960_v17 = vld [vmem:[#allocation10 + $0x8] sm:$0xff]  ;;  %v959_v19 = vld [vmem:[#allocation10] sm:$0xff] }
 0x130   : > { %v2235_v16 = vpack.c.bf16 %v873_v15, %v872_v13  ;;  %v962_v18 = vld [vmem:[#allocation10 + $0x18] sm:$0xff]  ;;  %v961_v21 = vld [vmem:[#allocation10 + $0x10] sm:$0xff]  ;;  %v964_v22 = vld [vmem:[#allocation10 + $0x28] sm:$0xff] }
 0x131   : > { %v2239_v20 = vpack.c.bf16 %v962_v18, %v960_v17  ;;  %v966_v23 = vld [vmem:[#allocation10 + $0x38] sm:$0xff]  ;;  %v2241_v24 = vpack.c.bf16 %v961_v21, %v959_v19  ;;  %v965_v27 = vld [vmem:[#allocation10 + $0x30] sm:$0xff]  ;;  %v968_v28 = vld [vmem:[#allocation10 + $0x48] sm:$0xff] }
 0x132   : > { %2162 = vmatpush3.bf16.msra.mxu0 %v2159_v26  ;;  %2190 = vmatpush3.bf16.msra.mxu1 %v2187_v29  ;;  %v2243_v25 = vpack.c.bf16 %v966_v23, %v964_v22  ;;  %v963_v26 = vld [vmem:[#allocation10 + $0x20] sm:$0xff]  ;;  %v970_v29 = vld [vmem:[#allocation10 + $0x58] sm:$0xff]  ;;  %v972_v34 = vld [vmem:[#allocation10 + $0x68] sm:$0xff] }
 0x133   : > { %2164 = vmatprep.subr.bf16.mxu0 %v2163_v30  ;;  %2192 = vmatprep.subr.bf16.mxu1 %v2191_v40  ;;  %v2247_v31 = vpack.c.bf16 %v970_v29, %v968_v28  ;;  %v967_v32 = vld [vmem:[#allocation10 + $0x40] sm:$0xff]  ;;  %v974_v35 = vld [vmem:[#allocation10 + $0x78] sm:$0xff]  ;;  %v973_v39 = vld [vmem:[#allocation10 + $0x70] sm:$0xff] }
 0x134   : > { %v971_v38 = vld [vmem:[#allocation10 + $0x60] sm:$0xff]  ;;  %v978_v41 = vld [vmem:[#allocation10 + $0x98] sm:$0xff]  ;;  %v977_v52 = vld [vmem:[#allocation10 + $0x90] sm:$0xff] }
 0x135   : > { %v2253_v42 = vpack.c.bf16 %v973_v39, %v971_v38  ;;  %v1750_v44 = vld [vmem:[%s3546_s17] ss:$0 sm:$0xff]  ;;  %v980_v54 = vld [vmem:[#allocation10 + $0xa8] sm:$0xff]  ;;  %v1094_v11 = vld [vmem:[#allocation11 + $0x10] sm:$0xff] }
 0x136   : > { %2166 = vmatpush3.bf16.msra.mxu0 %v2163_v30  ;;  %2194 = vmatpush3.bf16.msra.mxu1 %v2191_v40  ;;  %v2245_v30 = vpack.c.bf16 %v965_v27, %v963_v26  ;;  %v976_v40 = vld [vmem:[#allocation10 + $0x88] sm:$0xff]  ;;  %v975_v51 = vld [vmem:[#allocation10 + $0x80] sm:$0xff]  ;;  %v1095_v13 = vld [vmem:[#allocation11 + $0x18] sm:$0xff] }
 0x137   : > { %2168 = vmatprep.subr.bf16.mxu0 %v2167_v33  ;;  %2196 = vmatprep.subr.bf16.mxu1 %v2195_v43  ;;  %v979_v57 = vld [vmem:[#allocation10 + $0xa0] sm:$0xff]  ;;  %v984_v60 = vld [vmem:[#allocation10 + $0xc8] sm:$0xff]  ;;  %v1099_v26 = vld [vmem:[#allocation11 + $0x38] sm:$0xff] }
 0x138   : > { %v987_v6 = vld [vmem:[#allocation10 + $0xe0] sm:$0xff]  ;;  %v1097_v23 = vld [vmem:[#allocation11 + $0x28] sm:$0xff]  ;;  %v1107_v38 = vld [vmem:[#allocation11 + $0x78] sm:$0xff] }
 0x139   : > { %v1092_v9 = vld [vmem:[#allocation11] sm:$0xff]  ;;  %v1101_v29 = vld [vmem:[#allocation11 + $0x48] sm:$0xff] }
 0x13a   : > { %2170 = vmatpush3.bf16.msra.mxu0 %v2167_v33  ;;  %2198 = vmatpush3.bf16.msra.mxu1 %v2195_v43  ;;  %v969_v33 = vld [vmem:[#allocation10 + $0x50] sm:$0xff]  ;;  %v2255_v43 = vpack.c.bf16 %v978_v41, %v976_v40  ;;  %v1752_v15 = vld [vmem:[%s3546_s17 + $0x1] ss:$0 sm:$0xff]  ;;  %v1193_v41 = vld [vmem:[#allocation13 + $0x8] sm:$0xff] }
 0x13b   : > { %2172 = vmatprep.subr.bf16.mxu0 %v2171_v36  ;;  %2200 = vmatprep.subr.bf16.mxu1 %v2199_v47  ;;  %v1096_v22 = vld [vmem:[#allocation11 + $0x20] sm:$0xff] }
 0x13c   : > { %v1100_v28 = vld [vmem:[#allocation11 + $0x40] sm:$0xff] }
 0x13d   : > { %v1192_v40 = vld [vmem:[#allocation13] sm:$0xff] }
 0x13e   : > { %2174 = vmatpush3.bf16.msra.mxu0 %v2171_v36  ;;  %2202 = vmatpush3.bf16.msra.mxu1 %v2199_v47  ;;  %v2249_v36 = vpack.c.bf16 %v969_v33, %v967_v32  ;;  %v1103_v32 = vld [vmem:[#allocation11 + $0x58] sm:$0xff]  ;;  %v1104_v33 = vld [vmem:[#allocation11 + $0x60] sm:$0xff] }
 0x13f   : > { %2204 = vmatprep.subr.bf16.mxu1 %v2203_v49  ;;  %2208 = vmatprep.subr.bf16.mxu0 %v2207_v53 }
 0x141   : > { %1931 = vmatmul.mubr.f32.vlgmr.msra.gmra.mrb[0].mxu0 %v656_v37  ;;  %v2251_v37 = vpack.c.bf16 %v974_v35, %v972_v34  ;;  %v1105_v35 = vld [vmem:[#allocation11 + $0x68] sm:$0xff] }
 0x142   : > { %2206 = vmatpush3.bf16.msra.mxu1 %v2203_v49  ;;  %2210 = vmatpush3.bf16.msra.mxu0 %v2207_v53  ;;  %v2257_v53 = vpack.c.bf16 %v977_v52, %v975_v51  ;;  %v993_v52 = vlaneseq }
 0x143   : > { %2212 = vmatprep.subr.bf16.mxu0 %v2211_v55  ;;  %2240 = vmatprep.subr.bf16.mxu1 %v2239_v20 }
 0x146   : > { %2214 = vmatpush3.bf16.msra.mxu0 %v2211_v55  ;;  %v982_v55 = vld [vmem:[#allocation10 + $0xb8] sm:$0xff] }
 0x147   : > { %2216 = vmatprep.subr.bf16.mxu0 %v2215_v58  ;;  %v2259_v56 = vpack.c.bf16 %v982_v55, %v980_v54  ;;  %v991_v55 = vld [vmem:[%s3547_s11] sm:$0x3]  ;;  %s3400_s11 = scalar_lea.hbm %s3550_s10, %s1771_s27 }
 0x14a   : > { %2218 = vmatpush3.bf16.msra.mxu0 %v2215_v58  ;;  %v981_v58 = vld [vmem:[#allocation10 + $0xb0] sm:$0xff] }
 0x14b   : > { %2220 = vmatprep.subr.bf16.mxu0 %v2219_v61  ;;  %v2261_v59 = vpack.c.bf16 %v981_v58, %v979_v57 }
 0x14e   : > { %2222 = vmatpush3.bf16.msra.mxu0 %v2219_v61  ;;  %v986_v61 = vld [vmem:[#allocation10 + $0xd8] sm:$0xff] }
 0x14f   : > { %2224 = vmatprep.subr.bf16.mxu0 %v2223_v7 }
 0x152   : > { %2226 = vmatpush3.bf16.msra.mxu0 %v2223_v7  ;;  %v989_v7 = vld [vmem:[#allocation10 + $0xf0] sm:$0xff] }
 0x153   : > { %2228 = vmatprep.subr.bf16.mxu0 %v2227_v10  ;;  %v2269_v8 = vpack.c.bf16 %v989_v7, %v987_v6  ;;  %v1080_v7 = vld [vmem:[%s570_s14] sm:$0xff] }
 0x156   : > { %2230 = vmatpush3.bf16.msra.mxu0 %v2227_v10  ;;  %v1093_v10 = vld [vmem:[#allocation11 + $0x8] sm:$0xff] }
 0x157   : > { %2232 = vmatprep.subr.bf16.mxu0 %v2231_v14  ;;  %v2271_v12 = vpack.c.bf16 %v1093_v10, %v1092_v9  ;;  %v1081_v10 = vld [vmem:[%s570_s14 + $0x8] sm:$0xff] }
 0x15a   : > { %2234 = vmatpush3.bf16.msra.mxu0 %v2231_v14  ;;  %v2275_v14 = vpack.c.bf16 %v1095_v13, %v1094_v11 }
 0x15b   : > { %2236 = vmatprep.subr.bf16.mxu0 %v2235_v16 }
 0x15e   : > { %2238 = vmatpush3.bf16.msra.mxu0 %v2235_v16 }
 0x15f   : > { %2272 = vmatprep.subr.bf16.mxu0 %v2271_v12 }
 0x214   : > { %v1932_v63 = vpop.f32.mrb[0].mxu0 }
 0x215   : > { %v752_v0 = vadd.f32 %v1932_v63, %v1749_v62  ;;  %v746_v1 = vpop.f32.mrb[1].mxu0  ;;  %v2263_v63 = vpack.c.bf16 %v986_v61, %v984_v60 }
 0x216   : > { %v747_v2 = vadd.f32 %v1749_v62, %v746_v1  ;;  %v983_v62 = vld [vmem:[#allocation10 + $0xc0] sm:$0xff]  ;;  %v988_v1 = vld [vmem:[#allocation10 + $0xe8] sm:$0xff] }
 0x218   : > { %2525 = vtanh.f32 %v747_v2  ;;  %v990_v2 = vld [vmem:[#allocation10 + $0xf8] sm:$0xff] }
 0x219   : > { %2527 = vtanh.f32 %v752_v0  ;;  %v985_v0 = vld [vmem:[#allocation10 + $0xd0] sm:$0xff]  ;;  %v2267_v5 = vpack.c.bf16 %v990_v2, %v988_v1 }
 0x222   : > { %v2526_v3 = vpop.eup %2525 }
 0x223   : > { %v2528_v4 = vpop.eup %2527  ;;  %1965 = vmatprep.mubr.f32.mxu1 %v2526_v3  ;;  %v2917_v3 = vmov 0.0  }
 0x224   : > { %1966 = vmatmul.mubr.f32.vlgmr.msra.gmra.mrb[0].mxu1 %v2528_v4  ;;  %v2265_v4 = vpack.c.bf16 %v985_v0, %v983_v62 }
 0x225   : > { %2242 = vmatpush1.bf16.msra.mxu1 %v2241_v24  ;;  %1067 = vmatprep.mubr.f32.mxu1 %v2917_v3  ;;  %v2279_v24 = vpack.c.bf16 %v1097_v23, %v1096_v22  ;;  %v1205_v22 = vld [vmem:[#allocation13 + $0x68] sm:$0xff]  ;;  %v1206_v23 = vld [vmem:[#allocation13 + $0x70] sm:$0xff] }
 0x226   : > { %2244 = vmatprep.subr.bf16.mxu1 %v2243_v25  ;;  %v1098_v25 = vld [vmem:[#allocation11 + $0x30] sm:$0xff] }
 0x227   : > { %v2283_v27 = vpack.c.bf16 %v1099_v26, %v1098_v25  ;;  %v1207_v25 = vld [vmem:[#allocation13 + $0x78] sm:$0xff] }
 0x228   : > { %v2331_v26 = vpack.c.bf16 %v1207_v25, %v1206_v23  ;;  %v1409_v23 = vld [vmem:[#allocation14 + $0x78] sm:$0xff]  ;;  %v1756_v25 = vld [vmem:[%s3549_s15 + $0x1] ss:$0 sm:$0xff] }
 0x229   : > { %2246 = vmatpush1.bf16.msra.mxu1 %v2245_v30  ;;  %v2287_v30 = vpack.c.bf16 %v1101_v29, %v1100_v28  ;;  %v1294_v28 = vld [vmem:[#allocation13 + $0x88] sm:$0xff]  ;;  %v1295_v29 = vld [vmem:[#allocation13 + $0x90] sm:$0xff] }
 0x22a   : > { %2248 = vmatprep.subr.bf16.mxu1 %v2247_v31  ;;  %v1102_v31 = vld [vmem:[#allocation11 + $0x50] sm:$0xff] }
 0x22b   : > { %v2291_v34 = vpack.c.bf16 %v1103_v32, %v1102_v31  ;;  %v1296_v31 = vld [vmem:[#allocation13 + $0x98] sm:$0xff] }
 0x22c   : > { %v2339_v32 = vpack.c.bf16 %v1296_v31, %v1295_v29 }
 0x22d   : > { %2250 = vmatpush1.bf16.msra.mxu1 %v2249_v36  ;;  %v2295_v36 = vpack.c.bf16 %v1105_v35, %v1104_v33  ;;  %v1297_v33 = vld [vmem:[#allocation13 + $0xa0] sm:$0xff] }
 0x22e   : > { %2252 = vmatprep.subr.bf16.mxu1 %v2251_v37  ;;  %v1106_v37 = vld [vmem:[#allocation11 + $0x70] sm:$0xff] }
 0x22f   : > { %v2299_v39 = vpack.c.bf16 %v1107_v38, %v1106_v37  ;;  %v1300_v37 = vld [vmem:[#allocation13 + $0xb8] sm:$0xff] }
 0x231   : > { %2254 = vmatpush1.bf16.msra.mxu1 %v2253_v42  ;;  %v1194_v42 = vld [vmem:[#allocation13 + $0x10] sm:$0xff] }
 0x232   : > { %2256 = vmatprep.subr.bf16.mxu1 %v2255_v43  ;;  %v2303_v43 = vpack.c.bf16 %v1193_v41, %v1192_v40 }
 0x235   : > { %2258 = vmatpush1.bf16.msra.mxu1 %v2257_v53  ;;  %v994_v53 = vshrl.u32 %v993_v52, 7  ;;  %v1305_v52 = vld [vmem:[#allocation13 + $0xe0] sm:$0xff] }
 0x236   : > { %2260 = vmatprep.subr.bf16.mxu1 %v2259_v56 }
 0x237   : > { %v995_v54 = vsub.s32 0, %v994_v53  ;;  %v999_v56 = vsub.s32 1, %v994_v53  ;;  %v1306_v53 = vld [vmem:[#allocation13 + $0xe8] sm:$0xff] }
 0x239   : > { %2262 = vmatpush1.bf16.msra.mxu1 %v2261_v59  ;;  %v996_v57 = vrot.slane %v991_v55, %v995_v54  ;;  %v1000_v58 = vrot.slane %v991_v55, %v999_v56  ;;  %v1307_v54 = vld [vmem:[#allocation13 + $0xf0] sm:$0xff]  ;;  %v2359_v55 = vpack.c.bf16 %v1306_v53, %v1305_v52  ;;  %v1308_v56 = vld [vmem:[#allocation13 + $0xf8] sm:$0xff] }
 0x23a   : > { %2264 = vmatprep.subr.bf16.mxu1 %v2263_v63 }
 0x23d   : > { %2266 = vmatpush1.bf16.msra.mxu1 %v2265_v4 }
 0x23e   : > { %2268 = vmatprep.subr.bf16.mxu1 %v2267_v5 }
 0x241   : > { %2270 = vmatpush1.bf16.msra.mxu1 %v2269_v8 }
 0x242   : > { %2304 = vmatprep.subr.bf16.mxu1 %v2303_v43 }
 0x2f7   : > { %v1967_v45 = vpop.f32.mrb[0].mxu1 }
 0x2f8   : > { %v852_v46 = vadd.f32 %v1967_v45, %v1750_v44  ;;  %v846_v47 = vpop.f32.mrb[1].mxu1 }
 0x2f9   : > { %v847_v48 = vadd.f32 %v1750_v44, %v846_v47  ;;  %v1195_v44 = vld [vmem:[#allocation13 + $0x18] sm:$0xff]  ;;  %v1197_v47 = vld [vmem:[#allocation13 + $0x28] sm:$0xff] }
 0x2fa   : > { %v2307_v45 = vpack.c.bf16 %v1195_v44, %v1194_v42 }
 0x2fb   : > { %2529 = vtanh.f32 %v847_v48 }
 0x2fc   : > { %2531 = vtanh.f32 %v852_v46  ;;  %v1196_v46 = vld [vmem:[#allocation13 + $0x20] sm:$0xff] }
 0x2fd   : > { %v2311_v48 = vpack.c.bf16 %v1197_v47, %v1196_v46  ;;  %v1301_v46 = vld [vmem:[#allocation13 + $0xc0] sm:$0xff]  ;;  %v1302_v47 = vld [vmem:[#allocation13 + $0xc8] sm:$0xff] }
 0x305   : > { %v2530_v49 = vpop.eup %2529 }
 0x306   : > { %v2532_v50 = vpop.eup %2531  ;;  %2000 = vmatprep.mubr.f32.mxu0 %v2530_v49  ;;  %v1198_v49 = vld [vmem:[#allocation13 + $0x30] sm:$0xff] }
 0x307   : > { %2001 = vmatmul.mubr.f32.vlgmr.msra.gmra.mrb[2].mxu0 %v2532_v50  ;;  %v1199_v50 = vld [vmem:[#allocation13 + $0x38] sm:$0xff] }
 0x308   : > { %2274 = vmatpush3.bf16.msra.mxu0 %v2271_v12  ;;  %v2315_v51 = vpack.c.bf16 %v1199_v50, %v1198_v49  ;;  %v1303_v49 = vld [vmem:[#allocation13 + $0xd0] sm:$0xff]  ;;  %v1304_v50 = vld [vmem:[#allocation13 + $0xd8] sm:$0xff] }
 0x309   : > { %2276 = vmatprep.subr.bf16.mxu0 %v2275_v14 }
 0x30c   : > { %2278 = vmatpush3.bf16.msra.mxu0 %v2275_v14 }
 0x30d   : > { %2280 = vmatprep.subr.bf16.mxu0 %v2279_v24 }
 0x310   : > { %2282 = vmatpush3.bf16.msra.mxu0 %v2279_v24 }
 0x311   : > { %2284 = vmatprep.subr.bf16.mxu0 %v2283_v27 }
 0x314   : > { %2286 = vmatpush3.bf16.msra.mxu0 %v2283_v27  ;;  %v1293_v27 = vld [vmem:[#allocation13 + $0x80] sm:$0xff] }
 0x315   : > { %2288 = vmatprep.subr.bf16.mxu0 %v2287_v30 }
 0x318   : > { %2290 = vmatpush3.bf16.msra.mxu0 %v2287_v30  ;;  %v2335_v30 = vpack.c.bf16 %v1294_v28, %v1293_v27 }
 0x319   : > { %2292 = vmatprep.subr.bf16.mxu0 %v2291_v34 }
 0x31c   : > { %2294 = vmatpush3.bf16.msra.mxu0 %v2291_v34  ;;  %v1298_v34 = vld [vmem:[#allocation13 + $0xa8] sm:$0xff] }
 0x31d   : > { %2296 = vmatprep.subr.bf16.mxu0 %v2295_v36  ;;  %v2343_v35 = vpack.c.bf16 %v1298_v34, %v1297_v33 }
 0x320   : > { %2298 = vmatpush3.bf16.msra.mxu0 %v2295_v36  ;;  %v1299_v36 = vld [vmem:[#allocation13 + $0xb0] sm:$0xff] }
 0x321   : > { %2300 = vmatprep.subr.bf16.mxu0 %v2299_v39  ;;  %v2347_v38 = vpack.c.bf16 %v1300_v37, %v1299_v36 }
 0x324   : > { %2302 = vmatpush3.bf16.msra.mxu0 %v2299_v39  ;;  %v1753_v39 = vld [vmem:[%s3548_s8] ss:$0 sm:$0xff]  ;;  %s2789_s8 = sshll.u32 %s2918_s6, 4  ;;  %s2790_s8 = int_to_ptr.vmem [resolvable:$false] %s2789_s8 }
 0x325   : > { %2336 = vmatprep.subr.bf16.mxu0 %v2335_v30  ;;  %p2792_p9 = scmp.lt.s32.totalorder %s3394_s13, %s2790_s8 }
 0x3da   : > { %v2002_v16 = vpop.f32.mrb[2].mxu0 }
 0x3db   : > { %v948_v17 = vpop.f32.mrb[3].mxu0  ;;  %v954_v19 = vadd.f32 %v2002_v16, %v1752_v15  ;;  %v1201_v16 = vld [vmem:[#allocation13 + $0x48] sm:$0xff] }
 0x3dc   : > { %v949_v18 = vadd.f32 %v1752_v15, %v948_v17  ;;  %v1200_v15 = vld [vmem:[#allocation13 + $0x40] sm:$0xff] }
 0x3dd   : > { %v2319_v17 = vpack.c.bf16 %v1201_v16, %v1200_v15  ;;  %v1404_v16 = vld [vmem:[#allocation14 + $0x50] sm:$0xff] }
 0x3de   : > { %2533 = vtanh.f32 %v949_v18  ;;  %v1202_v18 = vld [vmem:[#allocation13 + $0x50] sm:$0xff] }
 0x3df   : > { %2535 = vtanh.f32 %v954_v19  ;;  %v1203_v19 = vld [vmem:[#allocation13 + $0x58] sm:$0xff] }
 0x3e8   : > { %v2534_v20 = vpop.eup %2533 }
 0x3e9   : > { %1068 = vmatmul.mubr.f32.vlgmr.msra.gmra.mrb[2].mxu1 %v2534_v20  ;;  %v2536_v21 = vpop.eup %2535  ;;  %v2323_v20 = vpack.c.bf16 %v1203_v19, %v1202_v18  ;;  %v1406_v19 = vld [vmem:[#allocation14 + $0x60] sm:$0xff] }
 0x3ea   : > { %1073 = vmatprep.mubr.f32.mxu1 %v2917_v3  ;;  %2306 = vmatpush3.bf16.msra.mxu1 %v2303_v43 }
 0x3eb   : > { %2308 = vmatprep.subr.bf16.mxu1 %v2307_v45 }
 0x3ed   : > { %1074 = vmatmul.mubr.f32.gmra.mrb[4].mxu1 %v2536_v21  ;;  %v1204_v21 = vld [vmem:[#allocation13 + $0x60] sm:$0xff] }
 0x3ee   : > { %2310 = vmatpush3.bf16.msra.mxu1 %v2307_v45  ;;  %v2327_v24 = vpack.c.bf16 %v1205_v22, %v1204_v21  ;;  %v1408_v21 = vld [vmem:[#allocation14 + $0x70] sm:$0xff] }
 0x3ef   : > { %2312 = vmatprep.subr.bf16.mxu1 %v2311_v48 }
 0x3f2   : > { %2314 = vmatpush3.bf16.msra.mxu1 %v2311_v48  ;;  %v2351_v48 = vpack.c.bf16 %v1302_v47, %v1301_v46 }
 0x3f3   : > { %2316 = vmatprep.subr.bf16.mxu1 %v2315_v51 }
 0x3f6   : > { %2318 = vmatpush3.bf16.msra.mxu1 %v2315_v51  ;;  %v2355_v51 = vpack.c.bf16 %v1304_v50, %v1303_v49 }
 0x3f7   : > { %2320 = vmatprep.subr.bf16.mxu1 %v2319_v17 }
 0x3fa   : > { %2322 = vmatpush3.bf16.msra.mxu1 %v2319_v17  ;;  %v1405_v17 = vld [vmem:[#allocation14 + $0x58] sm:$0xff] }
 0x3fb   : > { %2324 = vmatprep.subr.bf16.mxu1 %v2323_v20  ;;  %v2387_v18 = vpack.c.bf16 %v1405_v17, %v1404_v16 }
 0x3fe   : > { %2326 = vmatpush3.bf16.msra.mxu1 %v2323_v20  ;;  %v1407_v20 = vld [vmem:[#allocation14 + $0x68] sm:$0xff] }
 0x3ff   : > { %2328 = vmatprep.subr.bf16.mxu1 %v2327_v24  ;;  %v2391_v22 = vpack.c.bf16 %v1407_v20, %v1406_v19 }
 0x402   : > { %2330 = vmatpush3.bf16.msra.mxu1 %v2327_v24  ;;  %v2395_v24 = vpack.c.bf16 %v1409_v23, %v1408_v21 }
 0x403   : > { %2332 = vmatprep.subr.bf16.mxu1 %v2331_v26 }
 0x406   : > { %2334 = vmatpush3.bf16.msra.mxu1 %v2331_v26 }
 0x4bc   : > { %v1069_v59 = vpop.f32.mrb[2].mxu1 }
 0x4bd   : > { %v1070_v60 = vadd.f32 %v1069_v59, %v996_v57  ;;  %v1071_v61 = vpop.f32.mrb[3].mxu1  ;;  %v1395_v59 = vld [vmem:[#allocation14 + $0x8] sm:$0xff] }
 0x4be   : > { %v1072_v62 = vadd.f32 %v1071_v61, %v1000_v58 }
 0x4bf   : > { %1498 = vst [vmem:[%s3374_s5] sm:$0xff] %v1070_v60 }
 0x4c0   : > { %v1082_v63 = vmul.f32 0.5, %v1072_v62  ;;  %1499 = vst [vmem:[%s3374_s5 + $0x8] sm:$0xff] %v1072_v62  ;;  %v1075_v0 = vpop.f32.mrb[4].mxu1  ;;  %v1397_v62 = vld [vmem:[#allocation14 + $0x18] sm:$0xff] }
 0x4c1   : > { %v1076_v1 = vadd.f32 %v1075_v0, %v996_v57  ;;  %v1077_v2 = vpop.f32.mrb[5].mxu1  ;;  %v2363_v57 = vpack.c.bf16 %v1308_v56, %v1307_v54  ;;  %v1398_v0 = vld [vmem:[#allocation14 + $0x20] sm:$0xff] }
 0x4c2   : > { %v1084_v3 = vmul.f32 1.442695, %v1082_v63  ;;  %v1078_v4 = vadd.f32 %v1077_v2, %v1000_v58  ;;  %v1394_v58 = vld [vmem:[#allocation14] sm:$0xff] }
 0x4c3   : > { %1500 = vst [vmem:[%s3374_s5 + $0x10] sm:$0xff] %v1076_v1  ;;  %v2367_v61 = vpack.c.bf16 %v1395_v59, %v1394_v58 }
 0x4c4   : > { %2537 = vpow2.f32 %v1084_v3  ;;  %v1083_v5 = vmul.f32 0.5, %v1078_v4  ;;  %1501 = vst [vmem:[%s3374_s5 + $0x18] sm:$0xff] %v1078_v4  ;;  %v1400_v3 = vld [vmem:[#allocation14 + $0x30] sm:$0xff]  ;;  %v1401_v4 = vld [vmem:[#allocation14 + $0x38] sm:$0xff]  ;;  %s2791_s5 = scalar_lea.vmem %s2790_s8, 1024 }
 0x4c5   : > { %2368 = vmatprep.subr.bf16.mxu1 %v2367_v61  ;;  %p2793_p8 = scmp.lt.s32.totalorder %s2791_s5, %s2785_s2 }
 0x4c6   : > { %v1086_v6 = vmul.f32 1.442695, %v1083_v5  ;;  %v2379_v5 = vpack.c.bf16 %v1401_v4, %v1400_v3 }
 0x4c7   : > { %p2794_p11 = por %p2793_p8, %p2792_p9 }
 0x4c8   : > { %2539 = vpow2.f32 %v1086_v6  ;;  %v1754_v6 = vld [vmem:[%s3549_s15] ss:$0 sm:$0xff] }
 0x4c9   : > { %p2795_p3 = pnand %p2794_p11, %p2788_p7 }
 0x4ce   : > { %v2538_v8 = vpop.eup %2537 }
 0x4cf   : > { %v1088_v9 = vmul.f32 %v2538_v8, %v1080_v7 }
 0x4d1   : > { %v1090_v11 = vadd.f32 %v1088_v9, %v1070_v60  ;;  %v1396_v60 = vld [vmem:[#allocation14 + $0x10] sm:$0xff] }
 0x4d2   : > { %v2540_v12 = vpop.eup %2539  ;;  %v2371_v63 = vpack.c.bf16 %v1397_v62, %v1396_v60 }
 0x4d3   : > { %2035 = vmatprep.mubr.f32.mxu0 %v1090_v11  ;;  %v1089_v13 = vmul.f32 %v2540_v12, %v1081_v10 }
 0x4d5   : > { %v1091_v14 = vadd.f32 %v1089_v13, %v1076_v1  ;;  %v1399_v1 = vld [vmem:[#allocation14 + $0x28] sm:$0xff]  ;;  %v1402_v13 = vld [vmem:[#allocation14 + $0x40] sm:$0xff] }
 0x4d6   : > { %v2375_v2 = vpack.c.bf16 %v1399_v1, %v1398_v0 }
 0x4d7   : > { %2036 = vmatmul.mubr.f32.vlgmr.msra.gmra.mrb[4].mxu0 %v1091_v14  ;;  %v1403_v14 = vld [vmem:[#allocation14 + $0x48] sm:$0xff] }
 0x4d8   : > { %2338 = vmatpush3.bf16.msra.mxu0 %v2335_v30  ;;  %v2383_v15 = vpack.c.bf16 %v1403_v14, %v1402_v13 }
 0x4d9   : > { %2340 = vmatprep.subr.bf16.mxu0 %v2339_v32 }
 0x4dc   : > { %2342 = vmatpush3.bf16.msra.mxu0 %v2339_v32 }
 0x4dd   : > { %2344 = vmatprep.subr.bf16.mxu0 %v2343_v35 }
 0x4e0   : > { %2346 = vmatpush3.bf16.msra.mxu0 %v2343_v35 }
 0x4e1   : > { %2348 = vmatprep.subr.bf16.mxu0 %v2347_v38 }
 0x4e4   : > { %2350 = vmatpush3.bf16.msra.mxu0 %v2347_v38 }
 0x4e5   : > { %2352 = vmatprep.subr.bf16.mxu0 %v2351_v48 }
 0x4e8   : > { %2354 = vmatpush3.bf16.msra.mxu0 %v2351_v48 }
 0x4e9   : > { %2356 = vmatprep.subr.bf16.mxu0 %v2355_v51 }
 0x4ec   : > { %2358 = vmatpush3.bf16.msra.mxu0 %v2355_v51 }
 0x4ed   : > { %2360 = vmatprep.subr.bf16.mxu0 %v2359_v55 }
 0x4f0   : > { %2362 = vmatpush3.bf16.msra.mxu0 %v2359_v55 }
 0x4f1   : > { %2364 = vmatprep.subr.bf16.mxu0 %v2363_v57 }
 0x4f4   : > { %2366 = vmatpush3.bf16.msra.mxu0 %v2363_v57 }
 0x5aa   : > { %v2037_v40 = vpop.f32.mrb[4].mxu0 }
 0x5ab   : > { %v1187_v41 = vadd.f32 %v2037_v40, %v1753_v39  ;;  %v1181_v42 = vpop.f32.mrb[5].mxu0 }
 0x5ac   : > { %v1182_v43 = vadd.f32 %v1753_v39, %v1181_v42 }
 0x5ae   : > { %2541 = vtanh.f32 %v1182_v43 }
 0x5af   : > { %2543 = vtanh.f32 %v1187_v41 }
 0x5b8   : > { %v2542_v44 = vpop.eup %2541 }
 0x5b9   : > { %v2544_v45 = vpop.eup %2543  ;;  %2070 = vmatprep.mubr.f32.mxu1 %v2542_v44 }
 0x5ba   : > { %2071 = vmatmul.mubr.f32.vlgmr.msra.gmra.mrb[6].mxu1 %v2544_v45 }
 0x5bb   : > { %2370 = vmatpush3.bf16.msra.mxu1 %v2367_v61 }
 0x5bc   : > { %2372 = vmatprep.subr.bf16.mxu1 %v2371_v63 }
 0x5bf   : > { %2374 = vmatpush3.bf16.msra.mxu1 %v2371_v63 }
 0x5c0   : > { %2376 = vmatprep.subr.bf16.mxu1 %v2375_v2 }
 0x5c3   : > { %2378 = vmatpush3.bf16.msra.mxu1 %v2375_v2 }
 0x5c4   : > { %2380 = vmatprep.subr.bf16.mxu1 %v2379_v5 }
 0x5c7   : > { %2382 = vmatpush3.bf16.msra.mxu1 %v2379_v5 }
 0x5c8   : > { %2384 = vmatprep.subr.bf16.mxu1 %v2383_v15 }
 0x5cb   : > { %2386 = vmatpush3.bf16.msra.mxu1 %v2383_v15 }
 0x5cc   : > { %2388 = vmatprep.subr.bf16.mxu1 %v2387_v18 }
 0x5cf   : > { %2390 = vmatpush3.bf16.msra.mxu1 %v2387_v18 }
 0x5d0   : > { %2392 = vmatprep.subr.bf16.mxu1 %v2391_v22 }
 0x5d3   : > { %2394 = vmatpush3.bf16.msra.mxu1 %v2391_v22 }
 0x5d4   : > { %2396 = vmatprep.subr.bf16.mxu1 %v2395_v24 }
 0x5d7   : > { %2398 = vmatpush3.bf16.msra.mxu1 %v2395_v24 }
 0x68d   : > { %v2072_v7 = vpop.f32.mrb[6].mxu1 }
 0x68e   : > { %v1287_v8 = vadd.f32 %v2072_v7, %v1754_v6  ;;  %v1281_v9 = vpop.f32.mrb[7].mxu1 }
 0x68f   : > { %v1282_v10 = vadd.f32 %v1754_v6, %v1281_v9 }
 0x691   : > { %2545 = vtanh.f32 %v1282_v10 }
 0x692   : > { %2547 = vtanh.f32 %v1287_v8 }
 0x69b   : > { %v2546_v11 = vpop.eup %2545 }
 0x69c   : > { %v2548_v12 = vpop.eup %2547  ;;  %2105 = vmatprep.mubr.f32.mxu0 %v2546_v11 }
 0x69d   : > { %2106 = vmatmul.mubr.f32.vlgmr.msra.gmra.mrb[6].mxu0 %v2548_v12 }
 0x770   : > { %v2107_v26 = vpop.f32.mrb[6].mxu0 }
 0x771   : > { %v1389_v27 = vadd.f32 %v2107_v26, %v1756_v25  ;;  %v1383_v28 = vpop.f32.mrb[7].mxu0 }
 0x772   : > { %v1384_v29 = vadd.f32 %v1756_v25, %v1383_v28 }
 0x774   : > { %2549 = vtanh.f32 %v1384_v29 }
 0x775   : > { %2551 = vtanh.f32 %v1389_v27 }
 0x77e   : > { %v2550_v30 = vpop.eup %2549 }
 0x77f   : > { %v2552_v31 = vpop.eup %2551  ;;  %2140 = vmatprep.mubr.f32.mxu1 %v2550_v30 }
 0x780   : > { %2141 = vmatmul.mubr.f32.vlgmr.msra.gmra.mrb[8].mxu1 %v2552_v31 }
 0x781   : > { %2798 = shalt.err (!%p2795_p3)
}
 0x782   : > { %s2799_s25 = scalar_lea.hbm %s3400_s11, 512  ;;  %s2803_s23 = scalar_lea.hbm %s3550_s10, 1024 }
 0x783   : > { %p2800_p12 = scmp.ne.s32.totalorder %s3400_s11, %s2799_s25  ;;  %p2804_p0 = scmp.lt.u32.totalorder %s3400_s11, %s3550_s10 }
 0x784   : > { %p2805_p6 = scmp.lt.u32.totalorder %s2803_s23, %s2799_s25  ;;  %p2807_p4 = scmp.lt.u32.totalorder %s2799_s25, %s3400_s11 }
 0x785   : > { %p2801_p1 = pnand %p2800_p12, %p3551_p10 }
 0x786   : > { %p2806_p2 = por %p2805_p6, %p2804_p0 }
 0x787   : > { %p2802_p13 = pneg %p2801_p1 }
 0x788   : > { %p2808_p5 = por %p2807_p4, %p2806_p2 }
 0x78a   : > { %p2809_p7 = pnand %p2808_p5, %p2802_p13 }
 0x78c   : > { %2812 = shalt.err (!%p2809_p7)
}
 0x78d   : > { %s2919_s9 = smov 256   ;;  %s2920_s2 = smov 16  }
 0x78e   : > { %2428 = dma.vmem_to_hbm [thread:$0]  (%p3551_p10), %s3394_s13, 512, %s3400_s11, %s1508_s16, %s2919_s9, %s2919_s9, %s2920_s2  }
 0x78f   : > { %s3552_s5 = sld [smem:[#allocation37_spill]]  ;;  %s1769_s25 = sshll.u32 %s3025_s24, 8 }
 0x790   : > { %s643_s14 = scalar_lea.vmem [#allocation16], %s3327_s4  ;;  %s3553_s13 = sld [smem:[#allocation38_spill]] }
 0x791   : > { %s1521_s29 = sshll.u32 %s643_s14, 4  ;;  %s1503_s16 = scalar_lea.sflag [#allocation4], %s3324_s28  ;;  %s3436_s29 = int_to_ptr.vmem [resolvable:$true] %s1521_s29 }
 0x792   : > { %s2813_s12 = scalar_lea.vmem %s3436_s29, 256  ;;  %s2921_s24 = smov [#allocation16]  }
 0x793   : > { %p2814_p9 = scmp.ne.s32.totalorder %s3436_s29, %s2813_s12  ;;  %s2817_s4 = sshll.u32 %s2921_s24, 4  ;;  %s2818_s4 = int_to_ptr.vmem [resolvable:$false] %s2817_s4 }
 0x794   : > { %s2819_s9 = scalar_lea.vmem %s2818_s4, 512  ;;  %p2820_p3 = scmp.lt.s32.totalorder %s3436_s29, %s2818_s4 }
 0x795   : > { %v1757_v32 = vld [vmem:[%s3552_s5] ss:$0 sm:$0xff]  ;;  %p2815_p8 = pnand %p2814_p9, %p3551_p10  ;;  %p2821_p12 = scmp.lt.s32.totalorder %s2819_s9, %s2813_s12 }
 0x796   : > { %s3434_s11 = scalar_lea.hbm %s3553_s13, %s1769_s25 }
 0x797   : > { %p2816_p11 = pneg %p2815_p8  ;;  %p2822_p1 = por %p2821_p12, %p2820_p3 }
 0x799   : > { %p2823_p13 = pnand %p2822_p1, %p2816_p11 }
 0x853   : > { %v2142_v33 = vpop.f32.mrb[8].mxu1 }
 0x854   : > { %v1489_v34 = vadd.f32 %v2142_v33, %v1757_v32  ;;  %v1483_v35 = vpop.f32.mrb[9].mxu1 }
 0x855   : > { %v1484_v36 = vadd.f32 %v1757_v32, %v1483_v35 }
 0x856   : > { %v1494_v37 = vmul.f32 1.442695, %v1489_v34 }
 0x857   : > { %v1492_v38 = vmul.f32 1.442695, %v1484_v36 }
 0x858   : > { %2553 = vpow2.f32 %v1494_v37 }
 0x859   : > { %2555 = vpow2.f32 %v1492_v38 }
 0x862   : > { %v2554_v39 = vpop.eup %2553 }
 0x863   : > { %v2556_v40 = vpop.eup %2555  ;;  %1497 = vst [vmem:[%s643_s14 + $0x8] sm:$0xff] %v2554_v39 }
 0x864   : > { %1496 = vst [vmem:[%s643_s14] sm:$0xff] %v2556_v40 }
 0x865   : > { %2826 = shalt.err (!%p2823_p13)
}
 0x866   : > { %s2827_s2 = scalar_lea.hbm %s3434_s11, 256  ;;  %s2831_s5 = scalar_lea.hbm %s3553_s13, 512 }
 0x867   : > { %p2828_p0 = scmp.ne.s32.totalorder %s3434_s11, %s2827_s2  ;;  %p2832_p4 = scmp.lt.u32.totalorder %s3434_s11, %s3553_s13 }
 0x868   : > { %p2833_p5 = scmp.lt.u32.totalorder %s2831_s5, %s2827_s2  ;;  %p2835_p9 = scmp.lt.u32.totalorder %s2827_s2, %s3434_s11 }
 0x869   : > { %p2829_p6 = pnand %p2828_p0, %p3551_p10 }
 0x86a   : > { %p2834_p7 = por %p2833_p5, %p2832_p4 }
 0x86b   : > { %p2830_p2 = pneg %p2829_p6 }
 0x86c   : > { %p2836_p8 = por %p2835_p9, %p2834_p7 }
 0x86e   : > { %p2837_p11 = pnand %p2836_p8, %p2830_p2 }
 0x870   : > { %2840 = shalt.err (!%p2837_p11)
}
 0x871   : > { %s2922_s23 = smov 128   ;;  %s2923_s27 = smov 8  }
 0x872   : > { %2427 = dma.vmem_to_hbm [thread:$0]  (%p3551_p10), %s3436_s29, 256, %s3434_s11, %s1503_s16, %s2922_s23, %s2922_s23, %s2923_s27  }
 0x873 PF: > { %s1553_s12 = sand.u32 1, %s2891_s18   ;;  %p3554_p3 = scmp.ne.s32.totalorder %s3535_s7, 0 }
 0x874   : > { %p3555_p12 = scmp.ge.s32.totalorder %s2903_s21, 2  ;;  %s1554_s24 = scalar_lea.sflag [#allocation4], %s1553_s12 }
 0x876   : > { %p2458_p1 = pnand %p3555_p12, %p3554_p3 }
 0x878   : > { %2882 = dma.done.wait (!%p2458_p1), %s1554_s24, 256  }
 0x879   : > { %2884 = vsyncadd (!%p2458_p1), %s1554_s24, 4294967040  ;;  %s1563_s4 = scalar_lea.sflag [#allocation18], %s1553_s12 }
 0x87a   : > { %2886 = dma.done.wait (!%p2458_p1), %s1563_s4, 512  }
 0x87b   : > { %2888 = vsyncadd (!%p2458_p1), %s1563_s4, 4294966784  ;;  %p38_p10 = scmp.ge.s32.totalorder %s3202_s26, 4   ;;  %s3556_s18 = smov %s2895_s19 }
 0x87c   : > { %s3557_s19 = smov %s2899_s20  ;;  %s3558_s20 = smov %s3213_s22 }
 0x87d   : > { %s3559_s21 = smov %s3202_s26  ;;  %40 = sbr.rel (!%p38_p10) target bundleno = 26 (0x1a), region = 179 }
 0x884   :  { %1568 = vsyncpa [#allocation3], 1 }
 0x885   :  { %1570 = vsyncpa [#allocation3 + $0x1], 1 }
 0x886   :  { %1571 = vsyncpa [#allocation6], 1 }
 0x887   :  { %1573 = vsyncpa [#allocation6 + $0x1], 1 }
 0x888   :  { %1574 = vsyncpa [#allocation9], 1 }
 0x889   :  { %1575 = vsyncpa [#allocation12], 1 }
 0x88a   :  { %1576 = vsyncpa [#allocation15], 1 }
 0x88b   :  { %1577 = vsyncpa [#allocation4], 1 }
 0x88c   :  { %1579 = vsyncpa [#allocation4 + $0x1], 1 }
 0x88d   :  { %1580 = vsyncpa [#allocation18], 1 }
 0x88e   :  { %1582 = vsyncpa [#allocation18 + $0x1], 1 }

</bundles_post_ra>
